<compile_context>
chip_gen: v6e
topology: v6e:2x2x1
jax: 0.10.0
libtpu: 0.0.40
codegen_flags: <defaults>
</compile_context>

<pallas_src>
import numpy as np
import jax
import jax.numpy as jnp
from jax import lax
from jax.experimental import pallas as pl
from jax.experimental.pallas import tpu as pltpu

EPS = 1e-5
CARDINALITY = 16
SE_REDUCTION = 16
LANE = 128
HIGHEST = jax.lax.Precision.HIGHEST   # used only in the pure-JAX reference


# --------------------------- fused Pallas kernel ----------------------------

def _make_fused_kernel(metas, b_step, H, W):
    """Kernel body for one grid step (b_step images, all bottlenecks fused)."""
    M = b_step * H * W
    HW = H * W
    f32 = jnp.float32

    def kernel(x_ref, msk_ref, w_ref, c_ref, o_ref):
        cur = x_ref[...]                               # (M, Cin0) f32
        masks = msk_ref[...]                           # (M, 4) f32
        m_wlo = masks[:, 0:1]                          # valid to read w-1
        m_whi = masks[:, 1:2]                          # valid to read w+1
        m_hlo = masks[:, 2:3]                          # valid to read h-1
        m_hhi = masks[:, 3:4]                          # valid to read h+1

        for mt in metas:                               # static unroll
            cin, P, cout = mt['cin'], mt['p'], mt['cout']
            cur_b = cur.astype(jnp.bfloat16)           # single bf16 cast / block

            # ---- conv1 (1x1) [+ fused 1x1 downsample] : one MXU matmul -------
            # BN scales are already folded into the bf16 weights; bias only.
            wa = w_ref[mt['wa_r']:mt['wa_r'] + cin, :]          # (cin, 128) bf16
            ba = c_ref[mt['ba_r']:mt['ba_r'] + 1, :]            # (1, 128) f32
            ya = jnp.dot(cur_b, wa, preferred_element_type=f32) + ba
            if mt['fuse']:
                res = ya[:, :cout]                              # downsample + BN
                y = jnp.maximum(ya[:, cout:cout + P], 0.0)      # conv1+BN1+ReLU
            else:
                y = jnp.maximum(ya[:, :P], 0.0)
                if mt['ds']:
                    wd = w_ref[mt['wd_r']:mt['wd_r'] + cin, :]
                    bd = c_ref[mt['bd_r']:mt['bd_r'] + 1, :cout]
                    res = jnp.dot(cur_b, wd,
                                  preferred_element_type=f32)[:, :cout] + bd
                else:
                    res = cur

            # ---- conv2: depthwise 3x3 (+folded BN) via shifted VPU MACs ------
            w2 = c_ref[mt['w2_r']:mt['w2_r'] + 9, :P]           # (9, P) taps*s2
            b2 = c_ref[mt['b2_r']:mt['b2_r'] + 1, :P]           # (1, P)
            z1 = jnp.zeros((1, P), f32)
            zW = jnp.zeros((W, P), f32)
            # +-1 row shifts along M read the w+-1 neighbour (masked at w edges)
            y_e = jnp.concatenate([y[1:], z1], axis=0) * m_whi   # reads w+1
            y_w = jnp.concatenate([z1, y[:-1]], axis=0) * m_wlo  # reads w-1

            def horiz(kh):                                       # sum over kw
                k0 = 3 * kh
                return (y_w * w2[k0:k0 + 1, :]
                        + y * w2[k0 + 1:k0 + 2, :]
                        + y_e * w2[k0 + 2:k0 + 3, :])

            acc = horiz(1)                                                     # dh =  0
            acc = acc + jnp.concatenate([horiz(2)[W:], zW], axis=0) * m_hhi    # dh = +1
            acc = acc + jnp.concatenate([zW, horiz(0)[:-W]], axis=0) * m_hlo   # dh = -1
            y = jnp.maximum(acc + b2, 0.0)                       # (M, P)

            # ---- conv3 (1x1) + folded BN ------------------------------------
            w3 = w_ref[mt['w3_r']:mt['w3_r'] + P, :]             # (P, 128) bf16
            b3 = c_ref[mt['b3_r']:mt['b3_r'] + 1, :cout]         # (1, cout)
            z = jnp.dot(y.astype(jnp.bfloat16), w3,
                        preferred_element_type=f32)[:, :cout] + b3

            # ---- squeeze-excite: per-image, on VPU/XLU/EUP (no MXU trips) ----
            if mt['se']:
                cr = mt['cr']
                se1 = c_ref[mt['se1_r']:mt['se1_r'] + cr, :cout]  # (cr, cout)
                se2 = c_ref[mt['se2_r']:mt['se2_r'] + cr, :cout]  # (cr, cout)
                parts = []
                for b in range(b_step):                           # static unroll
                    zb = z[b * HW:(b + 1) * HW, :]                # (HW, cout)
                    pooled = jnp.mean(zb, axis=0, keepdims=True)  # (1, cout)
                    hfc = jnp.maximum(
                        jnp.sum(pooled * se1, axis=1, keepdims=True), 0.0)  # (cr, 1)
                    gate = jax.nn.sigmoid(
                        jnp.sum(hfc * se2, axis=0, keepdims=True))          # (1, cout)
                    parts.append(zb * gate)
                z = parts[0] if b_step == 1 else jnp.concatenate(parts, axis=0)

            # ---- residual add + ReLU ----------------------------------------
            cur = jnp.maximum(z + res, 0.0)                       # (M, cout)

        o_ref[...] = cur

    return kernel


# --------------------------- parameter packing -------------------------------

class _SlabBuilder:
    """Stacks (rows, <=128) chunks into one (R, 128) slab, row-aligned."""

    def __init__(self, row_align):
        self._chunks = []
        self._rows = 0
        self._align = row_align

    def add(self, a):
        a = np.asarray(a, np.float32)
        assert a.ndim == 2 and a.shape[1] <= LANE
        r = ((a.shape[0] + self._align - 1) // self._align) * self._align
        buf = np.zeros((r, LANE), np.float32)
        buf[:a.shape[0], :a.shape[1]] = a
        off = self._rows
        self._chunks.append(buf)
        self._rows += r
        return off

    def build(self, dtype):
        return jnp.asarray(np.concatenate(self._chunks, axis=0), dtype=dtype)


def pack_params(blocks):
    """Fold BN scales into weights (f32, before bf16 cast), fuse the 1x1
    downsample with conv1, and pack everything into two slabs:
    a bf16 matmul-weight slab and an f32 epilogue-constant slab."""
    wsb = _SlabBuilder(16)      # bf16 tiles are (16, 128)
    csb = _SlabBuilder(8)       # f32 tiles are (8, 128)
    metas = []
    for p in blocks:
        P, cin = p['conv1_w'].shape[0], p['conv1_w'].shape[1]
        cout = p['conv3_w'].shape[0]
        gs = p['conv2_w'].shape[1]
        # With planes//4 == cardinality the grouped 3x3 conv is depthwise.
        # TODO(synk): grouped conv with group size > 1 is not implemented.
        assert gs == 1, "only depthwise (group size 1) grouped conv supported"
        assert cout <= LANE and P <= LANE

        s1, b1 = p['bn1']
        s2, b2 = p['bn2']
        s3, b3 = p['bn3']
        w1 = p['conv1_w'][:, :, 0, 0].T * s1[None, :]           # (cin, P)  *BN1
        w3 = p['conv3_w'][:, :, 0, 0].T * s3[None, :]           # (P, cout) *BN3
        w2 = (np.transpose(p['conv2_w'][:, 0, :, :], (1, 2, 0)).reshape(9, P)
              * s2[None, :])                                     # (9, P)    *BN2

        ds = 'ds_w' in p
        se = 'se_fc1' in p
        if ds:
            sd, bd = p['ds_bn']
            wd = p['ds_w'][:, :, 0, 0].T * sd[None, :]           # (cin, cout)
        fuse = ds and (cout + P <= LANE)
        if fuse:                                                 # [downsample|conv1]
            wa = np.concatenate([wd, w1], axis=1)
            ba = np.concatenate([bd, b1])[None, :]
        else:
            wa = w1
            ba = b1[None, :]

        mt = dict(cin=cin, p=P, cout=cout, ds=ds, se=se, fuse=fuse)
        mt['wa_r'] = wsb.add(wa)
        mt['w3_r'] = wsb.add(w3)
        if ds and not fuse:
            mt['wd_r'] = wsb.add(wd)
        mt['ba_r'] = csb.add(ba)
        if ds and not fuse:
            mt['bd_r'] = csb.add(bd[None, :])
        mt['w2_r'] = csb.add(w2)
        mt['b2_r'] = csb.add(b2[None, :])
        mt['b3_r'] = csb.add(b3[None, :])
        if se:
            mt['cr'] = p['se_fc1'].shape[0]
            mt['se1_r'] = csb.add(p['se_fc1'])                   # (cout//R, cout)
            mt['se2_r'] = csb.add(p['se_fc2'].T)                 # (cout//R, cout)
        metas.append(mt)
    return wsb.build(jnp.bfloat16), csb.build(jnp.float32), metas


# -------------------------------- wrapper ------------------------------------

def _num_grid_splits(batch):
    """2 'parallel' grid steps on 2-TensorCore chips (v4/v5p/v7x); otherwise a
    single fused step (v5e/v6e: no per-step overhead, better MXU row fill)."""
    try:
        kind = jax.devices()[0].device_kind.lower()
    except Exception:
        kind = ""
    two_tc = ("v4" in kind) or ("v5p" in kind) or ("v7" in kind)
    return 2 if (two_tc and batch >= 2 and batch % 2 == 0) else 1


def _boundary_masks(batch, H, W):
    """(B*H*W, 4) f32: [w>0, w<W-1, h>0, h<H-1] per flattened (b,h,w) row."""
    h = np.broadcast_to(np.arange(H)[None, :, None], (batch, H, W))
    w = np.broadcast_to(np.arange(W)[None, None, :], (batch, H, W))
    m = np.stack([w > 0, w < W - 1, h > 0, h < H - 1], axis=-1)
    return jnp.asarray(m.reshape(batch * H * W, 4).astype(np.float32))


def decoder_block_forward(x_nchw, wslab, cslab, metas):
    """x_nchw: (B, Cin, H, W) -> PixelShuffle(2) output (B, Cout//4, 2H, 2W)."""
    x = jnp.transpose(x_nchw, (0, 2, 3, 1)).astype(jnp.float32)   # NCHW -> NHWC
    B, H, W, Cin = x.shape
    Cout = metas[-1]['cout']

    nsplit = _num_grid_splits(B)
    b_step = B // nsplit
    m_total, m_step = B * H * W, b_step * H * W

    x2 = x.reshape(m_total, Cin)
    masks = _boundary_masks(B, H, W)

    kernel = _make_fused_kernel(metas, b_step, H, W)
    out = pl.pallas_call(
        kernel,
        out_shape=jax.ShapeDtypeStruct((m_total, Cout), jnp.float32),
        grid=(nsplit,),
        in_specs=[
            pl.BlockSpec((m_step, Cin), lambda i: (i, 0)),
            pl.BlockSpec((m_step, 4), lambda i: (i, 0)),
            pl.BlockSpec(wslab.shape, lambda i: (0, 0)),
            pl.BlockSpec(cslab.shape, lambda i: (0, 0)),
        ],
        out_specs=pl.BlockSpec((m_step, Cout), lambda i: (i, 0)),
        compiler_params=pltpu.CompilerParams(
            dimension_semantics=("parallel",)),
    )(x2, masks, wslab, cslab)

    # PixelShuffle(2) in NHWC: pure data movement (wrapper-side glue).
    cps = Cout // 4
    out = out.reshape(B, H, W, cps, 2, 2)
    out = jnp.transpose(out, (0, 1, 4, 2, 5, 3)).reshape(B, 2 * H, 2 * W, cps)
    return jnp.transpose(out, (0, 3, 1, 2))                        # NHWC -> NCHW


# ------------------------- parameter construction ----------------------------

def _spectral_normalize(w):
    mat = w.reshape(w.shape[0], -1)
    sigma = np.linalg.svd(mat, compute_uv=False)[0]
    return (w / sigma).astype(np.float32)


def _bn_params(rng, c):
    gamma = (1.0 + 0.1 * rng.standard_normal(c)).astype(np.float32)
    beta = (0.1 * rng.standard_normal(c)).astype(np.float32)
    rmean = (0.1 * rng.standard_normal(c)).astype(np.float32)
    rvar = (1.0 + 0.1 * rng.standard_normal(c) ** 2).astype(np.float32)
    scale = (gamma / np.sqrt(rvar + EPS)).astype(np.float32)
    bias = (beta - rmean * scale).astype(np.float32)
    return scale, bias


def init_bottleneck(rng, inplanes, p_width, senet):
    P = p_width
    c_out = 4 * P
    prm = {}
    prm['conv1_w'] = _spectral_normalize(
        rng.standard_normal((P, inplanes, 1, 1)).astype(np.float32))
    prm['bn1'] = _bn_params(rng, P)
    prm['conv2_w'] = _spectral_normalize(
        rng.standard_normal((P, P // CARDINALITY, 3, 3)).astype(np.float32))
    prm['bn2'] = _bn_params(rng, P)
    prm['conv3_w'] = _spectral_normalize(
        rng.standard_normal((c_out, P, 1, 1)).astype(np.float32))
    prm['bn3'] = _bn_params(rng, c_out)
    if senet:
        prm['se_fc1'] = (0.1 * rng.standard_normal(
            (c_out // SE_REDUCTION, c_out))).astype(np.float32)
        prm['se_fc2'] = (0.1 * rng.standard_normal(
            (c_out, c_out // SE_REDUCTION))).astype(np.float32)
    if inplanes != c_out:
        prm['ds_w'] = _spectral_normalize(
            rng.standard_normal((c_out, inplanes, 1, 1)).astype(np.float32))
        prm['ds_bn'] = _bn_params(rng, c_out)
    return prm


def init_decoder_block(seed, inplanes, planes, block_num, senet):
    rng = np.random.default_rng(seed)
    p_width = planes // 4
    blocks = [init_bottleneck(rng, inplanes, p_width, senet)]
    for _ in range(1, block_num):
        blocks.append(init_bottleneck(rng, planes, p_width, senet))
    return blocks


# ------------------------ pure-JAX reference (NCHW) ---------------------------

def ref_decoder_block(x_nchw, blocks):
    def bn(x, sb):
        s, b = jnp.asarray(sb[0]), jnp.asarray(sb[1])
        return x * s[None, :, None, None] + b[None, :, None, None]

    def conv(x, w, pad, groups=1):
        return lax.conv_general_dilated(
            x, jnp.asarray(w), (1, 1), pad,
            dimension_numbers=('NCHW', 'OIHW', 'NCHW'),
            feature_group_count=groups, precision=HIGHEST)

    out = x_nchw.astype(jnp.float32)
    for p in blocks:
        res = out
        y = jax.nn.relu(bn(conv(out, p['conv1_w'], 'VALID'), p['bn1']))
        y = jax.nn.relu(bn(conv(y, p['conv2_w'], ((1, 1), (1, 1)),
                                groups=CARDINALITY), p['bn2']))
        y = bn(conv(y, p['conv3_w'], 'VALID'), p['bn3'])
        if 'se_fc1' in p:
            pooled = jnp.mean(y, axis=(2, 3))
            h = jax.nn.relu(pooled @ jnp.asarray(p['se_fc1']).T)
            s = jax.nn.sigmoid(h @ jnp.asarray(p['se_fc2']).T)
            y = y * s[:, :, None, None]
        if 'ds_w' in p:
            res = bn(conv(out, p['ds_w'], 'VALID'), p['ds_bn'])
        out = jax.nn.relu(y + res)
    B, C, H, W = out.shape
    out = out.reshape(B, C // 4, 2, 2, H, W)
    out = jnp.transpose(out, (0, 1, 4, 2, 5, 3)).reshape(B, C // 4, 2 * H, 2 * W)
    return out


# ----------------------------------- main -------------------------------------

if __name__ == "__main__":
    # DecoderBlock(inplanes=128, planes=64, block_num=2, senet=True)
    INPLANES, PLANES, BLOCK_NUM, SENET = 128, 64, 2, True
    B, Hs, Ws = 2, 8, 8

    key = jax.random.PRNGKey(0)
    x = jax.random.normal(key, (B, INPLANES, Hs, Ws), dtype=jnp.float32)

    blocks = init_decoder_block(0, INPLANES, PLANES, BLOCK_NUM, SENET)
    wslab, cslab, metas = pack_params(blocks)

    fwd = jax.jit(lambda xx, ws, cs: decoder_block_forward(xx, ws, cs, metas))
    out = jax.block_until_ready(fwd(x, wslab, cslab))
    assert out.shape == (B, PLANES // 4, 2 * Hs, 2 * Ws), out.shape

    ref = jax.block_until_ready(ref_decoder_block(x, blocks))
    # Kernel uses bf16 MXU inputs with BN scales folded in f32 before the bf16
    # cast (f32 accumulate) vs. the f32 HIGHEST-precision reference, so the
    # tolerance is relaxed accordingly.
    np.testing.assert_allclose(np.asarray(out), np.asarray(ref),
                               rtol=3e-2, atol=3e-2)
    print("KERNEL_OK")
</pallas_src>

<mosaic_0001>
module attributes {stable_mosaic.version = 11 : i64} {
  func.func @kernel(%arg0: i32, %arg1: memref<128x128xf32, #tpu.memory_space<vmem>>, %arg2: memref<128x4xf32, #tpu.memory_space<vmem>>, %arg3: memref<224x128xbf16, #tpu.memory_space<vmem>>, %arg4: memref<112x128xf32, #tpu.memory_space<vmem>>, %arg5: memref<128x64xf32, #tpu.memory_space<vmem>>) attributes {dimension_semantics = [#tpu.dimension_semantics<parallel>], iteration_bounds = array<i64: 1>, scalar_prefetch = 0 : i64, scratch_operands = 0 : i64, tpu.core_type = #tpu.core_type<tc>, window_params = [{transform_indices = @transform_0, window_bounds = array<i64: 128, 128>}, {transform_indices = @transform_1, window_bounds = array<i64: 128, 4>}, {pipeline_mode = #tpu.pipeline_mode<synchronous>, transform_indices = @transform_2, window_bounds = array<i64: 224, 128>}, {pipeline_mode = #tpu.pipeline_mode<synchronous>, transform_indices = @transform_3, window_bounds = array<i64: 112, 128>}, {transform_indices = @transform_4, window_bounds = array<i64: 128, 64>}]} {
    %c0 = arith.constant 0 : index
    %c0_0 = arith.constant 0 : index
    %0 = vector.load %arg1[%c0, %c0_0] : memref<128x128xf32, #tpu.memory_space<vmem>>, vector<128x128xf32>
    %c0_1 = arith.constant 0 : index
    %c0_2 = arith.constant 0 : index
    %1 = vector.load %arg2[%c0_1, %c0_2] : memref<128x4xf32, #tpu.memory_space<vmem>>, vector<128x4xf32>
    %2 = vector.extract_strided_slice %1 {offsets = [0, 0], sizes = [128, 1], strides = [1, 1]} : vector<128x4xf32> to vector<128x1xf32>
    %3 = vector.extract_strided_slice %1 {offsets = [0, 1], sizes = [128, 1], strides = [1, 1]} : vector<128x4xf32> to vector<128x1xf32>
    %4 = vector.extract_strided_slice %1 {offsets = [0, 2], sizes = [128, 1], strides = [1, 1]} : vector<128x4xf32> to vector<128x1xf32>
    %5 = vector.extract_strided_slice %1 {offsets = [0, 3], sizes = [128, 1], strides = [1, 1]} : vector<128x4xf32> to vector<128x1xf32>
    %6 = arith.truncf %0 : vector<128x128xf32> to vector<128x128xbf16>
    %c0_3 = arith.constant 0 : index
    %c0_4 = arith.constant 0 : index
    %7 = vector.load %arg3[%c0_3, %c0_4] : memref<224x128xbf16, #tpu.memory_space<vmem>>, vector<128x128xbf16>
    %c0_5 = arith.constant 0 : index
    %c0_6 = arith.constant 0 : index
    %8 = vector.load %arg4[%c0_5, %c0_6] : memref<112x128xf32, #tpu.memory_space<vmem>>, vector<1x128xf32>
    %cst = arith.constant dense<0.000000e+00> : vector<128x128xf32>
    %9 = tpu.matmul %6, %7, %cst {dimension_numbers = #tpu.dot_dimension_numbers<[1], [0], [0], [1], [0, 0, 1, 1], [], []>} : vector<128x128xbf16>, vector<128x128xbf16>, vector<128x128xf32> -> vector<128x128xf32>
    %10 = vector.broadcast %8 : vector<1x128xf32> to vector<128x128xf32>
    %11 = arith.addf %9, %10 : vector<128x128xf32>
    %12 = vector.extract_strided_slice %11 {offsets = [0, 0], sizes = [128, 64], strides = [1, 1]} : vector<128x128xf32> to vector<128x64xf32>
    %13 = vector.extract_strided_slice %11 {offsets = [0, 64], sizes = [128, 16], strides = [1, 1]} : vector<128x128xf32> to vector<128x16xf32>
    %cst_7 = arith.constant 0.000000e+00 : f32
    %14 = vector.broadcast %cst_7 : f32 to vector<128x16xf32>
    %15 = arith.maximumf %13, %14 : vector<128x16xf32>
    %c8 = arith.constant 8 : index
    %c0_8 = arith.constant 0 : index
    %16 = vector.load %arg4[%c8, %c0_8] : memref<112x128xf32, #tpu.memory_space<vmem>>, vector<9x16xf32>
    %c24 = arith.constant 24 : index
    %c0_9 = arith.constant 0 : index
    %17 = vector.load %arg4[%c24, %c0_9] : memref<112x128xf32, #tpu.memory_space<vmem>>, vector<1x16xf32>
    %cst_10 = arith.constant 0.000000e+00 : f32
    %18 = vector.broadcast %cst_10 : f32 to vector<1x16xf32>
    %cst_11 = arith.constant 0.000000e+00 : f32
    %19 = vector.broadcast %cst_11 : f32 to vector<8x16xf32>
    %20 = vector.extract_strided_slice %15 {offsets = [1, 0], sizes = [127, 16], strides = [1, 1]} : vector<128x16xf32> to vector<127x16xf32>
    %21 = tpu.concatenate %20, %18 in 0 : vector<127x16xf32>, vector<1x16xf32> -> vector<128x16xf32>
    %22 = vector.broadcast %3 : vector<128x1xf32> to vector<128x16xf32>
    %23 = arith.mulf %21, %22 : vector<128x16xf32>
    %24 = vector.extract_strided_slice %15 {offsets = [0, 0], sizes = [127, 16], strides = [1, 1]} : vector<128x16xf32> to vector<127x16xf32>
    %25 = tpu.concatenate %18, %24 in 0 : vector<1x16xf32>, vector<127x16xf32> -> vector<128x16xf32>
    %26 = vector.broadcast %2 : vector<128x1xf32> to vector<128x16xf32>
    %27 = arith.mulf %25, %26 : vector<128x16xf32>
    %28 = vector.extract_strided_slice %16 {offsets = [3, 0], sizes = [1, 16], strides = [1, 1]} : vector<9x16xf32> to vector<1x16xf32>
    %29 = vector.broadcast %28 : vector<1x16xf32> to vector<128x16xf32>
    %30 = arith.mulf %27, %29 : vector<128x16xf32>
    %31 = vector.extract_strided_slice %16 {offsets = [4, 0], sizes = [1, 16], strides = [1, 1]} : vector<9x16xf32> to vector<1x16xf32>
    %32 = vector.broadcast %31 : vector<1x16xf32> to vector<128x16xf32>
    %33 = arith.mulf %15, %32 : vector<128x16xf32>
    %34 = arith.addf %30, %33 : vector<128x16xf32>
    %35 = vector.extract_strided_slice %16 {offsets = [5, 0], sizes = [1, 16], strides = [1, 1]} : vector<9x16xf32> to vector<1x16xf32>
    %36 = vector.broadcast %35 : vector<1x16xf32> to vector<128x16xf32>
    %37 = arith.mulf %23, %36 : vector<128x16xf32>
    %38 = arith.addf %34, %37 : vector<128x16xf32>
    %39 = vector.extract_strided_slice %16 {offsets = [6, 0], sizes = [1, 16], strides = [1, 1]} : vector<9x16xf32> to vector<1x16xf32>
    %40 = vector.broadcast %39 : vector<1x16xf32> to vector<128x16xf32>
    %41 = arith.mulf %27, %40 : vector<128x16xf32>
    %42 = vector.extract_strided_slice %16 {offsets = [7, 0], sizes = [1, 16], strides = [1, 1]} : vector<9x16xf32> to vector<1x16xf32>
    %43 = vector.broadcast %42 : vector<1x16xf32> to vector<128x16xf32>
    %44 = arith.mulf %15, %43 : vector<128x16xf32>
    %45 = arith.addf %41, %44 : vector<128x16xf32>
    %46 = vector.extract_strided_slice %16 {offsets = [8, 0], sizes = [1, 16], strides = [1, 1]} : vector<9x16xf32> to vector<1x16xf32>
    %47 = vector.broadcast %46 : vector<1x16xf32> to vector<128x16xf32>
    %48 = arith.mulf %23, %47 : vector<128x16xf32>
    %49 = arith.addf %45, %48 : vector<128x16xf32>
    %50 = vector.extract_strided_slice %49 {offsets = [8, 0], sizes = [120, 16], strides = [1, 1]} : vector<128x16xf32> to vector<120x16xf32>
    %51 = tpu.concatenate %50, %19 in 0 : vector<120x16xf32>, vector<8x16xf32> -> vector<128x16xf32>
    %52 = vector.broadcast %5 : vector<128x1xf32> to vector<128x16xf32>
    %53 = arith.mulf %51, %52 : vector<128x16xf32>
    %54 = arith.addf %38, %53 : vector<128x16xf32>
    %55 = vector.extract_strided_slice %16 {offsets = [0, 0], sizes = [1, 16], strides = [1, 1]} : vector<9x16xf32> to vector<1x16xf32>
    %56 = vector.broadcast %55 : vector<1x16xf32> to vector<128x16xf32>
    %57 = arith.mulf %27, %56 : vector<128x16xf32>
    %58 = vector.extract_strided_slice %16 {offsets = [1, 0], sizes = [1, 16], strides = [1, 1]} : vector<9x16xf32> to vector<1x16xf32>
    %59 = vector.broadcast %58 : vector<1x16xf32> to vector<128x16xf32>
    %60 = arith.mulf %15, %59 : vector<128x16xf32>
    %61 = arith.addf %57, %60 : vector<128x16xf32>
    %62 = vector.extract_strided_slice %16 {offsets = [2, 0], sizes = [1, 16], strides = [1, 1]} : vector<9x16xf32> to vector<1x16xf32>
    %63 = vector.broadcast %62 : vector<1x16xf32> to vector<128x16xf32>
    %64 = arith.mulf %23, %63 : vector<128x16xf32>
    %65 = arith.addf %61, %64 : vector<128x16xf32>
    %66 = vector.extract_strided_slice %65 {offsets = [0, 0], sizes = [120, 16], strides = [1, 1]} : vector<128x16xf32> to vector<120x16xf32>
    %67 = tpu.concatenate %19, %66 in 0 : vector<8x16xf32>, vector<120x16xf32> -> vector<128x16xf32>
    %68 = vector.broadcast %4 : vector<128x1xf32> to vector<128x16xf32>
    %69 = arith.mulf %67, %68 : vector<128x16xf32>
    %70 = arith.addf %54, %69 : vector<128x16xf32>
    %71 = vector.broadcast %17 : vector<1x16xf32> to vector<128x16xf32>
    %72 = arith.addf %70, %71 : vector<128x16xf32>
    %cst_12 = arith.constant 0.000000e+00 : f32
    %73 = vector.broadcast %cst_12 : f32 to vector<128x16xf32>
    %74 = arith.maximumf %72, %73 : vector<128x16xf32>
    %c128 = arith.constant 128 : index
    %c0_13 = arith.constant 0 : index
    %75 = vector.load %arg3[%c128, %c0_13] : memref<224x128xbf16, #tpu.memory_space<vmem>>, vector<16x128xbf16>
    %c32 = arith.constant 32 : index
    %c0_14 = arith.constant 0 : index
    %76 = vector.load %arg4[%c32, %c0_14] : memref<112x128xf32, #tpu.memory_space<vmem>>, vector<1x64xf32>
    %77 = arith.truncf %74 : vector<128x16xf32> to vector<128x16xbf16>
    %cst_15 = arith.constant dense<0.000000e+00> : vector<128x128xf32>
    %78 = tpu.matmul %77, %75, %cst_15 {dimension_numbers = #tpu.dot_dimension_numbers<[1], [0], [0], [1], [0, 0, 1, 1], [], []>} : vector<128x16xbf16>, vector<16x128xbf16>, vector<128x128xf32> -> vector<128x128xf32>
    %79 = vector.extract_strided_slice %78 {offsets = [0, 0], sizes = [128, 64], strides = [1, 1]} : vector<128x128xf32> to vector<128x64xf32>
    %80 = vector.broadcast %76 : vector<1x64xf32> to vector<128x64xf32>
    %81 = arith.addf %79, %80 : vector<128x64xf32>
    %c40 = arith.constant 40 : index
    %c0_16 = arith.constant 0 : index
    %82 = vector.load %arg4[%c40, %c0_16] : memref<112x128xf32, #tpu.memory_space<vmem>>, vector<4x64xf32>
    %c48 = arith.constant 48 : index
    %c0_17 = arith.constant 0 : index
    %83 = vector.load %arg4[%c48, %c0_17] : memref<112x128xf32, #tpu.memory_space<vmem>>, vector<4x64xf32>
    %84 = vector.extract_strided_slice %81 {offsets = [0, 0], sizes = [64, 64], strides = [1, 1]} : vector<128x64xf32> to vector<64x64xf32>
    %cst_18 = arith.constant dense<0.000000e+00> : vector<64xf32>
    %85 = vector.multi_reduction <add>, %84, %cst_18 [0] : vector<64x64xf32> to vector<64xf32>
    %86 = vector.shape_cast %85 : vector<64xf32> to vector<1x64xf32>
    %cst_19 = arith.constant 6.400000e+01 : f32
    %87 = vector.broadcast %cst_19 : f32 to vector<1x64xf32>
    %88 = arith.divf %86, %87 : vector<1x64xf32>
    %89 = vector.broadcast %88 : vector<1x64xf32> to vector<4x64xf32>
    %90 = arith.mulf %89, %82 : vector<4x64xf32>
    %cst_20 = arith.constant dense<0.000000e+00> : vector<4xf32>
    %91 = vector.multi_reduction <add>, %90, %cst_20 [1] : vector<4x64xf32> to vector<4xf32>
    %92 = vector.shape_cast %91 : vector<4xf32> to vector<4x1xf32>
    %cst_21 = arith.constant 0.000000e+00 : f32
    %93 = vector.broadcast %cst_21 : f32 to vector<4x1xf32>
    %94 = arith.maximumf %92, %93 : vector<4x1xf32>
    %95 = vector.broadcast %94 : vector<4x1xf32> to vector<4x64xf32>
    %96 = arith.mulf %95, %83 : vector<4x64xf32>
    %cst_22 = arith.constant dense<0.000000e+00> : vector<64xf32>
    %97 = vector.multi_reduction <add>, %96, %cst_22 [0] : vector<4x64xf32> to vector<64xf32>
    %98 = vector.shape_cast %97 : vector<64xf32> to vector<1x64xf32>
    %99 = arith.negf %98 : vector<1x64xf32>
    %100 = math.exp %99 : vector<1x64xf32>
    %cst_23 = arith.constant 1.000000e+00 : f32
    %101 = vector.broadcast %cst_23 : f32 to vector<1x64xf32>
    %102 = arith.addf %101, %100 : vector<1x64xf32>
    %103 = arith.divf %101, %102 : vector<1x64xf32>
    %104 = vector.broadcast %103 : vector<1x64xf32> to vector<64x64xf32>
    %105 = arith.mulf %84, %104 : vector<64x64xf32>
    %106 = vector.extract_strided_slice %81 {offsets = [64, 0], sizes = [64, 64], strides = [1, 1]} : vector<128x64xf32> to vector<64x64xf32>
    %cst_24 = arith.constant dense<0.000000e+00> : vector<64xf32>
    %107 = vector.multi_reduction <add>, %106, %cst_24 [0] : vector<64x64xf32> to vector<64xf32>
    %108 = vector.shape_cast %107 : vector<64xf32> to vector<1x64xf32>
    %cst_25 = arith.constant 6.400000e+01 : f32
    %109 = vector.broadcast %cst_25 : f32 to vector<1x64xf32>
    %110 = arith.divf %108, %109 : vector<1x64xf32>
    %111 = vector.broadcast %110 : vector<1x64xf32> to vector<4x64xf32>
    %112 = arith.mulf %111, %82 : vector<4x64xf32>
    %cst_26 = arith.constant dense<0.000000e+00> : vector<4xf32>
    %113 = vector.multi_reduction <add>, %112, %cst_26 [1] : vector<4x64xf32> to vector<4xf32>
    %114 = vector.shape_cast %113 : vector<4xf32> to vector<4x1xf32>
    %cst_27 = arith.constant 0.000000e+00 : f32
    %115 = vector.broadcast %cst_27 : f32 to vector<4x1xf32>
    %116 = arith.maximumf %114, %115 : vector<4x1xf32>
    %117 = vector.broadcast %116 : vector<4x1xf32> to vector<4x64xf32>
    %118 = arith.mulf %117, %83 : vector<4x64xf32>
    %cst_28 = arith.constant dense<0.000000e+00> : vector<64xf32>
    %119 = vector.multi_reduction <add>, %118, %cst_28 [0] : vector<4x64xf32> to vector<64xf32>
    %120 = vector.shape_cast %119 : vector<64xf32> to vector<1x64xf32>
    %121 = arith.negf %120 : vector<1x64xf32>
    %122 = math.exp %121 : vector<1x64xf32>
    %cst_29 = arith.constant 1.000000e+00 : f32
    %123 = vector.broadcast %cst_29 : f32 to vector<1x64xf32>
    %124 = arith.addf %123, %122 : vector<1x64xf32>
    %125 = arith.divf %123, %124 : vector<1x64xf32>
    %126 = vector.broadcast %125 : vector<1x64xf32> to vector<64x64xf32>
    %127 = arith.mulf %106, %126 : vector<64x64xf32>
    %128 = tpu.concatenate %105, %127 in 0 : vector<64x64xf32>, vector<64x64xf32> -> vector<128x64xf32>
    %129 = arith.addf %128, %12 : vector<128x64xf32>
    %cst_30 = arith.constant 0.000000e+00 : f32
    %130 = vector.broadcast %cst_30 : f32 to vector<128x64xf32>
    %131 = arith.maximumf %129, %130 : vector<128x64xf32>
    %132 = arith.truncf %131 : vector<128x64xf32> to vector<128x64xbf16>
    %c144 = arith.constant 144 : index
    %c0_31 = arith.constant 0 : index
    %133 = vector.load %arg3[%c144, %c0_31] : memref<224x128xbf16, #tpu.memory_space<vmem>>, vector<64x128xbf16>
    %c56 = arith.constant 56 : index
    %c0_32 = arith.constant 0 : index
    %134 = vector.load %arg4[%c56, %c0_32] : memref<112x128xf32, #tpu.memory_space<vmem>>, vector<1x128xf32>
    %cst_33 = arith.constant dense<0.000000e+00> : vector<128x128xf32>
    %135 = tpu.matmul %132, %133, %cst_33 {dimension_numbers = #tpu.dot_dimension_numbers<[1], [0], [0], [1], [0, 0, 1, 1], [], []>} : vector<128x64xbf16>, vector<64x128xbf16>, vector<128x128xf32> -> vector<128x128xf32>
    %136 = vector.broadcast %134 : vector<1x128xf32> to vector<128x128xf32>
    %137 = arith.addf %135, %136 : vector<128x128xf32>
    %138 = vector.extract_strided_slice %137 {offsets = [0, 0], sizes = [128, 16], strides = [1, 1]} : vector<128x128xf32> to vector<128x16xf32>
    %cst_34 = arith.constant 0.000000e+00 : f32
    %139 = vector.broadcast %cst_34 : f32 to vector<128x16xf32>
    %140 = arith.maximumf %138, %139 : vector<128x16xf32>
    %c64 = arith.constant 64 : index
    %c0_35 = arith.constant 0 : index
    %141 = vector.load %arg4[%c64, %c0_35] : memref<112x128xf32, #tpu.memory_space<vmem>>, vector<9x16xf32>
    %c80 = arith.constant 80 : index
    %c0_36 = arith.constant 0 : index
    %142 = vector.load %arg4[%c80, %c0_36] : memref<112x128xf32, #tpu.memory_space<vmem>>, vector<1x16xf32>
    %cst_37 = arith.constant 0.000000e+00 : f32
    %143 = vector.broadcast %cst_37 : f32 to vector<1x16xf32>
    %cst_38 = arith.constant 0.000000e+00 : f32
    %144 = vector.broadcast %cst_38 : f32 to vector<8x16xf32>
    %145 = vector.extract_strided_slice %140 {offsets = [1, 0], sizes = [127, 16], strides = [1, 1]} : vector<128x16xf32> to vector<127x16xf32>
    %146 = tpu.concatenate %145, %143 in 0 : vector<127x16xf32>, vector<1x16xf32> -> vector<128x16xf32>
    %147 = vector.broadcast %3 : vector<128x1xf32> to vector<128x16xf32>
    %148 = arith.mulf %146, %147 : vector<128x16xf32>
    %149 = vector.extract_strided_slice %140 {offsets = [0, 0], sizes = [127, 16], strides = [1, 1]} : vector<128x16xf32> to vector<127x16xf32>
    %150 = tpu.concatenate %143, %149 in 0 : vector<1x16xf32>, vector<127x16xf32> -> vector<128x16xf32>
    %151 = vector.broadcast %2 : vector<128x1xf32> to vector<128x16xf32>
    %152 = arith.mulf %150, %151 : vector<128x16xf32>
    %153 = vector.extract_strided_slice %141 {offsets = [3, 0], sizes = [1, 16], strides = [1, 1]} : vector<9x16xf32> to vector<1x16xf32>
    %154 = vector.broadcast %153 : vector<1x16xf32> to vector<128x16xf32>
    %155 = arith.mulf %152, %154 : vector<128x16xf32>
    %156 = vector.extract_strided_slice %141 {offsets = [4, 0], sizes = [1, 16], strides = [1, 1]} : vector<9x16xf32> to vector<1x16xf32>
    %157 = vector.broadcast %156 : vector<1x16xf32> to vector<128x16xf32>
    %158 = arith.mulf %140, %157 : vector<128x16xf32>
    %159 = arith.addf %155, %158 : vector<128x16xf32>
    %160 = vector.extract_strided_slice %141 {offsets = [5, 0], sizes = [1, 16], strides = [1, 1]} : vector<9x16xf32> to vector<1x16xf32>
    %161 = vector.broadcast %160 : vector<1x16xf32> to vector<128x16xf32>
    %162 = arith.mulf %148, %161 : vector<128x16xf32>
    %163 = arith.addf %159, %162 : vector<128x16xf32>
    %164 = vector.extract_strided_slice %141 {offsets = [6, 0], sizes = [1, 16], strides = [1, 1]} : vector<9x16xf32> to vector<1x16xf32>
    %165 = vector.broadcast %164 : vector<1x16xf32> to vector<128x16xf32>
    %166 = arith.mulf %152, %165 : vector<128x16xf32>
    %167 = vector.extract_strided_slice %141 {offsets = [7, 0], sizes = [1, 16], strides = [1, 1]} : vector<9x16xf32> to vector<1x16xf32>
    %168 = vector.broadcast %167 : vector<1x16xf32> to vector<128x16xf32>
    %169 = arith.mulf %140, %168 : vector<128x16xf32>
    %170 = arith.addf %166, %169 : vector<128x16xf32>
    %171 = vector.extract_strided_slice %141 {offsets = [8, 0], sizes = [1, 16], strides = [1, 1]} : vector<9x16xf32> to vector<1x16xf32>
    %172 = vector.broadcast %171 : vector<1x16xf32> to vector<128x16xf32>
    %173 = arith.mulf %148, %172 : vector<128x16xf32>
    %174 = arith.addf %170, %173 : vector<128x16xf32>
    %175 = vector.extract_strided_slice %174 {offsets = [8, 0], sizes = [120, 16], strides = [1, 1]} : vector<128x16xf32> to vector<120x16xf32>
    %176 = tpu.concatenate %175, %144 in 0 : vector<120x16xf32>, vector<8x16xf32> -> vector<128x16xf32>
    %177 = vector.broadcast %5 : vector<128x1xf32> to vector<128x16xf32>
    %178 = arith.mulf %176, %177 : vector<128x16xf32>
    %179 = arith.addf %163, %178 : vector<128x16xf32>
    %180 = vector.extract_strided_slice %141 {offsets = [0, 0], sizes = [1, 16], strides = [1, 1]} : vector<9x16xf32> to vector<1x16xf32>
    %181 = vector.broadcast %180 : vector<1x16xf32> to vector<128x16xf32>
    %182 = arith.mulf %152, %181 : vector<128x16xf32>
    %183 = vector.extract_strided_slice %141 {offsets = [1, 0], sizes = [1, 16], strides = [1, 1]} : vector<9x16xf32> to vector<1x16xf32>
    %184 = vector.broadcast %183 : vector<1x16xf32> to vector<128x16xf32>
    %185 = arith.mulf %140, %184 : vector<128x16xf32>
    %186 = arith.addf %182, %185 : vector<128x16xf32>
    %187 = vector.extract_strided_slice %141 {offsets = [2, 0], sizes = [1, 16], strides = [1, 1]} : vector<9x16xf32> to vector<1x16xf32>
    %188 = vector.broadcast %187 : vector<1x16xf32> to vector<128x16xf32>
    %189 = arith.mulf %148, %188 : vector<128x16xf32>
    %190 = arith.addf %186, %189 : vector<128x16xf32>
    %191 = vector.extract_strided_slice %190 {offsets = [0, 0], sizes = [120, 16], strides = [1, 1]} : vector<128x16xf32> to vector<120x16xf32>
    %192 = tpu.concatenate %144, %191 in 0 : vector<8x16xf32>, vector<120x16xf32> -> vector<128x16xf32>
    %193 = vector.broadcast %4 : vector<128x1xf32> to vector<128x16xf32>
    %194 = arith.mulf %192, %193 : vector<128x16xf32>
    %195 = arith.addf %179, %194 : vector<128x16xf32>
    %196 = vector.broadcast %142 : vector<1x16xf32> to vector<128x16xf32>
    %197 = arith.addf %195, %196 : vector<128x16xf32>
    %cst_39 = arith.constant 0.000000e+00 : f32
    %198 = vector.broadcast %cst_39 : f32 to vector<128x16xf32>
    %199 = arith.maximumf %197, %198 : vector<128x16xf32>
    %c208 = arith.constant 208 : index
    %c0_40 = arith.constant 0 : index
    %200 = vector.load %arg3[%c208, %c0_40] : memref<224x128xbf16, #tpu.memory_space<vmem>>, vector<16x128xbf16>
    %c88 = arith.constant 88 : index
    %c0_41 = arith.constant 0 : index
    %201 = vector.load %arg4[%c88, %c0_41] : memref<112x128xf32, #tpu.memory_space<vmem>>, vector<1x64xf32>
    %202 = arith.truncf %199 : vector<128x16xf32> to vector<128x16xbf16>
    %cst_42 = arith.constant dense<0.000000e+00> : vector<128x128xf32>
    %203 = tpu.matmul %202, %200, %cst_42 {dimension_numbers = #tpu.dot_dimension_numbers<[1], [0], [0], [1], [0, 0, 1, 1], [], []>} : vector<128x16xbf16>, vector<16x128xbf16>, vector<128x128xf32> -> vector<128x128xf32>
    %204 = vector.extract_strided_slice %203 {offsets = [0, 0], sizes = [128, 64], strides = [1, 1]} : vector<128x128xf32> to vector<128x64xf32>
    %205 = vector.broadcast %201 : vector<1x64xf32> to vector<128x64xf32>
    %206 = arith.addf %204, %205 : vector<128x64xf32>
    %c96 = arith.constant 96 : index
    %c0_43 = arith.constant 0 : index
    %207 = vector.load %arg4[%c96, %c0_43] : memref<112x128xf32, #tpu.memory_space<vmem>>, vector<4x64xf32>
    %c104 = arith.constant 104 : index
    %c0_44 = arith.constant 0 : index
    %208 = vector.load %arg4[%c104, %c0_44] : memref<112x128xf32, #tpu.memory_space<vmem>>, vector<4x64xf32>
    %209 = vector.extract_strided_slice %206 {offsets = [0, 0], sizes = [64, 64], strides = [1, 1]} : vector<128x64xf32> to vector<64x64xf32>
    %cst_45 = arith.constant dense<0.000000e+00> : vector<64xf32>
    %210 = vector.multi_reduction <add>, %209, %cst_45 [0] : vector<64x64xf32> to vector<64xf32>
    %211 = vector.shape_cast %210 : vector<64xf32> to vector<1x64xf32>
    %cst_46 = arith.constant 6.400000e+01 : f32
    %212 = vector.broadcast %cst_46 : f32 to vector<1x64xf32>
    %213 = arith.divf %211, %212 : vector<1x64xf32>
    %214 = vector.broadcast %213 : vector<1x64xf32> to vector<4x64xf32>
    %215 = arith.mulf %214, %207 : vector<4x64xf32>
    %cst_47 = arith.constant dense<0.000000e+00> : vector<4xf32>
    %216 = vector.multi_reduction <add>, %215, %cst_47 [1] : vector<4x64xf32> to vector<4xf32>
    %217 = vector.shape_cast %216 : vector<4xf32> to vector<4x1xf32>
    %cst_48 = arith.constant 0.000000e+00 : f32
    %218 = vector.broadcast %cst_48 : f32 to vector<4x1xf32>
    %219 = arith.maximumf %217, %218 : vector<4x1xf32>
    %220 = vector.broadcast %219 : vector<4x1xf32> to vector<4x64xf32>
    %221 = arith.mulf %220, %208 : vector<4x64xf32>
    %cst_49 = arith.constant dense<0.000000e+00> : vector<64xf32>
    %222 = vector.multi_reduction <add>, %221, %cst_49 [0] : vector<4x64xf32> to vector<64xf32>
    %223 = vector.shape_cast %222 : vector<64xf32> to vector<1x64xf32>
    %224 = arith.negf %223 : vector<1x64xf32>
    %225 = math.exp %224 : vector<1x64xf32>
    %cst_50 = arith.constant 1.000000e+00 : f32
    %226 = vector.broadcast %cst_50 : f32 to vector<1x64xf32>
    %227 = arith.addf %226, %225 : vector<1x64xf32>
    %228 = arith.divf %226, %227 : vector<1x64xf32>
    %229 = vector.broadcast %228 : vector<1x64xf32> to vector<64x64xf32>
    %230 = arith.mulf %209, %229 : vector<64x64xf32>
    %231 = vector.extract_strided_slice %206 {offsets = [64, 0], sizes = [64, 64], strides = [1, 1]} : vector<128x64xf32> to vector<64x64xf32>
    %cst_51 = arith.constant dense<0.000000e+00> : vector<64xf32>
    %232 = vector.multi_reduction <add>, %231, %cst_51 [0] : vector<64x64xf32> to vector<64xf32>
    %233 = vector.shape_cast %232 : vector<64xf32> to vector<1x64xf32>
    %cst_52 = arith.constant 6.400000e+01 : f32
    %234 = vector.broadcast %cst_52 : f32 to vector<1x64xf32>
    %235 = arith.divf %233, %234 : vector<1x64xf32>
    %236 = vector.broadcast %235 : vector<1x64xf32> to vector<4x64xf32>
    %237 = arith.mulf %236, %207 : vector<4x64xf32>
    %cst_53 = arith.constant dense<0.000000e+00> : vector<4xf32>
    %238 = vector.multi_reduction <add>, %237, %cst_53 [1] : vector<4x64xf32> to vector<4xf32>
    %239 = vector.shape_cast %238 : vector<4xf32> to vector<4x1xf32>
    %cst_54 = arith.constant 0.000000e+00 : f32
    %240 = vector.broadcast %cst_54 : f32 to vector<4x1xf32>
    %241 = arith.maximumf %239, %240 : vector<4x1xf32>
    %242 = vector.broadcast %241 : vector<4x1xf32> to vector<4x64xf32>
    %243 = arith.mulf %242, %208 : vector<4x64xf32>
    %cst_55 = arith.constant dense<0.000000e+00> : vector<64xf32>
    %244 = vector.multi_reduction <add>, %243, %cst_55 [0] : vector<4x64xf32> to vector<64xf32>
    %245 = vector.shape_cast %244 : vector<64xf32> to vector<1x64xf32>
    %246 = arith.negf %245 : vector<1x64xf32>
    %247 = math.exp %246 : vector<1x64xf32>
    %cst_56 = arith.constant 1.000000e+00 : f32
    %248 = vector.broadcast %cst_56 : f32 to vector<1x64xf32>
    %249 = arith.addf %248, %247 : vector<1x64xf32>
    %250 = arith.divf %248, %249 : vector<1x64xf32>
    %251 = vector.broadcast %250 : vector<1x64xf32> to vector<64x64xf32>
    %252 = arith.mulf %231, %251 : vector<64x64xf32>
    %253 = tpu.concatenate %230, %252 in 0 : vector<64x64xf32>, vector<64x64xf32> -> vector<128x64xf32>
    %254 = arith.addf %253, %131 : vector<128x64xf32>
    %cst_57 = arith.constant 0.000000e+00 : f32
    %255 = vector.broadcast %cst_57 : f32 to vector<128x64xf32>
    %256 = arith.maximumf %254, %255 : vector<128x64xf32>
    %c0_58 = arith.constant 0 : index
    %c0_59 = arith.constant 0 : index
    %257 = vector.load %arg5[%c0_58, %c0_59] : memref<128x64xf32, #tpu.memory_space<vmem>>, vector<128x64xf32>
    tpu.vector_store %arg5[%c0_58, %c0_59], %256 {strides = array<i32>} : memref<128x64xf32, #tpu.memory_space<vmem>>, vector<128x64xf32>,
    return
  }
  func.func @transform_0(%arg0: i32) -> (i32, i32) {
    %c0_i32 = arith.constant 0 : i32
    %c0_i32_0 = arith.constant 0 : i32
    return %arg0, %c0_i32 : i32, i32
  }
  func.func @transform_1(%arg0: i32) -> (i32, i32) {
    %c0_i32 = arith.constant 0 : i32
    %c0_i32_0 = arith.constant 0 : i32
    return %arg0, %c0_i32 : i32, i32
  }
  func.func @transform_2(%arg0: i32) -> (i32, i32) {
    %c0_i32 = arith.constant 0 : i32
    %c0_i32_0 = arith.constant 0 : i32
    %c0_i32_1 = arith.constant 0 : i32
    return %c0_i32, %c0_i32_0 : i32, i32
  }
  func.func @transform_3(%arg0: i32) -> (i32, i32) {
    %c0_i32 = arith.constant 0 : i32
    %c0_i32_0 = arith.constant 0 : i32
    %c0_i32_1 = arith.constant 0 : i32
    return %c0_i32, %c0_i32_0 : i32, i32
  }
  func.func @transform_4(%arg0: i32) -> (i32, i32) {
    %c0_i32 = arith.constant 0 : i32
    %c0_i32_0 = arith.constant 0 : i32
    return %arg0, %c0_i32 : i32, i32
  }
}

</mosaic_0001>

<bundles_post_ra>
// kernel: _lambda_.1
= control target key start
LH: loop header
LB: loop body
LE: loop exit
PB: predicated region body
PF: predicated region fallthrough
CT: control target
= control target key end

     0   :  { %9 = vsyncpa [#allocation3], 0  ;;  %s5315_s0 = inlined_call_operand.hbm [shape: f32[128,128], index: 0, kind: input, shape index: {}]   ;;  %s5316_s1 = inlined_call_operand.hbm [shape: f32[128,4], index: 1, kind: input, shape index: {}]   ;;  %s5317_s2 = inlined_call_operand.hbm [shape: bf16[224,128], index: 2, kind: input, shape index: {}]   ;;  %s5318_s3 = inlined_call_operand.hbm [shape: f32[112,128], index: 3, kind: input, shape index: {}]   ;;  %s5319_s4 = inlined_call_operand.vmem [shape: f32[128,64], index: 4, kind: output, shape index: {}]  }
   0x1   :  { %10 = vsyncpa [#allocation5], 0 }
   0x2   :  { %11 = vsyncpa [#allocation8], 0  ;;  %s3149_s15 = smov [#allocation4]   ;;  %s3150_s17 = smov [#allocation2]  }
   0x3   :  { %s29_s16 = sshll.u32 %s3149_s15, 4  ;;  %s17_s18 = sshll.u32 %s3150_s17, 4  ;;  %s30_s16 = int_to_ptr.vmem [resolvable:$true] %s29_s16  ;;  %s18_s18 = int_to_ptr.vmem [resolvable:$true] %s17_s18 }
   0x4   :  { %s3071_s19 = scalar_lea.vmem %s30_s16, 2048  ;;  %p3076_p1 = scmp.lt.s32.totalorder %s30_s16, %s30_s16 }
   0x5   :  { %p3072_p0 = scmp.ne.s32.totalorder %s30_s16, %s3071_s19  ;;  %p3077_p2 = scmp.lt.s32.totalorder %s3071_s19, %s3071_s19 }
   0x7   :  { %p3078_p3 = por %p3077_p2, %p3076_p1 }
   0x9   :  { %p3079_p4 = pnand %p3078_p3, %p3072_p0 }
   0xb   :  { %3082 = shalt.err (!%p3079_p4)
}
   0xc   :  { %s3151_s20 = smov 128   ;;  %s3152_s21 = smov 8  }
   0xd   :  { %35 = dma.hbm_to_vmem [thread:$0]  %s5316_s1, 2048, %s30_s16, [#allocation5], %s3151_s20, %s3151_s20, %s3152_s21  }
   0xe   :  { %s3091_s24 = scalar_lea.vmem %s18_s18, 2048  ;;  %p3096_p6 = scmp.lt.s32.totalorder %s18_s18, %s18_s18 }
   0xf   :  { %p3092_p5 = scmp.ne.s32.totalorder %s18_s18, %s3091_s24  ;;  %p3097_p7 = scmp.lt.s32.totalorder %s3091_s24, %s3091_s24 }
  0x11   :  { %p3098_p8 = por %p3097_p7, %p3096_p6 }
  0x13   :  { %p3099_p9 = pnand %p3098_p8, %p3092_p5 }
  0x15   :  { %3102 = shalt.err (!%p3099_p9)
}
  0x16   :  { %23 = dma.hbm_to_vmem [thread:$0]  %s5315_s0, 2048, %s18_s18, [#allocation3], %s3151_s20, %s3151_s20, %s3152_s21  }
  0x17   :  { %s3153_s27 = smov [#allocation6]  }
  0x18   :  { %s41_s28 = sshll.u32 %s3153_s27, 4  ;;  %s42_s28 = int_to_ptr.vmem [resolvable:$true] %s41_s28 }
  0x19   :  { %s3111_s29 = scalar_lea.vmem %s42_s28, 1792  ;;  %p3116_p11 = scmp.lt.s32.totalorder %s42_s28, %s42_s28 }
  0x1a   :  { %p3112_p10 = scmp.ne.s32.totalorder %s42_s28, %s3111_s29  ;;  %p3117_p12 = scmp.lt.s32.totalorder %s3111_s29, %s3111_s29 }
  0x1c   :  { %p3118_p13 = por %p3117_p12, %p3116_p11 }
  0x1e   :  { %p3119_p0 = pnand %p3118_p13, %p3112_p10 }
  0x20   :  { %3122 = shalt.err (!%p3119_p0)
}
  0x21   :  { %s3154_s1 = smov 64   ;;  %s3155_s30 = smov 4  }
  0x22   :  { %47 = dma.hbm_to_vmem [thread:$0]  %s5317_s2, 1792, %s42_s28, [#allocation5], %s3154_s1, %s3154_s1, %s3155_s30  }
  0x23   :  { %s3156_s7 = smov [#allocation7]  }
  0x24   :  { %s53_s0 = sshll.u32 %s3156_s7, 4  ;;  %s54_s0 = int_to_ptr.vmem [resolvable:$true] %s53_s0 }
  0x25   :  { %s3131_s8 = scalar_lea.vmem %s54_s0, 1792  ;;  %p3136_p2 = scmp.lt.s32.totalorder %s54_s0, %s54_s0 }
  0x26   :  { %p3132_p1 = scmp.ne.s32.totalorder %s54_s0, %s3131_s8  ;;  %p3137_p3 = scmp.lt.s32.totalorder %s3131_s8, %s3131_s8 }
  0x28   :  { %p3138_p4 = por %p3137_p3, %p3136_p2 }
  0x2a   :  { %p3139_p5 = pnand %p3138_p4, %p3132_p1 }
  0x2c   :  { %3142 = shalt.err (!%p3139_p5)
}
  0x2d   :  { %59 = dma.hbm_to_vmem [thread:$0]  %s5318_s3, 1792, %s54_s0, [#allocation8], %s3151_s20, %s3151_s20, %s3152_s21  }
  0x2e   :  { %3143 = dma.done.wait [#allocation3], 2048  }
  0x2f   :  { %3144 = vsyncadd [#allocation3], 4294965248 }
  0x30   :  { %3145 = dma.done.wait [#allocation5], 3840  }
  0x31   :  { %3146 = vsyncadd [#allocation5], 4294963456 }
  0x32   :  { %3147 = dma.done.wait [#allocation8], 1792  }
  0x33   :  { %3148 = vsyncadd [#allocation8], 4294965504  ;;  %v3157_v0 = vmov 1   ;;  %v3030_v1 = vld [vmem:[#allocation6 + $0x38] sm:$0xff]   ;;  %v3031_v2 = vld [vmem:[#allocation6 + $0x30] sm:$0xff]   ;;  %v620_v4 = vlaneseq  ;;  %vm459_vm0 = vcmask 1040384  }
  0x34   :  { %3009 = vset.pattern.permute.xlu1 %v3157_v0  ;;  %3008 = vset.pattern.permute.xlu0 %v3157_v0  ;;  %v3032_v3 = vld [vmem:[#allocation6 + $0x28] sm:$0xff]   ;;  %v3033_v5 = vld [vmem:[#allocation6 + $0x20] sm:$0xff]   ;;  %v3213_v12 = vld [vmem:[#allocation4 + $0x18] sm:$0xff]  ;;  %vm314_vm1 = vcmask 1046528   ;;  %vm1523_vm2 = vcmask 130048   ;;  %vm1667_vm3 = vcmask 523264  }
  0x35   :  { %2902 = vmatprep.subr.bf16.mxu0 %v3030_v1  ;;  %v73_v6 = vld [vmem:[#allocation2] sm:$0xff]  ;;  %v74_v7 = vld [vmem:[#allocation2 + $0x8] sm:$0xff]  ;;  %v3209_v8 = vshrl.u32 %v620_v4, 7  ;;  %v3034_v14 = vld [vmem:[#allocation6 + $0x18] sm:$0xff]   ;;  %380 = vperm.xlu1 %3009, %v3213_v12   ;;  %vm1692_vm4 = vcmask 519168  }
  0x36   :  { %2903 = vmatpush3.bf16.msra.mxu0 %v3030_v1  ;;  %v105_v9 = vpack.c.bf16 %v74_v7, %v73_v6  ;;  %v3217_v15 = vld [vmem:[#allocation4 + $0x8] sm:$0xff]  ;;  %v3220_v17 = vld [vmem:[#allocation4 + $0x20] sm:$0xff]  ;;  %v295_v18 = vld [vmem:[#allocation7 + $0x8] sm:$0xff]  ;;  %v5330_v6 = vmov 3   ;;  %v5328_v7 = vmov 2  }
  0x37   :  { %2904 = vmatprep.subr.bf16.mxu0 %v3031_v2  ;;  %5451 = vst [vmem:[#allocation12_spill] sm:$0xff] %v3209_v8  ;;  %v5324_v10 = vsub.s32 3, %v3209_v8  ;;  %v5322_v11 = vsub.s32 6, %v3209_v8  ;;  %v5323_v13 = vsub.s32 0, %v3209_v8  ;;  %v5327_v16 = vsub.s32 7, %v3209_v8  ;;  %370 = vperm.xlu0 %3008, %v3217_v15   ;;  %v3235_v22 = vld [vmem:[#allocation4 + $0x10] sm:$0xff] }
  0x38   :  { %2918 = vmatprep.mubr.bf16.mxu0 %v105_v9  ;;  %v3035_v23 = vld [vmem:[#allocation6 + $0x10] sm:$0xff]   ;;  %v5326_v25 = vsub.s32 4, %v3209_v8  ;;  %v3242_v26 = vld [vmem:[#allocation4] sm:$0xff]  ;;  %v3036_v27 = vld [vmem:[#allocation6 + $0x8] sm:$0xff]   ;;  %v5325_v29 = vsub.s32 1, %v3209_v8  ;;  %v5321_v38 = vsub.s32 5, %v3209_v8 }
  0x39   :  { %v3225_v19 = vrot.slane %v295_v18, %v5324_v10  ;;  %v3229_v20 = vrot.slane %v295_v18, %v5322_v11  ;;  %v3233_v21 = vrot.slane %v295_v18, %v5323_v13  ;;  %385 = vperm.xlu1 %3009, %v3220_v17   ;;  %v870_v24 = vrot.slane %v295_v18, %v5327_v16  ;;  %v2815_v28 = vld [vmem:[#allocation7 + $0x10] ss:$0 sm:$0xff]  ;;  %v3250_v32 = vld [vmem:[#allocation4 + $0x28] sm:$0xff]  ;;  %v75_v34 = vld [vmem:[#allocation2 + $0x10] sm:$0xff] }
  0x3a   :  { %2905 = vmatpush3.bf16.msra.mxu0 %v3031_v2  ;;  %v643_v30 = vrot.slane %v295_v18, %v5326_v25  ;;  %v3037_v31 = vld [vmem:[#allocation6] sm:$0xff]   ;;  %v1181_v33 = vrot.slane %v295_v18, %v5325_v29  ;;  %v76_v35 = vld [vmem:[#allocation2 + $0x18] sm:$0xff]  ;;  %v78_v37 = vld [vmem:[#allocation2 + $0x28] sm:$0xff]  ;;  %v747_v43 = vrot.slane %v295_v18, %v5321_v38  ;;  %v5320_v44 = vsub.s32 2, %v3209_v8 }
  0x3b   :  { %2906 = vmatprep.subr.bf16.mxu0 %v3032_v3  ;;  %375 = vperm.xlu0 %3008, %v3235_v22   ;;  %v77_v36 = vld [vmem:[#allocation2 + $0x20] sm:$0xff]  ;;  %v3257_v39 = vld [vmem:[#allocation4 + $0x38] sm:$0xff]  ;;  %v106_v40 = vpack.c.bf16 %v76_v35, %v75_v34  ;;  %v3260_v41 = vld [vmem:[#allocation4 + $0x30] sm:$0xff] }
  0x3c   :  { %v107_v42 = vpack.c.bf16 %v78_v37, %v77_v36  ;;  %v3267_v45 = vld [vmem:[#allocation4 + $0x40] sm:$0xff]  ;;  %v79_v46 = vld [vmem:[#allocation2 + $0x30] sm:$0xff]  ;;  %v80_v47 = vld [vmem:[#allocation2 + $0x38] sm:$0xff]  ;;  %v1279_v51 = vrot.slane %v295_v18, %v5320_v44 }
  0x3d   :  { %872 = vrot.lane.b32.xlu1 %v870_v24, %s3154_s1  ;;  %v81_v48 = vld [vmem:[#allocation2 + $0x40] sm:$0xff]  ;;  %v82_v49 = vld [vmem:[#allocation2 + $0x48] sm:$0xff]  ;;  %v108_v52 = vpack.c.bf16 %v80_v47, %v79_v46  ;;  %v3276_v54 = vld [vmem:[#allocation4 + $0x58] sm:$0xff] }
  0x3e   :  { %2907 = vmatpush3.bf16.msra.mxu0 %v3032_v3  ;;  %v3270_v50 = vld [vmem:[#allocation4 + $0x48] sm:$0xff]  ;;  %v109_v53 = vpack.c.bf16 %v82_v49, %v81_v48  ;;  %v3279_v55 = vld [vmem:[#allocation4 + $0x50] sm:$0xff]  ;;  %v84_v57 = vld [vmem:[#allocation2 + $0x58] sm:$0xff] }
  0x3f   :  { %2908 = vmatprep.subr.bf16.mxu0 %v3033_v5  ;;  %365 = vperm.xlu0 %3008, %v3242_v26   ;;  %v83_v56 = vld [vmem:[#allocation2 + $0x50] sm:$0xff]  ;;  %v85_v58 = vld [vmem:[#allocation2 + $0x60] sm:$0xff]  ;;  %v86_v59 = vld [vmem:[#allocation2 + $0x68] sm:$0xff] }
  0x40   :  { %v3282_v60 = vld [vmem:[#allocation4 + $0x68] sm:$0xff]  ;;  %v110_v61 = vpack.c.bf16 %v84_v57, %v83_v56  ;;  %v3285_v62 = vld [vmem:[#allocation4 + $0x60] sm:$0xff]  ;;  %v111_v63 = vpack.c.bf16 %v86_v59, %v85_v58  ;;  %v3288_v0 = vld [vmem:[#allocation4 + $0x78] sm:$0xff] }
  0x41   :  { %970 = vrot.lane.b32.xlu1 %v2815_v28, %s3154_s1  ;;  %v3291_v1 = vld [vmem:[#allocation4 + $0x70] sm:$0xff]  ;;  %v88_v3 = vld [vmem:[#allocation2 + $0x78] sm:$0xff] }
  0x42   :  { %2909 = vmatpush3.bf16.msra.mxu0 %v3033_v5  ;;  %v87_v2 = vld [vmem:[#allocation2 + $0x70] sm:$0xff]  ;;  %v3158_v5 = vmov 0  }
  0x43   :  { %2910 = vmatprep.subr.bf16.mxu0 %v3034_v14  ;;  %645 = vrot.lane.b32.xlu0 %v643_v30, %s3154_s1  ;;  %v112_v4 = vpack.c.bf16 %v88_v3, %v87_v2  ;;  %v3368_v35 = vld [vmem:[#allocation7] ss:$0 sm:$0xff] }
  0x45   :  { %390 = vperm.xlu1 %3009, %v3250_v32  }
  0x46   :  { %2911 = vmatpush3.bf16.msra.mxu0 %v3034_v14 }
  0x47   :  { %2912 = vmatprep.subr.bf16.mxu0 %v3035_v23  ;;  %1183 = vrot.lane.b32.xlu0 %v1181_v33, %s3154_s1 }
  0x49   :  { %400 = vperm.xlu1 %3009, %v3257_v39  }
  0x4a   :  { %2913 = vmatpush3.bf16.msra.mxu0 %v3035_v23 }
  0x4b   :  { %2914 = vmatprep.subr.bf16.mxu0 %v3036_v27  ;;  %395 = vperm.xlu0 %3008, %v3260_v41  }
  0x4d   :  { %749 = vrot.lane.b32.xlu1 %v747_v43, %s3154_s1 }
  0x4e   :  { %2915 = vmatpush3.bf16.msra.mxu0 %v3036_v27 }
  0x4f   :  { %2916 = vmatprep.subr.bf16.mxu0 %v3037_v31  ;;  %405 = vperm.xlu0 %3008, %v3267_v45  }
  0x51   :  { %410 = vperm.xlu1 %3009, %v3270_v50  }
  0x52   :  { %2917 = vmatpush3.bf16.msra.mxu0 %v3037_v31 }
  0x53   :  { %1281 = vrot.lane.b32.xlu0 %v1279_v51, %s3154_s1 }
  0x55   :  { %2919 = vmatmul.mubr.bf16.vlgmr.msra.gmra.mxu0 %v106_v40  ;;  %420 = vperm.xlu1 %3009, %v3276_v54  }
  0x56   :  { %2922 = vmatprep.mubr.bf16.mxu0 %v107_v42 }
  0x57   :  { %415 = vperm.xlu0 %3008, %v3279_v55  }
  0x59   :  { %430 = vperm.xlu1 %3009, %v3282_v60  }
  0x5b   :  { %425 = vperm.xlu0 %3008, %v3285_v62  }
  0x5d   :  { %2923 = vmatmul.mubr.bf16.gmra.mxu0 %v108_v52  ;;  %440 = vperm.xlu1 %3009, %v3288_v0  }
  0x5e   :  { %2926 = vmatprep.mubr.bf16.mxu0 %v109_v53 }
  0x5f   :  { %435 = vperm.xlu0 %3008, %v3291_v1  }
  0x61   :  { %3011 = vset.pattern.permute.xlu1 %v3158_v5 }
  0x62   :  { %549 = vperm.xlu1 %3011, %v3235_v22  }
  0x63   :  { %3010 = vset.pattern.permute.xlu0 %v3158_v5 }
  0x64   :  { %545 = vperm.xlu0 %3010, %v3217_v15  }
  0x65   :  { %2927 = vmatmul.mubr.bf16.gmra.mxu0 %v110_v61 }
  0x66   :  { %2930 = vmatprep.mubr.bf16.mxu0 %v111_v63  ;;  %553 = vperm.xlu1 %3011, %v3213_v12  }
  0x68   :  { %557 = vperm.xlu0 %3010, %v3220_v17  }
  0x6a   :  { %541 = vperm.xlu1 %3011, %v3242_v26  }
  0x6c   :  { %565 = vperm.xlu0 %3010, %v3260_v41  }
  0x6d   :  { %2931 = vmatmul.mubr.bf16.gmra.mxu0 %v112_v4 }
  0x6e   :  { %561 = vperm.xlu1 %3011, %v3250_v32  }
  0x70   :  { %581 = vperm.xlu0 %3010, %v3279_v55  }
  0x72   :  { %3012 = vset.pattern.permute.xlu1 %v5330_v6 }
  0x73   :  { %1064 = vperm.xlu1 %3012, %v3242_v26  }
  0x74   :  { %585 = vperm.xlu0 %3010, %v3276_v54  }
  0x77   :  { %3013 = vset.pattern.permute.xlu1 %v3158_v5 }
  0x78   :  { %593 = vperm.xlu0 %3010, %v3282_v60   ;;  %569 = vperm.xlu1 %3013, %v3257_v39  }
  0x7c   :  { %3021 = vset.pattern.permute.xlu0 %v5330_v6  ;;  %573 = vperm.xlu1 %3013, %v3267_v45  }
  0x7d   :  { %1068 = vperm.xlu0 %3021, %v3217_v15  }
  0x80   :  { %3014 = vset.pattern.permute.xlu1 %v5330_v6 }
  0x81   :  { %1072 = vperm.xlu0 %3021, %v3235_v22   ;;  %1076 = vperm.xlu1 %3014, %v3213_v12  }
  0x85   :  { %1088 = vperm.xlu0 %3021, %v3260_v41   ;;  %3015 = vset.pattern.permute.xlu1 %v5328_v7 }
  0x86   :  { %1379 = vperm.xlu1 %3015, %v3217_v15  }
  0x89   :  { %1100 = vperm.xlu0 %3021, %v3270_v50  }
  0x8a   :  { %1387 = vperm.xlu1 %3015, %v3213_v12  }
  0x8d   :  { %1108 = vperm.xlu0 %3021, %v3276_v54  }
  0x8e   :  { %3016 = vset.pattern.permute.xlu1 %v3158_v5 }
  0x8f   :  { %577 = vperm.xlu1 %3016, %v3270_v50  }
  0x93   :  { %3017 = vset.pattern.permute.xlu1 %v5330_v6 }
  0x94   :  { %1080 = vperm.xlu1 %3017, %v3220_v17  }
  0x98   :  { %1084 = vperm.xlu1 %3017, %v3250_v32  }
  0x9c   :  { %3018 = vset.pattern.permute.xlu1 %v3158_v5 }
  0x9d   :  { %589 = vperm.xlu1 %3018, %v3285_v62  }
  0xa1   :  { %3019 = vset.pattern.permute.xlu1 %v5330_v6 }
  0xa2   :  { %1092 = vperm.xlu1 %3019, %v3257_v39  }
  0xa6   :  { %3020 = vset.pattern.permute.xlu1 %v5328_v7 }
  0xa7   :  { %1391 = vperm.xlu1 %3020, %v3220_v17  }
  0xab   :  { %1403 = vperm.xlu1 %3020, %v3257_v39  }
  0xaf   :  { %3022 = vset.pattern.permute.xlu1 %v3158_v5 }
  0xb0   :  { %597 = vperm.xlu1 %3022, %v3291_v1   ;;  %v3337_v9 = vpop.permute.xlu1 %380 }
  0xb1   :  { %5452 = vst [vmem:[#allocation13_spill] sm:$0xff] %v3337_v9 }
  0xb2   :  { %v3358_v28 = vpop.permute.xlu0 %370 }
  0xb3   :  { %5459 = vst [vmem:[#allocation20_spill] sm:$0xff] %v3358_v28 }
  0xb4   :  { %3023 = vset.pattern.permute.xlu1 %v5330_v6  ;;  %v3340_v12 = vpop.permute.xlu1 %385 }
  0xb5   :  { %1096 = vperm.xlu1 %3023, %v3267_v45   ;;  %5453 = vst [vmem:[#allocation14_spill] sm:$0xff] %v3340_v12 }
  0xb6   :  { %v3362_v31 = vpop.permute.xlu0 %375 }
  0xb7   :  { %5461 = vst [vmem:[#allocation22_spill] sm:$0xff] %v3362_v31 }
  0xb8   :  { %v3342_v14 = vpop.permute.xlu1 %872 }
  0xb9   :  { %3024 = vset.pattern.permute.xlu1 %v3158_v5 }
  0xba   :  { %601 = vperm.xlu1 %3024, %v3288_v0   ;;  %v3366_v34 = vpop.permute.xlu0 %365 }
  0xbb   :  { %5463 = vst [vmem:[#allocation24_spill] sm:$0xff] %v3366_v34 }
  0xbc   :  { %v3344_v15 = vpop.permute.xlu1 %970 }
  0xbe   :  { %3025 = vset.pattern.permute.xlu1 %v5330_v6  ;;  %v3375_v40 = vpop.permute.xlu0 %645 }
  0xbf   :  { %1104 = vperm.xlu1 %3025, %v3279_v55  }
  0xc0   :  { %v3346_v17 = vpop.permute.xlu1 %390 }
  0xc1   :  { %5454 = vst [vmem:[#allocation15_spill] sm:$0xff] %v3346_v17 }
  0xc2   :  { %v3397_v53 = vpop.permute.xlu0 %1183 }
  0xc3   :  { %3026 = vset.pattern.permute.xlu1 %v5328_v7 }
  0xc4   :  { %1407 = vperm.xlu1 %3026, %v3267_v45   ;;  %v3348_v18 = vpop.permute.xlu1 %400 }
  0xc5   :  { %5455 = vst [vmem:[#allocation16_spill] sm:$0xff] %v3348_v18 }
  0xc8   :  { %v3350_v22 = vpop.permute.xlu1 %749 }
  0xcc   :  { %v3352_v23 = vpop.permute.xlu1 %410 }
  0xcd   :  { %5456 = vst [vmem:[#allocation17_spill] sm:$0xff] %v3352_v23 }
  0xd0   :  { %v3354_v24 = vpop.permute.xlu1 %420 }
  0xd1   :  { %5457 = vst [vmem:[#allocation18_spill] sm:$0xff] %v3354_v24 }
  0xd4   :  { %v3356_v27 = vpop.permute.xlu1 %430 }
  0xd5   :  { %5458 = vst [vmem:[#allocation19_spill] sm:$0xff] %v3356_v27 }
  0xd8   :  { %v3360_v30 = vpop.permute.xlu1 %440 }
  0xd9   :  { %5460 = vst [vmem:[#allocation21_spill] sm:$0xff] %v3360_v30 }
  0xdd   :  { %v3364_v33 = vpop.permute.xlu1 %549 }
  0xde   :  { %5462 = vst [vmem:[#allocation23_spill] sm:$0xff] %v3364_v33 }
  0xe1   :  { %v3370_v36 = vpop.permute.xlu1 %553 }
  0xe5   :  { %v3393_v52 = vpop.permute.xlu1 %541 }
  0xe6   :  { %5467 = vst [vmem:[#allocation28_spill] sm:$0xff] %v3393_v52 }
  0xe9   :  { %v3407_v61 = vpop.permute.xlu1 %561 }
  0xea   :  { %5468 = vst [vmem:[#allocation29_spill] sm:$0xff] %v3407_v61 }
  0xee   :  { %v3418_v4 = vpop.permute.xlu1 %1064 }
  0xef   :  { %5470 = vst [vmem:[#allocation31_spill] sm:$0xff] %v3418_v4 }
 0x115   :  { %v2920_v37 = vpop.f32.mrf.mxu0 }
 0x116   :  { %v3373_v39 = vadd.f32 %v2920_v37, %v3368_v35 }
 0x117   :  { %v216_v42 = vpop.f32.mrf.mxu0 }
 0x118   :  { %5464 = vst [vmem:[#allocation25_spill] sm:$0xff] %v3373_v39  ;;  %v3378_v43 = vmax.f32 %v3373_v39, 0.0  ;;  %v3381_v45 = vadd.f32 %v3368_v35, %v216_v42 }
 0x119   :  { %v2921_v46 = vpop.f32.mrf.mxu0 }
 0x11a   :  { %5465 = vst [vmem:[#allocation26_spill] sm:$0xff] %v3381_v45  ;;  %v3384_v47 = vmax.f32 %v3381_v45, 0.0  ;;  %v3387_v48 = vadd.f32 %v2921_v46, %v3368_v35  ;;  %v876_v49 = vmul.f32 %v3342_v14, %v3378_v43  ;;  %v650_v51 = vmul.f32 %v3375_v40, %v3378_v43 }
 0x11b   :  { %v1188_v57 = vmul.f32 %v3397_v53, %v3378_v43  ;;  %v219_v59 = vpop.f32.mrf.mxu0 }
 0x11c   :  { %5466 = vst [vmem:[#allocation27_spill] sm:$0xff] %v3387_v48  ;;  %907 = vrot.lane.b32.xlu1 %v876_v49, %s3154_s1  ;;  %684 = vrot.lane.b32.xlu0 %v650_v51, %s3154_s1  ;;  %v3400_v56 = vmax.f32 %v3387_v48, 0.0  ;;  %v460_v58 = vrot.slane %v3384_v47, 7  ;;  %v3410_v63 = vadd.f32 %v3368_v35, %v219_v59  ;;  %v648_v2 = vmul.f32 %v3375_v40, %v3384_v47  ;;  %v3433_v51 = vpop.permute.xlu1 %569 }
 0x11d   :  { %v1186_v37 = vmul.f32 %v3397_v53, %v3384_v47  ;;  %5471 = vst [vmem:[#allocation32_spill] sm:$0xff] %v3433_v51 }
 0x11e   :  { %5469 = vst [vmem:[#allocation30_spill] sm:$0xff] %v3410_v63  ;;  %v877_v3 = vmul.f32 %v3342_v14, %v3400_v56  ;;  %v3421_v5 = vmax.f32 %v3410_v63, 0.0  ;;  %v1189_v42 = vmul.f32 %v3397_v53, %v3400_v56  ;;  %v651_v46 = vmul.f32 %v3375_v40, %v3400_v56 }
 0x11f   :  { %v465_v59 = vrot.slane %v3400_v56, 7  ;;  %v5331_v13 = vrot.slane %v3400_v56, 1 }
 0x120   :  { %1220 = vrot.lane.b32.xlu1 %v1188_v57, %s3154_s1  ;;  %491 = vrot.lane.b32.xlu0 %v460_v58, %s3154_s1  ;;  %v875_v49 = vmul.f32 %v3342_v14, %v3421_v5  ;;  %v2924_v57 = vpop.f32.mrf.mxu0  ;;  %v461_v38 = vrot.slane %v3421_v5, 7  ;;  %v316_v6 = vrot.slane %v3421_v5, 1 }
 0x122   :  { %v232_v25 = vpop.f32.mrf.mxu0  ;;  %v462_v16 = vsel %vm459_vm0, %v460_v58, %v461_v38 }
 0x124   :  { %680 = vrot.lane.b32.xlu1 %v648_v2, %s3154_s1  ;;  %909 = vrot.lane.b32.xlu0 %v877_v3, %s3154_s1  ;;  %v463_v2 = vrot.slane %v3378_v43, 7  ;;  %v3439_v3 = vpop.permute.xlu0 %395 }
 0x125   :  { %5472 = vst [vmem:[#allocation33_spill] sm:$0xff] %v3439_v3 }
 0x126   :  { %v466_v44 = vsel %vm459_vm0, %v463_v2, %v465_v59  ;;  %v464_v11 = vsel %vm459_vm0, %v461_v38, %v463_v2 }
 0x128   :  { %1216 = vrot.lane.b32.xlu1 %v1186_v37, %s3154_s1  ;;  %1222 = vrot.lane.b32.xlu0 %v1189_v42, %s3154_s1  ;;  %v3442_v37 = vadd.f32 %v2924_v57, %v3368_v35  ;;  %v649_v42 = vmul.f32 %v3375_v40, %v3421_v5  ;;  %v1187_v57 = vmul.f32 %v3397_v53, %v3421_v5  ;;  %v3459_v10 = vpop.permute.xlu0 %405 }
 0x129   :  { %5475 = vst [vmem:[#allocation36_spill] sm:$0xff] %v3459_v10 }
 0x12a   :  { %5473 = vst [vmem:[#allocation34_spill] sm:$0xff] %v3442_v37 }
 0x12c   :  { %686 = vrot.lane.b32.xlu1 %v651_v46, %s3154_s1  ;;  %905 = vrot.lane.b32.xlu0 %v875_v49, %s3154_s1  ;;  %v3450_v46 = vpop.permute.xlu1 %573  ;;  %v3453_v49 = vmax.f32 %v3442_v37, 0.0 }
 0x12d   :  { %5474 = vst [vmem:[#allocation35_spill] sm:$0xff] %v3450_v46 }
 0x12e   :  { %v880_v29 = vmul.f32 %v3342_v14, %v3453_v49  ;;  %v654_v7 = vmul.f32 %v3375_v40, %v3453_v49  ;;  %v471_v63 = vrot.slane %v3453_v49, 7  ;;  %v326_v4 = vrot.slane %v3453_v49, 1 }
 0x130   :  { %497 = vrot.lane.b32.xlu1 %v466_v44, %s3154_s1  ;;  %682 = vrot.lane.b32.xlu0 %v649_v42, %s3154_s1  ;;  %v3463_v44 = vpop.permute.xlu1 %1076  ;;  %v318_v42 = vrot.slane %v3378_v43, 1  ;;  %v1192_v43 = vmul.f32 %v3397_v53, %v3453_v49 }
 0x131   :  { %5476 = vst [vmem:[#allocation37_spill] sm:$0xff] %v3463_v44 }
 0x132   :  { %v321_v2 = vsel %vm314_vm1, %v318_v42, %v5331_v13  ;;  %v319_v48 = vsel %vm314_vm1, %v316_v6, %v318_v42 }
 0x133   :  { %v445_v38 = vmul.f32 %v3362_v31, %v321_v2 }
 0x134   :  { %495 = vrot.lane.b32.xlu1 %v464_v11, %s3154_s1  ;;  %1218 = vrot.lane.b32.xlu0 %v1187_v57, %s3154_s1  ;;  %v3474_v11 = vpop.permute.xlu0 %1281  ;;  %v3477_v57 = vadd.f32 %v3368_v35, %v232_v25  ;;  %v3484_v58 = vpop.permute.xlu1 %1379 }
 0x135   :  { %5478 = vst [vmem:[#allocation39_spill] sm:$0xff] %v3484_v58  ;;  %v754_v25 = vmul.f32 %v3350_v22, %v445_v38  ;;  %v1286_v31 = vmul.f32 %v3474_v11, %v445_v38 }
 0x136   :  { %5477 = vst [vmem:[#allocation38_spill] sm:$0xff] %v3477_v57 }
 0x138   :  { %915 = vrot.lane.b32.xlu1 %v880_v29, %s3154_s1  ;;  %493 = vrot.lane.b32.xlu0 %v462_v16, %s3154_s1  ;;  %v3489_v16 = vmax.f32 %v3477_v57, 0.0  ;;  %v974_v29 = vmul.f32 %v3344_v15, %v445_v38  ;;  %v3494_v13 = vpop.permute.xlu0 %415  ;;  %v3498_v2 = vpop.permute.xlu1 %1387 }
 0x139   :  { %5479 = vst [vmem:[#allocation40_spill] sm:$0xff] %v3494_v13  ;;  %5480 = vst [vmem:[#allocation41_spill] sm:$0xff] %v3498_v2  ;;  %v2925_v57 = vpop.f32.mrf.mxu0 }
 0x13a   :  { %v467_v8 = vrot.slane %v3489_v16, 7 }
 0x13c   :  { %1228 = vrot.lane.b32.xlu1 %v1192_v43, %s3154_s1  ;;  %692 = vrot.lane.b32.xlu0 %v654_v7, %s3154_s1  ;;  %v315_v43 = vrot.slane %v3384_v47, 1  ;;  %v878_v7 = vmul.f32 %v3342_v14, %v3489_v16  ;;  %v3508_v5 = vpop.permute.xlu0 %425  ;;  %v468_v38 = vsel %vm459_vm0, %v465_v59, %v467_v8 }
 0x13d   :  { %5481 = vst [vmem:[#allocation42_spill] sm:$0xff] %v3508_v5 }
 0x13e   :  { %v317_v37 = vsel %vm314_vm1, %v315_v43, %v316_v6  ;;  %v1190_v43 = vmul.f32 %v3397_v53, %v3489_v16 }
 0x13f   :  { %v443_v47 = vmul.f32 %v3366_v34, %v317_v37  ;;  %v444_v37 = vmul.f32 %v3358_v28, %v319_v48  ;;  %v235_v34 = vpop.f32.mrf.mxu0  ;;  %v322_v28 = vrot.slane %v3489_v16, 1 }
 0x140   :  { %788 = vrot.lane.b32.xlu1 %v754_v25, %s3154_s1  ;;  %1005 = vrot.lane.b32.xlu0 %v974_v29, %s3154_s1  ;;  %v652_v25 = vmul.f32 %v3375_v40, %v3489_v16  ;;  %v3513_v29 = vpop.permute.xlu1 %577  ;;  %v3526_v39 = vpop.permute.xlu0 %435  ;;  %v3536_v42 = vadd.f32 %v3368_v35, %v235_v34 }
 0x141   :  { %5482 = vst [vmem:[#allocation43_spill] sm:$0xff] %v3513_v29  ;;  %5484 = vst [vmem:[#allocation45_spill] sm:$0xff] %v3526_v39 }
 0x142   :  { %5486 = vst [vmem:[#allocation47_spill] sm:$0xff] %v3536_v42 }
 0x144   :  { %911 = vrot.lane.b32.xlu1 %v878_v7, %s3154_s1  ;;  %1318 = vrot.lane.b32.xlu0 %v1286_v31, %s3154_s1  ;;  %v3520_v31 = vadd.f32 %v2925_v57, %v3368_v35  ;;  %v752_v7 = vmul.f32 %v3350_v22, %v443_v47  ;;  %v3530_v6 = vpop.permute.xlu1 %1080  ;;  %v973_v57 = vmul.f32 %v3344_v15, %v444_v37  ;;  %v3542_v48 = vpop.permute.xlu0 %545 }
 0x145   :  { %5485 = vst [vmem:[#allocation46_spill] sm:$0xff] %v3530_v6  ;;  %5487 = vst [vmem:[#allocation48_spill] sm:$0xff] %v3542_v48 }
 0x146   :  { %5483 = vst [vmem:[#allocation44_spill] sm:$0xff] %v3520_v31  ;;  %v3533_v59 = vmax.f32 %v3520_v31, 0.0  ;;  %v5490_v31 = vrot.slane %v3400_v56, 1 }
 0x148   :  { %688 = vrot.lane.b32.xlu1 %v652_v25, %s3154_s1  ;;  %499 = vrot.lane.b32.xlu0 %v468_v38, %s3154_s1  ;;  %v1284_v25 = vmul.f32 %v3474_v11, %v443_v47  ;;  %v3545_v38 = vmax.f32 %v3536_v42, 0.0  ;;  %v3550_v34 = vpop.permute.xlu1 %1084  ;;  %v1285_v47 = vmul.f32 %v3474_v11, %v444_v37  ;;  %v323_v42 = vsel %vm314_vm1, %v5490_v31, %v322_v28 }
 0x149   :  { %5488 = vst [vmem:[#allocation49_spill] sm:$0xff] %v3550_v34  ;;  %v655_v31 = vmul.f32 %v3375_v40, %v3533_v59  ;;  %v473_v45 = vrot.slane %v3533_v59, 7  ;;  %v5354_v58 = vrot.slane %v3533_v59, 1 }
 0x14a   :  { %v469_v2 = vrot.slane %v3545_v38, 7 }
 0x14c   :  { %1224 = vrot.lane.b32.xlu1 %v1190_v43, %s3154_s1  ;;  %784 = vrot.lane.b32.xlu0 %v752_v7, %s3154_s1  ;;  %v753_v43 = vmul.f32 %v3350_v22, %v444_v37  ;;  %v1193_v7 = vmul.f32 %v3397_v53, %v3533_v59  ;;  %v3565_v16 = vpop.permute.xlu1 %589  ;;  %v1191_v37 = vmul.f32 %v3397_v53, %v3545_v38 }
 0x14d   :  { %5491 = vst [vmem:[#allocation51_spill] sm:$0xff] %v3565_v16  ;;  %v472_v16 = vsel %vm459_vm0, %v469_v2, %v471_v63 }
 0x150   :  { %1003 = vrot.lane.b32.xlu1 %v973_v57, %s3154_s1  ;;  %1314 = vrot.lane.b32.xlu0 %v1284_v25, %s3154_s1  ;;  %v879_v57 = vmul.f32 %v3342_v14, %v3545_v38  ;;  %v3558_v25 = vpop.permute.xlu0 %557 }
 0x151   :  { %5489 = vst [vmem:[#allocation50_spill] sm:$0xff] %v3558_v25 }
 0x154   :  { %786 = vrot.lane.b32.xlu1 %v753_v43, %s3154_s1  ;;  %1230 = vrot.lane.b32.xlu0 %v1193_v7, %s3154_s1  ;;  %v881_v43 = vmul.f32 %v3342_v14, %v3533_v59  ;;  %v446_v7 = vmul.f32 %v3337_v9, %v323_v42  ;;  %v3574_v56 = vpop.permute.xlu0 %565  ;;  %v470_v9 = vsel %vm459_vm0, %v467_v8, %v469_v2 }
 0x155   :  { %5492 = vst [vmem:[#allocation52_spill] sm:$0xff] %v3574_v56  ;;  %v329_v8 = vsel %vm314_vm1, %v326_v4, %v5354_v58 }
 0x156   :  { %v755_v48 = vmul.f32 %v3350_v22, %v446_v7 }
 0x158   :  { %1316 = vrot.lane.b32.xlu1 %v1285_v47, %s3154_s1  ;;  %913 = vrot.lane.b32.xlu0 %v879_v57, %s3154_s1  ;;  %v975_v47 = vmul.f32 %v3344_v15, %v446_v7  ;;  %v3579_v57 = vpop.permute.xlu1 %1092  ;;  %v3586_v42 = vpop.permute.xlu0 %581 }
 0x159   :  { %5493 = vst [vmem:[#allocation53_spill] sm:$0xff] %v3579_v57  ;;  %5494 = vst [vmem:[#allocation54_spill] sm:$0xff] %v3586_v42 }
 0x15c   :  { %917 = vrot.lane.b32.xlu1 %v881_v43, %s3154_s1  ;;  %1226 = vrot.lane.b32.xlu0 %v1191_v37, %s3154_s1  ;;  %v2928_v43 = vpop.f32.mrf.mxu0  ;;  %v474_v37 = vsel %vm459_vm0, %v471_v63, %v473_v45  ;;  %v3594_v52 = vpop.permute.xlu1 %1391 }
 0x15d   :  { %5495 = vst [vmem:[#allocation55_spill] sm:$0xff] %v3594_v52  ;;  %v3605_v49 = vpop.permute.xlu0 %585 }
 0x15e   :  { %5497 = vst [vmem:[#allocation57_spill] sm:$0xff] %v3605_v49  ;;  %v248_v42 = vpop.f32.mrf.mxu0 }
 0x160   :  { %694 = vrot.lane.b32.xlu1 %v655_v31, %s3154_s1  ;;  %1007 = vrot.lane.b32.xlu0 %v975_v47, %s3154_s1  ;;  %v3597_v31 = vadd.f32 %v2928_v43, %v3368_v35  ;;  %v653_v47 = vmul.f32 %v3375_v40, %v3545_v38  ;;  %v1287_v43 = vmul.f32 %v3474_v11, %v446_v7  ;;  %v3614_v33 = vpop.permute.xlu1 %1403 }
 0x161   :  { %5498 = vst [vmem:[#allocation58_spill] sm:$0xff] %v3614_v33 }
 0x162   :  { %5496 = vst [vmem:[#allocation56_spill] sm:$0xff] %v3597_v31 }
 0x164   :  { %505 = vrot.lane.b32.xlu1 %v474_v37, %s3154_s1  ;;  %501 = vrot.lane.b32.xlu0 %v470_v9, %s3154_s1  ;;  %v3610_v9 = vmax.f32 %v3597_v31, 0.0  ;;  %v449_v37 = vmul.f32 %v3439_v3, %v329_v8  ;;  %v324_v8 = vrot.slane %v3545_v38, 1  ;;  %v3630_v63 = vpop.permute.xlu1 %597 }
 0x165   :  { %5501 = vst [vmem:[#allocation61_spill] sm:$0xff] %v3630_v63 }
 0x166   :  { %v978_v58 = vmul.f32 %v3344_v15, %v449_v37  ;;  %v884_v7 = vmul.f32 %v3342_v14, %v3610_v9  ;;  %v325_v3 = vsel %vm314_vm1, %v322_v28, %v324_v8 }
 0x168   :  { %690 = vrot.lane.b32.xlu1 %v653_v47, %s3154_s1  ;;  %790 = vrot.lane.b32.xlu0 %v755_v48, %s3154_s1  ;;  %v3620_v47 = vadd.f32 %v3368_v35, %v248_v42  ;;  %v3622_v48 = vpop.permute.xlu0 %593  ;;  %v1290_v42 = vmul.f32 %v3474_v11, %v449_v37  ;;  %v3647_v31 = vpop.permute.xlu1 %1096 }
 0x169   :  { %5500 = vst [vmem:[#allocation60_spill] sm:$0xff] %v3622_v48  ;;  %5503 = vst [vmem:[#allocation63_spill] sm:$0xff] %v3647_v31 }
 0x16a   :  { %5499 = vst [vmem:[#allocation59_spill] sm:$0xff] %v3620_v47  ;;  %v3633_v2 = vmax.f32 %v3620_v47, 0.0 }
 0x16c   :  { %503 = vrot.lane.b32.xlu1 %v472_v16, %s3154_s1  ;;  %1320 = vrot.lane.b32.xlu0 %v1287_v43, %s3154_s1  ;;  %v3635_v16 = vpop.permute.xlu0 %1068  ;;  %v758_v43 = vmul.f32 %v3350_v22, %v449_v37  ;;  %v882_v38 = vmul.f32 %v3342_v14, %v3633_v2  ;;  %v475_v47 = vrot.slane %v3633_v2, 7  ;;  %v327_v37 = vsel %vm314_vm1, %v324_v8, %v326_v4 }
 0x16d   :  { %5502 = vst [vmem:[#allocation62_spill] sm:$0xff] %v3635_v16 }
 0x16e   :  { %v476_v63 = vsel %vm459_vm0, %v473_v45, %v475_v47 }
 0x170   :  { %1013 = vrot.lane.b32.xlu1 %v978_v58, %s3154_s1  ;;  %923 = vrot.lane.b32.xlu0 %v884_v7, %s3154_s1  ;;  %v656_v58 = vmul.f32 %v3375_v40, %v3633_v2  ;;  %v447_v7 = vmul.f32 %v3340_v12, %v325_v3  ;;  %v3651_v48 = vpop.permute.xlu0 %1072  ;;  %v3660_v3 = vpop.permute.xlu1 %601 }
 0x171   :  { %5504 = vst [vmem:[#allocation64_spill] sm:$0xff] %v3651_v48  ;;  %5505 = vst [vmem:[#allocation65_spill] sm:$0xff] %v3660_v3 }
 0x172   :  { %v976_v28 = vmul.f32 %v3344_v15, %v447_v7 }
 0x174   :  { %1326 = vrot.lane.b32.xlu1 %v1290_v42, %s3154_s1  ;;  %796 = vrot.lane.b32.xlu0 %v758_v43, %s3154_s1  ;;  %v448_v42 = vmul.f32 %v3346_v17, %v327_v37  ;;  %v2929_v43 = vpop.f32.mrf.mxu0  ;;  %v3665_v8 = vpop.permute.xlu0 %1088  ;;  %v1288_v37 = vmul.f32 %v3474_v11, %v447_v7  ;;  %v330_v17 = vrot.slane %v3633_v2, 1 }
 0x175   :  { %v3663_v4 = vadd.f32 %v2929_v43, %v3368_v35  ;;  %5507 = vst [vmem:[#allocation67_spill] sm:$0xff] %v3665_v8  ;;  %v3679_v43 = vpop.permute.xlu1 %1104 }
 0x176   :  { %v251_v12 = vpop.f32.mrf.mxu0  ;;  %5509 = vst [vmem:[#allocation69_spill] sm:$0xff] %v3679_v43  ;;  %v5511_v43 = vrot.slane %v3533_v59, 1 }
 0x177   :  { %5506 = vst [vmem:[#allocation66_spill] sm:$0xff] %v3663_v4  ;;  %v3672_v45 = vmax.f32 %v3663_v4, 0.0 }
 0x178   :  { %696 = vrot.lane.b32.xlu1 %v656_v58, %s3154_s1  ;;  %919 = vrot.lane.b32.xlu0 %v882_v38, %s3154_s1  ;;  %v757_v58 = vmul.f32 %v3350_v22, %v448_v42  ;;  %v977_v38 = vmul.f32 %v3344_v15, %v448_v42  ;;  %v3682_v3 = vpop.permute.xlu0 %1100  ;;  %v3692_v4 = vpop.f32.mrf.mxu0 }
 0x179   :  { %5510 = vst [vmem:[#allocation70_spill] sm:$0xff] %v3682_v3  ;;  %v5371_v48 = vrot.slane %v3672_v45, 7 }
 0x17a   :  { %v264_v3 = vpop.f32.mrf.mxu0 }
 0x17c   :  { %1009 = vrot.lane.b32.xlu1 %v976_v28, %s3154_s1  ;;  %507 = vrot.lane.b32.xlu0 %v476_v63, %s3154_s1  ;;  %v3675_v63 = vadd.f32 %v3368_v35, %v251_v12  ;;  %v756_v28 = vmul.f32 %v3350_v22, %v447_v7  ;;  %v885_v12 = vmul.f32 %v3342_v14, %v3672_v45  ;;  %v479_v7 = vrot.slane %v3610_v9, 7 }
 0x17e   :  { %5508 = vst [vmem:[#allocation68_spill] sm:$0xff] %v3675_v63  ;;  %v482_v59 = vsel %vm459_vm0, %v479_v7, %v5371_v48  ;;  %v334_v48 = vrot.slane %v3610_v9, 1 }
 0x180   :  { %794 = vrot.lane.b32.xlu1 %v757_v58, %s3154_s1  ;;  %1011 = vrot.lane.b32.xlu0 %v977_v38, %s3154_s1  ;;  %v3687_v58 = vmax.f32 %v3675_v63, 0.0  ;;  %v1289_v38 = vmul.f32 %v3474_v11, %v448_v42  ;;  %v3703_v63 = vpop.permute.xlu0 %1108 }
 0x181   :  { %5513 = vst [vmem:[#allocation72_spill] sm:$0xff] %v3703_v63 }
 0x182   :  { %v883_v42 = vmul.f32 %v3342_v14, %v3687_v58  ;;  %v477_v63 = vrot.slane %v3687_v58, 7  ;;  %v332_v33 = vrot.slane %v3687_v58, 1 }
 0x184   :  { %1322 = vrot.lane.b32.xlu1 %v1288_v37, %s3154_s1  ;;  %792 = vrot.lane.b32.xlu0 %v756_v28, %s3154_s1  ;;  %v331_v37 = vsel %vm314_vm1, %v5511_v43, %v330_v17  ;;  %v3701_v28 = vpop.permute.xlu1 %1407  ;;  %v3716_v43 = vadd.f32 %v3368_v35, %v264_v3 }
 0x185   :  { %5512 = vst [vmem:[#allocation71_spill] sm:$0xff] %v3701_v28  ;;  %v3708_v16 = vmul.f32 %v3348_v18, %v331_v37  ;;  %v657_v37 = vmul.f32 %v3375_v40, %v3687_v58  ;;  %v478_v28 = vsel %vm459_vm0, %v475_v47, %v477_v63 }
 0x186   :  { %5514 = vst [vmem:[#allocation73_spill] sm:$0xff] %v3716_v43  ;;  %v3732_v3 = vmax.f32 %v3716_v43, 0.0 }
 0x187   :  { %v979_v18 = vmul.f32 %v3344_v15, %v3708_v16  ;;  %v759_v43 = vmul.f32 %v3350_v22, %v3708_v16 }
 0x188   :  { %925 = vrot.lane.b32.xlu1 %v885_v12, %s3154_s1  ;;  %1324 = vrot.lane.b32.xlu0 %v1289_v38, %s3154_s1 }
 0x18c   :  { %921 = vrot.lane.b32.xlu1 %v883_v42, %s3154_s1  ;;  %513 = vrot.lane.b32.xlu0 %v482_v59, %s3154_s1  ;;  %v336_v42 = vrot.slane %v3672_v45, 1 }
 0x18e   :  { %v3718_v12 = vpop.permute.xlu1 %907  ;;  %v3720_v38 = vpop.permute.xlu0 %684  ;;  %v337_v31 = vsel %vm314_vm1, %v334_v48, %v336_v42 }
 0x18f   :  { %5515 = vst [vmem:[#allocation74_spill] sm:$0xff] %v3718_v12  ;;  %5516 = vst [vmem:[#allocation75_spill] sm:$0xff] %v3720_v38  ;;  %v480_v12 = vsel %vm459_vm0, %v477_v63, %v479_v7  ;;  %v886_v7 = vmul.f32 %v3342_v14, %v3732_v3  ;;  %v3753_v47 = vmul.f32 %v3494_v13, %v337_v31 }
 0x190   :  { %698 = vrot.lane.b32.xlu1 %v657_v37, %s3154_s1  ;;  %1015 = vrot.lane.b32.xlu0 %v979_v18, %s3154_s1  ;;  %v333_v63 = vsel %vm314_vm1, %v330_v17, %v332_v33  ;;  %v658_v31 = vmul.f32 %v3375_v40, %v3610_v9 }
 0x191   :  { %v3769_v17 = vmul.f32 %v3459_v10, %v333_v63 }
 0x192   :  { %v3734_v59 = vpop.permute.xlu1 %1220  ;;  %v3736_v38 = vpop.permute.xlu0 %491 }
 0x193   :  { %5517 = vst [vmem:[#allocation76_spill] sm:$0xff] %v3734_v59  ;;  %5518 = vst [vmem:[#allocation77_spill] sm:$0xff] %v3736_v38  ;;  %v335_v59 = vsel %vm314_vm1, %v332_v33, %v334_v48  ;;  %v982_v38 = vmul.f32 %v3344_v15, %v3753_v47 }
 0x194   :  { %511 = vrot.lane.b32.xlu1 %v480_v12, %s3154_s1  ;;  %509 = vrot.lane.b32.xlu0 %v478_v28, %s3154_s1  ;;  %v338_v12 = vrot.slane %v3732_v3, 1  ;;  %v2933_v28 = vpop.f32.mrf.mxu0  ;;  %v3772_v33 = vmul.f32 %v3352_v23, %v335_v59 }
 0x196   :  { %v3744_v18 = vpop.permute.xlu1 %680  ;;  %v3746_v37 = vpop.permute.xlu0 %909  ;;  %v339_v48 = vsel %vm314_vm1, %v336_v42, %v338_v12  ;;  %v981_v63 = vmul.f32 %v3344_v15, %v3772_v33 }
 0x197   :  { %5519 = vst [vmem:[#allocation78_spill] sm:$0xff] %v3744_v18  ;;  %5520 = vst [vmem:[#allocation79_spill] sm:$0xff] %v3746_v37  ;;  %v3786_v59 = vmul.f32 %v3354_v24, %v339_v48  ;;  %v5525_v48 = vrot.slane %v3672_v45, 7  ;;  %v1194_v24 = vmul.f32 %v3397_v53, %v3633_v2 }
 0x198   :  { %798 = vrot.lane.b32.xlu1 %v759_v43, %s3154_s1  ;;  %927 = vrot.lane.b32.xlu0 %v886_v7, %s3154_s1  ;;  %v267_v43 = vpop.f32.mrf.mxu0 }
 0x199   :  { %v3789_v42 = vadd.f32 %v3368_v35, %v267_v43  ;;  %v983_v23 = vmul.f32 %v3344_v15, %v3786_v59 }
 0x19a   :  { %v3760_v18 = vpop.permute.xlu1 %1216  ;;  %v3762_v37 = vpop.permute.xlu0 %1222 }
 0x19b   :  { %5521 = vst [vmem:[#allocation80_spill] sm:$0xff] %v3760_v18  ;;  %v980_v18 = vmul.f32 %v3344_v15, %v3769_v17  ;;  %5523 = vst [vmem:[#allocation82_spill] sm:$0xff] %v3789_v42 }
 0x19c   :  { %1021 = vrot.lane.b32.xlu1 %v982_v38, %s3154_s1  ;;  %700 = vrot.lane.b32.xlu0 %v658_v31, %s3154_s1  ;;  %v483_v38 = vrot.slane %v3732_v3, 7 }
 0x19e   :  { %v3777_v7 = vpop.permute.xlu1 %686  ;;  %v3779_v13 = vpop.permute.xlu0 %905  ;;  %v484_v43 = vsel %vm459_vm0, %v5525_v48, %v483_v38 }
 0x19f   :  { %5522 = vst [vmem:[#allocation81_spill] sm:$0xff] %v3779_v13  ;;  %v3801_v13 = vmax.f32 %v3789_v42, 0.0 }
 0x1a0   :  { %1017 = vrot.lane.b32.xlu1 %v980_v18, %s3154_s1  ;;  %1019 = vrot.lane.b32.xlu0 %v981_v63, %s3154_s1 }
 0x1a1   :  { %v485_v42 = vrot.slane %v3801_v13, 7  ;;  %v5382_v57 = vrot.slane %v3801_v13, 1 }
 0x1a2   :  { %v3794_v31 = vpop.permute.xlu1 %497  ;;  %v3796_v10 = vpop.permute.xlu0 %682 }
 0x1a3   :  { %5524 = vst [vmem:[#allocation83_spill] sm:$0xff] %v3796_v10  ;;  %v1195_v10 = vmul.f32 %v3397_v53, %v3687_v58  ;;  %v341_v2 = vsel %vm314_vm1, %v338_v12, %v5382_v57  ;;  %v3832_v58 = vadd.f32 %v3692_v4, %v3368_v35  ;;  %v760_v12 = vmul.f32 %v3350_v22, %v3769_v17 }
 0x1a4   :  { %515 = vrot.lane.b32.xlu1 %v484_v43, %s3154_s1  ;;  %1023 = vrot.lane.b32.xlu0 %v983_v23, %s3154_s1  ;;  %v486_v43 = vsel %vm459_vm0, %v483_v38, %v485_v42  ;;  %v659_v38 = vmul.f32 %v3375_v40, %v3672_v45 }
 0x1a5   :  { %5529 = vst [vmem:[#allocation87_spill] sm:$0xff] %v3832_v58 }
 0x1a6   :  { %v3808_v18 = vpop.permute.xlu1 %495  ;;  %v3810_v63 = vpop.permute.xlu0 %1218 }
 0x1a7   :  { %5526 = vst [vmem:[#allocation84_spill] sm:$0xff] %v3808_v18  ;;  %5527 = vst [vmem:[#allocation85_spill] sm:$0xff] %v3810_v63 }
 0x1a8   :  { %1232 = vrot.lane.b32.xlu1 %v1194_v24, %s3154_s1  ;;  %1234 = vrot.lane.b32.xlu0 %v1195_v10, %s3154_s1  ;;  %v3835_v10 = vadd.f32 %v2933_v28, %v3368_v35  ;;  %v3851_v35 = vmax.f32 %v3832_v58, 0.0  ;;  %v5531_v28 = vmov 3   ;;  %v1196_v58 = vmul.f32 %v3397_v53, %v3610_v9 }
 0x1aa   :  { %v3820_v48 = vpop.permute.xlu1 %915  ;;  %v3822_v23 = vpop.permute.xlu0 %493  ;;  %5530 = vst [vmem:[#allocation88_spill] sm:$0xff] %v3835_v10  ;;  %v3854_v4 = vmax.f32 %v3835_v10, 0.0 }
 0x1ab   :  { %5528 = vst [vmem:[#allocation86_spill] sm:$0xff] %v3822_v23 }
 0x1ac   :  { %1419 = vperm.xlu1 %3026, %v3276_v54   ;;  %517 = vrot.lane.b32.xlu0 %v486_v43, %s3154_s1  ;;  %v3846_v54 = vmul.f32 %v3508_v5, %v341_v2  ;;  %v489_v5 = vrot.slane %v3854_v4, 7 }
 0x1ae   :  { %v3837_v24 = vpop.permute.xlu1 %1228  ;;  %v3839_v63 = vpop.permute.xlu0 %692  ;;  %v984_v2 = vmul.f32 %v3344_v15, %v3846_v54 }
 0x1b0   :  { %702 = vrot.lane.b32.xlu1 %v659_v38, %s3154_s1  ;;  %800 = vrot.lane.b32.xlu0 %v760_v12, %s3154_s1  ;;  %v1291_v38 = vmul.f32 %v3474_v11, %v3708_v16  ;;  %v487_v12 = vrot.slane %v3851_v35, 7 }
 0x1b1   :  { %3027 = vset.pattern.permute.xlu1 %v5531_v28 }
 0x1b2   :  { %v3857_v43 = vpop.permute.xlu1 %788  ;;  %v3859_v57 = vpop.permute.xlu0 %1005 }
 0x1b3   :  { %5532 = vst [vmem:[#allocation89_spill] sm:$0xff] %v3857_v43  ;;  %5533 = vst [vmem:[#allocation90_spill] sm:$0xff] %v3859_v57  ;;  %v490_v43 = vsel %vm459_vm0, %v487_v12, %v489_v5 }
 0x1b4   :  { %1025 = vrot.lane.b32.xlu1 %v984_v2, %s3154_s1  ;;  %1328 = vrot.lane.b32.xlu0 %v1291_v38, %s3154_s1  ;;  %v763_v2 = vmul.f32 %v3350_v22, %v3786_v59  ;;  %v488_v38 = vsel %vm459_vm0, %v485_v42, %v487_v12  ;;  %v1292_v12 = vmul.f32 %v3474_v11, %v3769_v17 }
 0x1b5   :  { %v1293_v17 = vmul.f32 %v3474_v11, %v3772_v33 }
 0x1b6   :  { %v3869_v10 = vpop.permute.xlu1 %911  ;;  %v3871_v28 = vpop.permute.xlu0 %1318 }
 0x1b7   :  { %5534 = vst [vmem:[#allocation91_spill] sm:$0xff] %v3871_v28 }
 0x1b8   :  { %1236 = vrot.lane.b32.xlu1 %v1196_v58, %s3154_s1  ;;  %521 = vrot.lane.b32.xlu0 %v490_v43, %s3154_s1  ;;  %v761_v58 = vmul.f32 %v3350_v22, %v3772_v33  ;;  %v1294_v43 = vmul.f32 %v3474_v11, %v3753_v47 }
 0x1ba   :  { %v3878_v16 = vpop.permute.xlu1 %688  ;;  %v3880_v57 = vpop.permute.xlu0 %499 }
 0x1bc   :  { %519 = vrot.lane.b32.xlu1 %v488_v38, %s3154_s1  ;;  %806 = vrot.lane.b32.xlu0 %v763_v2, %s3154_s1 }
 0x1be   :  { %v3887_v9 = vpop.permute.xlu1 %1224  ;;  %v3889_v5 = vpop.permute.xlu0 %784 }
 0x1bf   :  { %5535 = vst [vmem:[#allocation92_spill] sm:$0xff] %v3887_v9  ;;  %5536 = vst [vmem:[#allocation93_spill] sm:$0xff] %v3889_v5 }
 0x1c0   :  { %802 = vrot.lane.b32.xlu1 %v761_v58, %s3154_s1  ;;  %1334 = vrot.lane.b32.xlu0 %v1294_v43, %s3154_s1  ;;  %v762_v58 = vmul.f32 %v3350_v22, %v3753_v47  ;;  %v3060_v47 = vld [vmem:[#allocation4 + $0x10] sm:$0xff] }
 0x1c2   :  { %v3897_v28 = vpop.permute.xlu1 %1003  ;;  %v3899_v42 = vpop.permute.xlu0 %1314 }
 0x1c3   :  { %5537 = vst [vmem:[#allocation94_spill] sm:$0xff] %v3897_v28  ;;  %5538 = vst [vmem:[#allocation95_spill] sm:$0xff] %v3899_v42 }
 0x1c4   :  { %1330 = vrot.lane.b32.xlu1 %v1292_v12, %s3154_s1  ;;  %1116 = vperm.xlu0 %3021, %v3282_v60   ;;  %v5542_v12 = vmov 2  }
 0x1c6   :  { %v3905_v2 = vpop.permute.xlu1 %786  ;;  %v3907_v38 = vpop.permute.xlu0 %1230 }
 0x1c7   :  { %5539 = vst [vmem:[#allocation96_spill] sm:$0xff] %v3905_v2  ;;  %5540 = vst [vmem:[#allocation97_spill] sm:$0xff] %v3907_v38  ;;  %v3038_v2 = vld [vmem:[#allocation6 + $0x40] sm:$0xff]  }
 0x1c8   :  { %804 = vrot.lane.b32.xlu1 %v762_v58, %s3154_s1  ;;  %1120 = vperm.xlu0 %3021, %v3291_v1  }
 0x1c9   :  { %2934 = vmatprep.subr.bf16.mxu1 %v3038_v2 }
 0x1ca   :  { %v3913_v43 = vpop.permute.xlu1 %1316  ;;  %v914_v9 = vpop.permute.xlu0 %913  ;;  %2935 = vmatpush3.bf16.msra.mxu1 %v3038_v2 }
 0x1cb   :  { %5541 = vst [vmem:[#allocation98_spill] sm:$0xff] %v3913_v43  ;;  %v887_v43 = vmul.f32 %v3342_v14, %v3801_v13 }
 0x1cc   :  { %1332 = vrot.lane.b32.xlu1 %v1293_v17, %s3154_s1  ;;  %3028 = vset.pattern.permute.xlu0 %v5542_v12 }
 0x1cd   :  { %1375 = vperm.xlu0 %3028, %v3242_v26   ;;  %v888_v26 = vmul.f32 %v3342_v14, %v3851_v35 }
 0x1ce   :  { %v918_v5 = vpop.permute.xlu1 %917  ;;  %v1227_v28 = vpop.permute.xlu0 %1226 }
 0x1d0   :  { %1112 = vperm.xlu1 %3027, %v3285_v62  }
 0x1d1   :  { %1383 = vperm.xlu0 %3028, %v3060_v47  }
 0x1d2   :  { %v695_v58 = vpop.permute.xlu1 %694  ;;  %v3921_v1 = vpop.permute.xlu0 %1007 }
 0x1d3   :  { %5543 = vst [vmem:[#allocation99_spill] sm:$0xff] %v3921_v1 }
 0x1d4   :  { %929 = vrot.lane.b32.xlu1 %v887_v43, %s3154_s1 }
 0x1d5   :  { %1395 = vperm.xlu0 %3028, %v3250_v32  }
 0x1d6   :  { %v506_v33 = vpop.permute.xlu1 %505  ;;  %v502_v17 = vpop.permute.xlu0 %501 }
 0x1d7   :  { %v3930_v42 = vmul.f32 %v3433_v51, %v506_v33  ;;  %v609_v47 = vmul.f32 %v3407_v61, %v502_v17 }
 0x1d8   :  { %931 = vrot.lane.b32.xlu1 %v888_v26, %s3154_s1 }
 0x1d9   :  { %5544 = vst [vmem:[#allocation100_spill] sm:$0xff] %v3930_v42  ;;  %1399 = vperm.xlu0 %3028, %v3260_v41   ;;  %v629_v1 = vmul.f32 %v3225_v19, %v609_v47  ;;  %v856_v43 = vmul.f32 %v3229_v20, %v609_v47  ;;  %v1168_v32 = vmul.f32 %v3233_v21, %v609_v47 }
 0x1da   :  { %v858_v23 = vmul.f32 %v3229_v20, %v3930_v42  ;;  %v691_v18 = vpop.permute.xlu1 %690  ;;  %v3940_v38 = vpop.permute.xlu0 %790  ;;  %v631_v33 = vmul.f32 %v3225_v19, %v3930_v42  ;;  %v344_v42 = vrot.slane %v3854_v4, 1 }
 0x1db   :  { %v3944_v17 = vadd.f32 %v691_v18, %v629_v1  ;;  %v3946_v26 = vadd.f32 %v914_v9, %v856_v43  ;;  %v3948_v41 = vadd.f32 %v1227_v28, %v1168_v32  ;;  %v342_v9 = vrot.slane %v3851_v35, 1 }
 0x1dc   :  { %1124 = vperm.xlu1 %3027, %v3288_v0   ;;  %v3951_v47 = vadd.f32 %v918_v5, %v858_v23  ;;  %v3953_v51 = vadd.f32 %v695_v58, %v631_v33  ;;  %v5545_v58 = vrot.slane %v3801_v13, 1 }
 0x1dd   :  { %1411 = vperm.xlu0 %3028, %v3270_v50  }
 0x1de   :  { %v504_v61 = vpop.permute.xlu1 %503  ;;  %v3956_v29 = vpop.permute.xlu0 %1320  ;;  %v343_v1 = vsel %vm314_vm1, %v5545_v58, %v342_v9 }
 0x1df   :  { %v610_v18 = vmul.f32 %v3574_v56, %v504_v61  ;;  %v660_v61 = vmul.f32 %v3375_v40, %v3732_v3 }
 0x1e0   :  { %3029 = vset.pattern.permute.xlu1 %v5542_v12  ;;  %v889_v12 = vmul.f32 %v3342_v14, %v3854_v4 }
 0x1e1   :  { %1423 = vperm.xlu1 %3029, %v3285_v62   ;;  %1415 = vperm.xlu0 %3028, %v3279_v55   ;;  %v857_v0 = vmul.f32 %v3229_v20, %v610_v18  ;;  %v1169_v23 = vmul.f32 %v3233_v21, %v610_v18  ;;  %v630_v5 = vmul.f32 %v3225_v19, %v610_v18 }
 0x1e2   :  { %v1014_v50 = vpop.permute.xlu1 %1013  ;;  %v3966_v28 = vpop.permute.xlu0 %923  ;;  %v345_v55 = vsel %vm314_vm1, %v342_v9, %v344_v42  ;;  %v3979_v62 = vmul.f32 %v3558_v25, %v3880_v57  ;;  %v661_v18 = vmul.f32 %v3375_v40, %v3801_v13  ;;  %v3995_v9 = vmul.f32 %v3370_v36, %v3794_v31  ;;  %v4225_v25 = vld [vmem:[#allocation7 + $0x18] ss:$0 sm:$0xff] }
 0x1e3   :  { %v955_v2 = vadd.f32 %v3820_v48, %v857_v0  ;;  %v1267_v48 = vadd.f32 %v3837_v24, %v1169_v23  ;;  %v734_v14 = vadd.f32 %v3839_v63, %v630_v5  ;;  %v3991_v57 = vmul.f32 %v3526_v39, %v345_v55 }
 0x1e4   :  { %v4002_v24 = vmul.f32 %v3356_v27, %v343_v1  ;;  %v855_v63 = vmul.f32 %v3229_v20, %v3979_v62  ;;  %v627_v31 = vmul.f32 %v3225_v19, %v3995_v9  ;;  %v1198_v1 = vmul.f32 %v3397_v53, %v3732_v3  ;;  %v5560_v27 = vld [vmem:[#allocation86_spill] sm:$0xff] }
 0x1e5   :  { %v1053_v43 = vadd.f32 %v1014_v50, %v955_v2  ;;  %704 = vrot.lane.b32.xlu1 %v660_v61, %s3154_s1  ;;  %933 = vrot.lane.b32.xlu0 %v889_v12, %s3154_s1  ;;  %v986_v2 = vmul.f32 %v3344_v15, %v3991_v57  ;;  %v1166_v12 = vmul.f32 %v3233_v21, %v3995_v9 }
 0x1e6   :  { %v1327_v32 = vpop.permute.xlu1 %1326  ;;  %v797_v33 = vpop.permute.xlu0 %796  ;;  %v985_v61 = vmul.f32 %v3344_v15, %v4002_v24 }
 0x1e7   :  { %v3997_v0 = vadd.f32 %v1327_v32, %v1267_v48  ;;  %v3999_v50 = vadd.f32 %v797_v33, %v734_v14  ;;  %v731_v48 = vadd.f32 %v3777_v7, %v627_v31  ;;  %v1197_v33 = vmul.f32 %v3397_v53, %v3672_v45 }
 0x1e8   :  { %v1264_v7 = vadd.f32 %v3762_v37, %v1166_v12  ;;  %v1132_v31 = vmul.f32 %v3550_v34, %v1053_v43  ;;  %v854_v34 = vmul.f32 %v3229_v20, %v3995_v9 }
 0x1e9   :  { %706 = vrot.lane.b32.xlu1 %v661_v18, %s3154_s1  ;;  %1427 = vperm.xlu0 %3028, %v3282_v60   ;;  %v953_v60 = vadd.f32 %v3869_v10, %v855_v63  ;;  %v628_v10 = vmul.f32 %v3225_v19, %v3979_v62  ;;  %v835_v18 = vadd.f32 %v3940_v38, %v731_v48  ;;  %v3061_v48 = vld [vmem:[#allocation4 + $0x78] sm:$0xff] }
 0x1ea   :  { %v697_v23 = vpop.permute.xlu1 %696  ;;  %v920_v5 = vpop.permute.xlu0 %919  ;;  %v1362_v43 = vadd.f32 %v3956_v29, %v1264_v7  ;;  %v662_v29 = vmul.f32 %v3375_v40, %v3851_v35 }
 0x1ed   :  { %1029 = vrot.lane.b32.xlu1 %v986_v2, %s3154_s1  ;;  %1027 = vrot.lane.b32.xlu0 %v985_v61, %s3154_s1 }
 0x1ee   :  { %v1010_v55 = vpop.permute.xlu1 %1009  ;;  %v508_v58 = vpop.permute.xlu0 %507 }
 0x1ef   :  { %v1051_v14 = vadd.f32 %v1010_v55, %v953_v60  ;;  %v4023_v32 = vmul.f32 %v3450_v46, %v508_v58 }
 0x1f1   :  { %v1130_v63 = vmul.f32 %v3463_v44, %v1051_v14  ;;  %1240 = vrot.lane.b32.xlu1 %v1198_v1, %s3154_s1  ;;  %1238 = vrot.lane.b32.xlu0 %v1197_v33, %s3154_s1  ;;  %v859_v3 = vmul.f32 %v3229_v20, %v4023_v32  ;;  %v632_v61 = vmul.f32 %v3225_v19, %v4023_v32  ;;  %v362_v1 = vsel %vm314_vm1, %v344_v42, 0.0  ;;  %v3062_v14 = vld [vmem:[#allocation4 + $0x70] sm:$0xff] }
 0x1f2   :  { %v795_v2 = vpop.permute.xlu1 %794  ;;  %v1012_v45 = vpop.permute.xlu0 %1011 }
 0x1f3   :  { %v4039_v60 = vadd.f32 %v1130_v63, %v835_v18  ;;  %v837_v38 = vadd.f32 %v795_v2, %v3944_v17  ;;  %v1052_v55 = vadd.f32 %v1012_v45, %v3946_v26  ;;  %v4043_v58 = vadd.f32 %v920_v5, %v859_v3 }
 0x1f4   :  { %v4048_v37 = vadd.f32 %v697_v23, %v632_v61  ;;  %v732_v17 = vadd.f32 %v3878_v16, %v628_v10  ;;  %v663_v5 = vmul.f32 %v3375_v40, %v3854_v4  ;;  %v458_v18 = vmul.f32 %v3360_v30, %v362_v1 }
 0x1f5   :  { %v4051_v12 = vadd.f32 %v1132_v31, %v837_v38  ;;  %1435 = vperm.xlu1 %3029, %v3061_v48   ;;  %1431 = vperm.xlu0 %3028, %v3062_v14   ;;  %v1131_v42 = vmul.f32 %v3530_v6, %v1052_v55  ;;  %v1442_v63 = vmul.f32 %v3594_v52, %v1362_v43 }
 0x1f6   :  { %v4054_v33 = vpop.permute.xlu1 %1322  ;;  %v793_v26 = vpop.permute.xlu0 %792  ;;  %v1199_v31 = vmul.f32 %v3397_v53, %v3801_v13  ;;  %v987_v40 = vmul.f32 %v3344_v15, %v458_v18  ;;  %v764_v38 = vmul.f32 %v3350_v22, %v3846_v54  ;;  %v1295_v43 = vmul.f32 %v3474_v11, %v3786_v59 }
 0x1f7   :  { %v836_v23 = vadd.f32 %v793_v26, %v732_v17  ;;  %v765_v48 = vmul.f32 %v3350_v22, %v4002_v24  ;;  %v1296_v59 = vmul.f32 %v3474_v11, %v3846_v54  ;;  %v1298_v54 = vmul.f32 %v3474_v11, %v3991_v57 }
 0x1f9   :  { %v1147_v3 = vadd.f32 %v1131_v42, %v836_v23  ;;  %710 = vrot.lane.b32.xlu1 %v663_v5, %s3154_s1  ;;  %708 = vrot.lane.b32.xlu0 %v662_v29, %s3154_s1  ;;  %v1297_v23 = vmul.f32 %v3474_v11, %v4002_v24  ;;  %v767_v29 = vmul.f32 %v3350_v22, %v458_v18  ;;  %v5547_v18 = vld [vmem:[#allocation53_spill] sm:$0xff] }
 0x1fa   :  { %v926_v16 = vpop.permute.xlu1 %925  ;;  %v1325_v10 = vpop.permute.xlu0 %1324 }
 0x1fb   :  { %v4065_v7 = vadd.f32 %v1442_v63, %v1147_v3  ;;  %v4068_v4 = vadd.f32 %v1325_v10, %v3948_v41  ;;  %v1200_v41 = vmul.f32 %v3397_v53, %v3851_v35 }
 0x1fd   :  { %1242 = vrot.lane.b32.xlu1 %v1199_v31, %s3154_s1  ;;  %1031 = vrot.lane.b32.xlu0 %v987_v40, %s3154_s1  ;;  %v5546_v31 = vld [vmem:[#allocation43_spill] sm:$0xff] }
 0x1fe   :  { %v922_v2 = vpop.permute.xlu1 %921  ;;  %v514_v45 = vpop.permute.xlu0 %513 }
 0x1ff   :  { %v4076_v61 = vmul.f32 %v3605_v49, %v514_v45 }
 0x201   :  { %808 = vrot.lane.b32.xlu1 %v764_v38, %s3154_s1  ;;  %1244 = vrot.lane.b32.xlu0 %v1200_v41, %s3154_s1  ;;  %v862_v13 = vmul.f32 %v3229_v20, %v4076_v61  ;;  %v5548_v38 = vld [vmem:[#allocation58_spill] sm:$0xff] }
 0x202   :  { %v4086_v15 = vpop.permute.xlu1 %698  ;;  %v1016_v55 = vpop.permute.xlu0 %1015  ;;  %v1445_v41 = vmul.f32 %v5548_v38, %v3997_v0  ;;  %v5567_v38 = vld [vmem:[#allocation80_spill] sm:$0xff] }
 0x203   :  { %v1054_v1 = vadd.f32 %v1016_v55, %v3951_v47  ;;  %v4093_v14 = vadd.f32 %v926_v16, %v862_v13  ;;  %v766_v47 = vmul.f32 %v3350_v22, %v3991_v57 }
 0x205   :  { %v1133_v53 = vmul.f32 %v3665_v8, %v1054_v1  ;;  %1336 = vrot.lane.b32.xlu1 %v1295_v43, %s3154_s1  ;;  %810 = vrot.lane.b32.xlu0 %v765_v48, %s3154_s1  ;;  %v5549_v48 = vld [vmem:[#allocation100_spill] sm:$0xff]  ;;  %v5559_v8 = vld [vmem:[#allocation77_spill] sm:$0xff] }
 0x206   :  { %v512_v35 = vpop.permute.xlu1 %511  ;;  %v510_v17 = vpop.permute.xlu0 %509 }
 0x207   :  { %v4099_v26 = vadd.f32 %v1133_v53, %v3999_v50  ;;  %v4119_v24 = vmul.f32 %v5546_v31, %v510_v17  ;;  %v1170_v53 = vmul.f32 %v3233_v21, %v5549_v48  ;;  %v5555_v48 = vld [vmem:[#allocation54_spill] sm:$0xff] }
 0x208   :  { %v5566_v31 = vld [vmem:[#allocation70_spill] sm:$0xff] }
 0x209   :  { %812 = vrot.lane.b32.xlu1 %v766_v47, %s3154_s1  ;;  %1338 = vrot.lane.b32.xlu0 %v1296_v59, %s3154_s1  ;;  %v860_v57 = vmul.f32 %v3229_v20, %v4119_v24  ;;  %v5550_v47 = vld [vmem:[#allocation63_spill] sm:$0xff] }
 0x20a   :  { %v799_v5 = vpop.permute.xlu1 %798  ;;  %v928_v42 = vpop.permute.xlu0 %927 }
 0x20b   :  { %v839_v22 = vadd.f32 %v799_v5, %v3953_v51 }
 0x20d   :  { %1340 = vrot.lane.b32.xlu1 %v1297_v23, %s3154_s1  ;;  %814 = vrot.lane.b32.xlu0 %v767_v29, %s3154_s1  ;;  %v5551_v29 = vld [vmem:[#allocation97_spill] sm:$0xff] }
 0x20e   :  { %v1022_v50 = vpop.permute.xlu1 %1021  ;;  %v4112_v63 = vpop.permute.xlu0 %700 }
 0x211   :  { %1342 = vrot.lane.b32.xlu0 %v1298_v54, %s3154_s1  ;;  %v1268_v54 = vadd.f32 %v5551_v29, %v1170_v53 }
 0x212   :  { %v1018_v3 = vpop.permute.xlu1 %1017  ;;  %v1020_v16 = vpop.permute.xlu0 %1019 }
 0x213   :  { %v1055_v10 = vadd.f32 %v1018_v3, %v4043_v58  ;;  %v958_v58 = vadd.f32 %v922_v2, %v860_v57  ;;  %v5552_v3 = vld [vmem:[#allocation51_spill] sm:$0xff] }
 0x215   :  { %v1134_v40 = vmul.f32 %v5547_v18, %v1055_v10  ;;  %v1056_v51 = vadd.f32 %v1020_v16, %v958_v58  ;;  %v5554_v16 = vld [vmem:[#allocation71_spill] sm:$0xff] }
 0x216   :  { %v4123_v45 = vpop.permute.xlu0 %1023  ;;  %v516_v1 = vpop.permute.xlu1 %515 }
 0x217   :  { %v1150_v13 = vadd.f32 %v1134_v40, %v839_v22  ;;  %v1135_v59 = vmul.f32 %v5550_v47, %v1056_v51  ;;  %v4143_v10 = vmul.f32 %v5552_v3, %v516_v1  ;;  %v635_v51 = vmul.f32 %v3225_v19, %v4076_v61 }
 0x218   :  { %v4157_v1 = vmul.f32 %v5555_v48, %v512_v35  ;;  %v539_v35 = vsel %vm459_vm0, 0.0, %v5559_v8  ;;  %v5563_v8 = vld [vmem:[#allocation74_spill] sm:$0xff]  ;;  %v5565_v48 = vld [vmem:[#allocation83_spill] sm:$0xff] }
 0x219   :  { %v4127_v11 = vadd.f32 %v1445_v41, %v1150_v13  ;;  %v863_v57 = vmul.f32 %v3229_v20, %v4143_v10 }
 0x21a   :  { %v4131_v55 = vpop.permute.xlu0 %1234  ;;  %v4138_v0 = vpop.permute.xlu1 %1232 }
 0x21e   :  { %v4133_v43 = vpop.permute.xlu0 %517 }
 0x222   :  { %v801_v17 = vpop.permute.xlu0 %800 }
 0x223   :  { %v840_v5 = vadd.f32 %v801_v17, %v4048_v37  ;;  %v961_v17 = vadd.f32 %v928_v42, %v863_v57 }
 0x225   :  { %v1151_v23 = vadd.f32 %v1135_v59, %v840_v5 }
 0x226   :  { %v1329_v2 = vpop.permute.xlu0 %1328 }
 0x227   :  { %v1366_v22 = vadd.f32 %v1329_v2, %v1268_v54  ;;  %v4145_v40 = vpop.permute.xlu1 %1419  ;;  %v5556_v54 = vld [vmem:[#allocation84_spill] sm:$0xff]  ;;  %v5557_v2 = vld [vmem:[#allocation23_spill] sm:$0xff] }
 0x228   :  { %5553 = vst [vmem:[#allocation100_spill] sm:$0xff] %v4145_v40 }
 0x229   :  { %v1446_v41 = vmul.f32 %v5554_v16, %v1366_v22  ;;  %v606_v22 = vmul.f32 %v5557_v2, %v5556_v54  ;;  %v861_v16 = vmul.f32 %v3229_v20, %v4157_v1 }
 0x22a   :  { %v4148_v13 = vpop.permute.xlu0 %521 }
 0x22b   :  { %v4152_v58 = vadd.f32 %v1446_v41, %v1151_v23  ;;  %v703_v37 = vpop.permute.xlu1 %702  ;;  %v5558_v41 = vld [vmem:[#allocation72_spill] sm:$0xff] }
 0x22c   :  { %v739_v53 = vadd.f32 %v703_v37, %v635_v51  ;;  %v5561_v37 = vld [vmem:[#allocation48_spill] sm:$0xff]  ;;  %v853_v51 = vmul.f32 %v3229_v20, %v606_v22 }
 0x22d   :  { %v605_v42 = vmul.f32 %v5561_v37, %v5560_v27 }
 0x22e   :  { %v807_v59 = vpop.permute.xlu0 %806  ;;  %v951_v30 = vadd.f32 %v5563_v8, %v853_v51  ;;  %v1165_v51 = vmul.f32 %v3233_v21, %v606_v22  ;;  %v5569_v8 = vld [vmem:[#allocation81_spill] sm:$0xff] }
 0x22f   :  { %v1026_v5 = vpop.permute.xlu1 %1025  ;;  %v843_v23 = vadd.f32 %v807_v59, %v739_v53  ;;  %v5562_v53 = vld [vmem:[#allocation28_spill] sm:$0xff]  ;;  %v625_v54 = vmul.f32 %v3225_v19, %v605_v42 }
 0x230   :  { %v1059_v29 = vadd.f32 %v1026_v5, %v961_v17  ;;  %v959_v17 = vadd.f32 %v3966_v28, %v861_v16  ;;  %v633_v5 = vmul.f32 %v3225_v19, %v4119_v24  ;;  %v604_v59 = vmul.f32 %v5562_v53, %v539_v35  ;;  %v5564_v16 = vld [vmem:[#allocation90_spill] sm:$0xff] }
 0x231   :  { %v1049_v3 = vadd.f32 %v5564_v16, %v951_v30  ;;  %v729_v35 = vadd.f32 %v5565_v48, %v625_v54  ;;  %v5571_v48 = vld [vmem:[#allocation62_spill] sm:$0xff]  ;;  %v5572_v54 = vld [vmem:[#allocation95_spill] sm:$0xff] }
 0x232   :  { %v1138_v47 = vmul.f32 %v5558_v41, %v1059_v29  ;;  %v1057_v41 = vadd.f32 %v1022_v50, %v959_v17  ;;  %v737_v27 = vadd.f32 %v4086_v15, %v633_v5  ;;  %v4184_v39 = vpop.permute.xlu0 %1334  ;;  %v5568_v17 = vld [vmem:[#allocation96_spill] sm:$0xff] }
 0x233   :  { %v4164_v18 = vpop.permute.xlu1 %1236  ;;  %v833_v15 = vadd.f32 %v5568_v17, %v729_v35  ;;  %v626_v17 = vmul.f32 %v3225_v19, %v606_v22 }
 0x234   :  { %v4170_v57 = vadd.f32 %v1138_v47, %v843_v23  ;;  %v1163_v47 = vmul.f32 %v3233_v21, %v604_v59  ;;  %v852_v23 = vmul.f32 %v3229_v20, %v605_v42  ;;  %v1136_v49 = vmul.f32 %v5566_v31, %v1057_v41  ;;  %v5577_v31 = vld [vmem:[#allocation91_spill] sm:$0xff] }
 0x235   :  { %v1128_v41 = vmul.f32 %v5571_v48, %v1049_v3  ;;  %v5575_v3 = vld [vmem:[#allocation79_spill] sm:$0xff] }
 0x236   :  { %v1261_v50 = vadd.f32 %v5567_v38, %v1163_v47  ;;  %v950_v52 = vadd.f32 %v5569_v8, %v852_v23  ;;  %v634_v38 = vmul.f32 %v3225_v19, %v4157_v1  ;;  %v5573_v47 = vld [vmem:[#allocation94_spill] sm:$0xff]  ;;  %v952_v8 = vadd.f32 %v5575_v3, %v854_v34  ;;  %v5578_v48 = vld [vmem:[#allocation39_spill] sm:$0xff] }
 0x237   :  { %v4177_v29 = vpop.permute.xlu1 %519  ;;  %v1144_v16 = vadd.f32 %v1128_v41, %v833_v15  ;;  %v5582_v41 = vld [vmem:[#allocation99_spill] sm:$0xff] }
 0x238   :  { %v1048_v23 = vadd.f32 %v5573_v47, %v950_v52  ;;  %v738_v35 = vadd.f32 %v4112_v63, %v634_v38  ;;  %v5580_v52 = vld [vmem:[#allocation78_spill] sm:$0xff]  ;;  %v1164_v63 = vmul.f32 %v3233_v21, %v605_v42  ;;  %v1050_v22 = vadd.f32 %v5582_v41, %v952_v8  ;;  %v5586_v42 = vld [vmem:[#allocation85_spill] sm:$0xff]  ;;  %v5587_v8 = vld [vmem:[#allocation64_spill] sm:$0xff] }
 0x23b   :  { %v803_v28 = vpop.permute.xlu1 %802 }
 0x23c   :  { %v841_v46 = vadd.f32 %v803_v28, %v737_v27  ;;  %v1359_v27 = vadd.f32 %v5572_v54, %v1261_v50  ;;  %v5574_v28 = vld [vmem:[#allocation76_spill] sm:$0xff] }
 0x23d   :  { %v1263_v9 = vadd.f32 %v5574_v28, %v1165_v51  ;;  %v5581_v51 = vld [vmem:[#allocation31_spill] sm:$0xff]  ;;  %v5583_v28 = vld [vmem:[#allocation93_spill] sm:$0xff] }
 0x23e   :  { %v4192_v5 = vadd.f32 %v1136_v49, %v841_v46  ;;  %v1058_v46 = vadd.f32 %v4123_v45, %v4093_v14  ;;  %v624_v49 = vmul.f32 %v3225_v19, %v604_v59  ;;  %v1439_v14 = vmul.f32 %v5578_v48, %v1359_v27  ;;  %v5579_v45 = vld [vmem:[#allocation69_spill] sm:$0xff]  ;;  %v5584_v27 = vld [vmem:[#allocation75_spill] sm:$0xff] }
 0x23f   :  { %v4197_v6 = vpop.permute.xlu1 %1330  ;;  %v4199_v30 = vpop.permute.xlu0 %1116  ;;  %v1361_v44 = vadd.f32 %v5577_v31, %v1263_v9  ;;  %v1127_v15 = vmul.f32 %v5581_v51, %v1048_v23  ;;  %v5585_v9 = vld [vmem:[#allocation41_spill] sm:$0xff] }
 0x240   :  { %5570 = vst [vmem:[#allocation97_spill] sm:$0xff] %v4199_v30  ;;  %v1137_v59 = vmul.f32 %v5579_v45, %v1058_v46  ;;  %v728_v47 = vadd.f32 %v5580_v52, %v624_v49  ;;  %v1455_v38 = vadd.f32 %v1439_v14, %v1144_v16  ;;  %v730_v46 = vadd.f32 %v5584_v27, %v626_v17  ;;  %v5589_v17 = vld [vmem:[#allocation98_spill] sm:$0xff] }
 0x241   :  { %v1167_v49 = vmul.f32 %v3233_v21, %v3979_v62  ;;  %v1129_v16 = vmul.f32 %v5587_v8, %v1050_v22  ;;  %v5591_v62 = vld [vmem:[#allocation92_spill] sm:$0xff] }
 0x242   :  { %v832_v3 = vadd.f32 %v5583_v28, %v728_v47  ;;  %v1475_v52 = vadd.f32 %v4225_v25, %v1455_v38  ;;  %v5588_v47 = vld [vmem:[#allocation89_spill] sm:$0xff] }
 0x243   :  { %v805_v50 = vpop.permute.xlu1 %804  ;;  %v4213_v54 = vpop.permute.xlu0 %1120  ;;  %v834_v41 = vadd.f32 %v5588_v47, %v730_v46  ;;  %v1265_v45 = vadd.f32 %v5591_v62, %v1167_v49 }
 0x244   :  { %5576 = vst [vmem:[#allocation84_spill] sm:$0xff] %v4213_v54  ;;  %v842_v56 = vadd.f32 %v805_v50, %v738_v35  ;;  %v1441_v35 = vmul.f32 %v5585_v9, %v1361_v44  ;;  %v1262_v50 = vadd.f32 %v5586_v42, %v1164_v63  ;;  %v1491_v46 = vmax.f32 %v1475_v52, 0.0 }
 0x245   :  { %v1145_v22 = vadd.f32 %v1129_v16, %v834_v41 }
 0x246   :  { %v4222_v34 = vadd.f32 %v1137_v59, %v842_v56  ;;  %v1143_v56 = vadd.f32 %v1127_v15, %v832_v3  ;;  %v1457_v59 = vadd.f32 %v1441_v35, %v4039_v60  ;;  %v1360_v28 = vadd.f32 %v5589_v17, %v1262_v50 }
 0x247   :  { %v4227_v31 = vpop.permute.xlu1 %1332  ;;  %v1173_v15 = vmul.f32 %v3233_v21, %v4157_v1  ;;  %v1363_v35 = vadd.f32 %v4054_v33, %v1265_v45  ;;  %v1171_v33 = vmul.f32 %v3233_v21, %v4023_v32 }
 0x248   :  { %v1376_v23 = vpop.permute.xlu0 %1375  ;;  %v1477_v3 = vadd.f32 %v4225_v25, %v1457_v59  ;;  %v1478_v59 = vadd.f32 %v4225_v25, %v4065_v7 }
 0x249   :  { %v4235_v14 = vmul.f32 0.0, %v1376_v23  ;;  %v1271_v23 = vadd.f32 %v4164_v18, %v1173_v15 }
 0x24a   :  { %v1493_v45 = vmax.f32 %v1477_v3, 0.0 }
 0x24b   :  { %v1454_v44 = vadd.f32 %v4235_v14, %v1143_v56  ;;  %v4242_v27 = vpop.permute.xlu1 %1112  ;;  %v1369_v18 = vadd.f32 %v4184_v39, %v1271_v23  ;;  %v1481_v39 = vadd.f32 %v4225_v25, %v4127_v11 }
 0x24c   :  { %5590 = vst [vmem:[#allocation23_spill] sm:$0xff] %v4242_v27  ;;  %v4245_v63 = vpop.permute.xlu0 %1383 }
 0x24d   :  { %v1440_v60 = vmul.f32 %v4245_v63, %v1360_v28  ;;  %v1474_v38 = vadd.f32 %v4225_v25, %v1454_v44  ;;  %v1269_v44 = vadd.f32 %v4138_v0, %v1171_v33  ;;  %v1449_v15 = vmul.f32 %v4145_v40, %v1369_v18 }
 0x24e   :  { %v1497_v23 = vmax.f32 %v1481_v39, 0.0 }
 0x24f   :  { %v1456_v42 = vadd.f32 %v1440_v60, %v1145_v22  ;;  %v4254_v50 = vpop.permute.xlu1 %929  ;;  %v1490_v49 = vmax.f32 %v1474_v38, 0.0  ;;  %v1494_v22 = vmax.f32 %v1478_v59, 0.0  ;;  %v1367_v60 = vadd.f32 %v4197_v6, %v1269_v44 }
 0x250   :  { %v4256_v56 = vpop.permute.xlu0 %1395  ;;  %v1482_v6 = vadd.f32 %v4225_v25, %v4152_v58 }
 0x251   :  { %v1476_v1 = vadd.f32 %v4225_v25, %v1456_v42  ;;  %v1443_v16 = vmul.f32 %v4256_v56, %v1363_v35  ;;  %v1509_v47 = vpack.c.bf16 %v1491_v46, %v1490_v49  ;;  %v1465_v42 = vadd.f32 %v1449_v15, %v4170_v57 }
 0x253   :  { %v1492_v52 = vmax.f32 %v1476_v1, 0.0  ;;  %v1459_v41 = vadd.f32 %v1443_v16, %v4051_v12  ;;  %v4266_v17 = vpop.permute.xlu1 %931  ;;  %2936 = vmatprep.mubr.msk.bf16.mxu1 %vm1523_vm2, %v1509_v47  ;;  %v1172_v12 = vmul.f32 %v3233_v21, %v4119_v24  ;;  %v1485_v58 = vadd.f32 %v4225_v25, %v1465_v42 }
 0x254   :  { %v4269_v28 = vpop.permute.xlu0 %1399 }
 0x255   :  { %5592 = vst [vmem:[#allocation77_spill] sm:$0xff] %v4269_v28  ;;  %v1479_v62 = vadd.f32 %v4225_v25, %v1459_v41  ;;  %v1444_v7 = vmul.f32 %v4269_v28, %v4068_v4  ;;  %v1510_v32 = vpack.c.bf16 %v1493_v45, %v1492_v52  ;;  %v1270_v46 = vadd.f32 %v4131_v55, %v1172_v12 }
 0x256   :  { %v1498_v45 = vmax.f32 %v1482_v6, 0.0  ;;  %v1501_v44 = vmax.f32 %v1485_v58, 0.0 }
 0x257   :  { %v1495_v38 = vmax.f32 %v1479_v62, 0.0  ;;  %v1460_v0 = vadd.f32 %v1444_v7, %v4099_v26  ;;  %v4282_v3 = vpop.permute.xlu1 %1124  ;;  %2937 = vmatmul.mubr.msk.bf16.vlgmr.msra.gmra.mxu1 %vm1523_vm2, %v1510_v32  ;;  %v1368_v26 = vadd.f32 %v4227_v31, %v1270_v46 }
 0x258   :  { %v4285_v4 = vpop.permute.xlu0 %1411 }
 0x259   :  { %5593 = vst [vmem:[#allocation86_spill] sm:$0xff] %v4285_v4  ;;  %v1480_v11 = vadd.f32 %v4225_v25, %v1460_v0  ;;  %v1447_v35 = vmul.f32 %v4285_v4, %v1367_v60  ;;  %v1511_v24 = vpack.c.bf16 %v1495_v38, %v1494_v22  ;;  %v5599_v0 = vld [vmem:[#allocation61_spill] sm:$0xff] }
 0x25a   :  { %v618_v46 = vmul.f32 %v5599_v0, %v4177_v29  ;;  %v636_v29 = vmul.f32 %v3225_v19, %v4143_v10 }
 0x25b   :  { %v1496_v49 = vmax.f32 %v1480_v11, 0.0  ;;  %v1463_v1 = vadd.f32 %v1447_v35, %v4192_v5  ;;  %2940 = vmatprep.mubr.msk.bf16.mxu1 %vm1523_vm2, %v1511_v24  ;;  %v5600_v24 = vld [vmem:[#allocation60_spill] sm:$0xff] }
 0x25c   :  { %v4296_v16 = vpop.permute.xlu1 %1423  ;;  %v4298_v55 = vpop.permute.xlu0 %1415  ;;  %v865_v6 = vmul.f32 %v3229_v20, %v618_v46 }
 0x25d   :  { %5594 = vst [vmem:[#allocation48_spill] sm:$0xff] %v4296_v16  ;;  %5595 = vst [vmem:[#allocation28_spill] sm:$0xff] %v4298_v55  ;;  %v1483_v47 = vadd.f32 %v4225_v25, %v1463_v1  ;;  %v1448_v59 = vmul.f32 %v4298_v55, %v1368_v26  ;;  %v1512_v33 = vpack.c.bf16 %v1497_v23, %v1496_v49  ;;  %v5601_v49 = vld [vmem:[#allocation65_spill] sm:$0xff] }
 0x25e   :  { %v617_v23 = vmul.f32 %v5600_v24, %v4133_v43  ;;  %v619_v1 = vmul.f32 %v5601_v49, %v4148_v13  ;;  %v1174_v43 = vmul.f32 %v3233_v21, %v4076_v61 }
 0x25f   :  { %v1499_v57 = vmax.f32 %v1483_v47, 0.0  ;;  %v1464_v31 = vadd.f32 %v1448_v59, %v4222_v34  ;;  %2941 = vmatmul.mubr.msk.bf16.gmra.mxu1 %vm1523_vm2, %v1512_v33  ;;  %v963_v59 = vadd.f32 %v4266_v17, %v865_v6  ;;  %v638_v6 = vmul.f32 %v3225_v19, %v618_v46 }
 0x260   :  { %v705_v5 = vpop.permute.xlu1 %704  ;;  %v934_v18 = vpop.permute.xlu0 %933  ;;  %v864_v47 = vmul.f32 %v3229_v20, %v617_v23  ;;  %v637_v13 = vmul.f32 %v3225_v19, %v617_v23 }
 0x261   :  { %v1484_v52 = vadd.f32 %v4225_v25, %v1464_v31  ;;  %v1513_v41 = vpack.c.bf16 %v1499_v57, %v1498_v45  ;;  %v740_v31 = vadd.f32 %v705_v5, %v636_v29 }
 0x262   :  { %v962_v33 = vadd.f32 %v4254_v50, %v864_v47 }
 0x263   :  { %v1500_v62 = vmax.f32 %v1484_v52, 0.0  ;;  %2944 = vmatprep.mubr.msk.bf16.mxu1 %vm1523_vm2, %v1513_v41  ;;  %v866_v52 = vmul.f32 %v3229_v20, %v619_v1 }
 0x264   :  { %v707_v7 = vpop.permute.xlu1 %706  ;;  %v4307_v32 = vpop.permute.xlu0 %1427 }
 0x265   :  { %5596 = vst [vmem:[#allocation74_spill] sm:$0xff] %v4307_v32  ;;  %v1514_v22 = vpack.c.bf16 %v1501_v44, %v1500_v62  ;;  %v964_v44 = vadd.f32 %v934_v18, %v866_v52  ;;  %v741_v62 = vadd.f32 %v707_v7, %v637_v13  ;;  %v639_v13 = vmul.f32 %v3225_v19, %v619_v1 }
 0x266   :  { %v4345_v19 = vmul.f32 0.0, %v4282_v3 }
 0x267   :  { %2945 = vmatmul.mubr.msk.bf16.gmra.mxu1 %vm1523_vm2, %v1514_v22 }
 0x268   :  { %v1030_v39 = vpop.permute.xlu1 %1029  ;;  %v1028_v12 = vpop.permute.xlu0 %1027  ;;  %5602 = vst [vmem:[#allocation80_spill] sm:$0xff] %v4345_v19 }
 0x269   :  { %v1061_v45 = vadd.f32 %v1030_v39, %v963_v59  ;;  %v1060_v41 = vadd.f32 %v1028_v12, %v962_v33  ;;  %v1175_v39 = vmul.f32 %v3233_v21, %v4143_v10  ;;  %v1176_v33 = vmul.f32 %v3233_v21, %v617_v23 }
 0x26b   :  { %v1140_v50 = vmul.f32 %v4199_v30, %v1061_v45  ;;  %v1139_v5 = vmul.f32 %v4242_v27, %v1060_v41 }
 0x26c   :  { %v1241_v34 = vpop.permute.xlu1 %1240  ;;  %v1239_v15 = vpop.permute.xlu0 %1238 }
 0x26d   :  { %v1272_v17 = vadd.f32 %v1239_v15, %v1174_v43  ;;  %v1273_v40 = vadd.f32 %v1241_v34, %v1175_v39 }
 0x270   :  { %v4310_v60 = vpop.permute.xlu1 %1435  ;;  %v4312_v38 = vpop.permute.xlu0 %1431 }
 0x271   :  { %5597 = vst [vmem:[#allocation90_spill] sm:$0xff] %v4310_v60  ;;  %5598 = vst [vmem:[#allocation83_spill] sm:$0xff] %v4312_v38 }
 0x274   :  { %v711_v11 = vpop.permute.xlu1 %710  ;;  %v709_v35 = vpop.permute.xlu0 %708 }
 0x275   :  { %v742_v12 = vadd.f32 %v709_v35, %v638_v6  ;;  %v1177_v35 = vmul.f32 %v3233_v21, %v618_v46 }
 0x278   :  { %v1243_v42 = vpop.permute.xlu1 %1242  ;;  %v1032_v26 = vpop.permute.xlu0 %1031 }
 0x279   :  { %v1062_v59 = vadd.f32 %v1032_v26, %v964_v44  ;;  %v1274_v26 = vadd.f32 %v1243_v42, %v1176_v33  ;;  %v4353_v33 = vld [vmem:[#allocation7 + $0x20] ss:$0 sm:$0xff] }
 0x27b   :  { %v1141_v10 = vmul.f32 %v4213_v54, %v1062_v59 }
 0x27c   :  { %v809_v58 = vpop.permute.xlu1 %808  ;;  %v1245_v57 = vpop.permute.xlu0 %1244 }
 0x27d   :  { %v844_v22 = vadd.f32 %v809_v58, %v740_v31  ;;  %v1275_v39 = vadd.f32 %v1245_v57, %v1177_v35 }
 0x27f   :  { %v1155_v18 = vadd.f32 %v1139_v5, %v844_v22 }
 0x280   :  { %v1337_v61 = vpop.permute.xlu1 %1336  ;;  %v811_v47 = vpop.permute.xlu0 %810 }
 0x281   :  { %v1370_v20 = vadd.f32 %v1337_v61, %v1272_v17  ;;  %v845_v29 = vadd.f32 %v811_v47, %v741_v62  ;;  %v743_v17 = vadd.f32 %v711_v11, %v639_v13 }
 0x283   :  { %v1450_v7 = vmul.f32 %v4296_v16, %v1370_v20  ;;  %v1156_v15 = vadd.f32 %v1140_v50, %v845_v29 }
 0x284   :  { %v813_v45 = vpop.permute.xlu1 %812  ;;  %v1339_v43 = vpop.permute.xlu0 %1338 }
 0x285   :  { %v1466_v58 = vadd.f32 %v1450_v7, %v1155_v18  ;;  %v846_v31 = vadd.f32 %v813_v45, %v742_v12  ;;  %v1371_v52 = vadd.f32 %v1339_v43, %v1273_v40 }
 0x287   :  { %v1157_v41 = vadd.f32 %v1141_v10, %v846_v31  ;;  %v1451_v34 = vmul.f32 %v4307_v32, %v1371_v52  ;;  %v1486_v23 = vadd.f32 %v4225_v25, %v1466_v58 }
 0x288   :  { %v1341_v44 = vpop.permute.xlu1 %1340  ;;  %v815_v62 = vpop.permute.xlu0 %814 }
 0x289   :  { %v1467_v22 = vadd.f32 %v1451_v34, %v1156_v15  ;;  %v1372_v50 = vadd.f32 %v1341_v44, %v1274_v26  ;;  %v847_v61 = vadd.f32 %v815_v62, %v743_v17  ;;  %v1502_v1 = vmax.f32 %v1486_v23, 0.0 }
 0x28b   :  { %v1487_v6 = vadd.f32 %v4225_v25, %v1467_v22  ;;  %v1452_v40 = vmul.f32 %v4312_v38, %v1372_v50  ;;  %v1158_v11 = vadd.f32 %v4345_v19, %v847_v61 }
 0x28c   :  { %v1343_v42 = vpop.permute.xlu0 %1342 }
 0x28d   :  { %v1503_v47 = vmax.f32 %v1487_v6, 0.0  ;;  %v1468_v21 = vadd.f32 %v1452_v40, %v1157_v41  ;;  %v1373_v46 = vadd.f32 %v1343_v42, %v1275_v39 }
 0x28f   :  { %v1453_v5 = vmul.f32 %v4310_v60, %v1373_v46  ;;  %v1515_v59 = vpack.c.bf16 %v1503_v47, %v1502_v1  ;;  %v1488_v57 = vadd.f32 %v4225_v25, %v1468_v21 }
 0x291   :  { %v1469_v20 = vadd.f32 %v1453_v5, %v1158_v11  ;;  %2948 = vmatprep.mubr.msk.bf16.mxu1 %vm1523_vm2, %v1515_v59  ;;  %v1504_v12 = vmax.f32 %v1488_v57, 0.0 }
 0x293   :  { %v1489_v29 = vadd.f32 %v4225_v25, %v1469_v20 }
 0x295   :  { %v1505_v3 = vmax.f32 %v1489_v29, 0.0 }
 0x297   :  { %v1516_v18 = vpack.c.bf16 %v1505_v3, %v1504_v12 }
 0x299   :  { %2949 = vmatmul.mubr.msk.bf16.gmra.mxu1 %vm1523_vm2, %v1516_v18  ;;  %v1665_v18 = vld [vmem:[#allocation7 + $0x28] sm:$0xf] }
 0x317   :  { %v2938_v7 = vpop.f32.mrf.mxu1 }
 0x318   :  { %v4359_v58 = vadd.f32 %v2938_v7, %v4353_v33 }
 0x319   :  { %v1582_v15 = vpop.f32.mrf.mxu1 }
 0x31a   :  { %v4356_v43 = vadd.f32 %v4353_v33, %v1582_v15  ;;  %v1671_v35 = vsel %vm1667_vm3, %v4359_v58, 0.0 }
 0x31b   :  { %v2939_v45 = vpop.f32.mrf.mxu1 }
 0x31c   :  { %v1668_v52 = vsel %vm1667_vm3, %v4356_v43, 0.0  ;;  %v4367_v13 = vadd.f32 %v2939_v45, %v4353_v33 }
 0x31d   :  { %v1585_v10 = vpop.f32.mrf.mxu1 }
 0x31e   :  { %v4362_v31 = vadd.f32 %v4353_v33, %v1585_v10  ;;  %v1673_v23 = vsel %vm1667_vm3, %v4367_v13, 0.0 }
 0x31f   :  { %v2942_v25 = vpop.f32.mrf.mxu1 }
 0x320   :  { %v1669_v26 = vsel %vm1667_vm3, %v4362_v31, 0.0  ;;  %v4379_v39 = vadd.f32 %v2942_v25, %v4353_v33 }
 0x321   :  { %v1670_v41 = vadd.f32 %v1669_v26, %v1668_v52  ;;  %v1598_v34 = vpop.f32.mrf.mxu1 }
 0x322   :  { %v4374_v44 = vadd.f32 %v4353_v33, %v1598_v34  ;;  %v1679_v21 = vsel %vm1667_vm3, %v4379_v39, 0.0 }
 0x323   :  { %v1672_v62 = vadd.f32 %v1671_v35, %v1670_v41  ;;  %v2943_v17 = vpop.f32.mrf.mxu1 }
 0x324   :  { %v1675_v6 = vsel %vm1667_vm3, %v4374_v44, 0.0  ;;  %v4387_v42 = vadd.f32 %v2943_v17, %v4353_v33 }
 0x325   :  { %v1674_v22 = vadd.f32 %v1673_v23, %v1672_v62  ;;  %v1601_v50 = vpop.f32.mrf.mxu1 }
 0x326   :  { %v4384_v40 = vadd.f32 %v4353_v33, %v1601_v50  ;;  %v1681_v11 = vsel %vm1667_vm3, %v4387_v42, 0.0 }
 0x327   :  { %v1676_v61 = vadd.f32 %v1675_v6, %v1674_v22  ;;  %v2946_v10 = vpop.f32.mrf.mxu1 }
 0x328   :  { %v1677_v1 = vsel %vm1667_vm3, %v4384_v40, 0.0  ;;  %v4405_v62 = vadd.f32 %v2946_v10, %v4353_v33 }
 0x329   :  { %v1678_v47 = vadd.f32 %v1677_v1, %v1676_v61  ;;  %v1614_v25 = vpop.f32.mrf.mxu1 }
 0x32a   :  { %v4400_v34 = vadd.f32 %v4353_v33, %v1614_v25  ;;  %v1722_v50 = vsel %vm1667_vm3, %v4405_v62, 0.0 }
 0x32b   :  { %v1680_v46 = vadd.f32 %v1679_v21, %v1678_v47  ;;  %v2947_v52 = vpop.f32.mrf.mxu1 }
 0x32c   :  { %v1719_v17 = vsel %vm1667_vm3, %v4400_v34, 0.0  ;;  %v4412_v6 = vadd.f32 %v2947_v52, %v4353_v33 }
 0x32d   :  { %v1682_v5 = vadd.f32 %v1681_v11, %v1680_v46  ;;  %v1617_v26 = vpop.f32.mrf.mxu1 }
 0x32e   :  { %v4397_v41 = vadd.f32 %v4353_v33, %v1617_v26  ;;  %v1724_v46 = vsel %vm1667_vm3, %v4412_v6, 0.0 }
 0x32f   :  { %v1683_v59 = vrot.slane %v1682_v5, 4 }
 0x330   :  { %v1720_v35 = vsel %vm1667_vm3, %v4397_v41, 0.0 }
 0x331   :  { %v1684_v57 = vadd.f32 %v1683_v59, %v1682_v5  ;;  %v1721_v23 = vadd.f32 %v1720_v35, %v1719_v17  ;;  %v3039_v17 = vld [vmem:[#allocation6 + $0x60] sm:$0xff]  }
 0x332   :  { %2952 = vmatprep.subr.bf16.mxu1 %v3039_v17 }
 0x333   :  { %v1685_v20 = vrot.slane %v1684_v57, 2  ;;  %v1723_v61 = vadd.f32 %v1722_v50, %v1721_v23  ;;  %v3040_v23 = vld [vmem:[#allocation6 + $0x58] sm:$0xff]   ;;  %2953 = vmatpush3.bf16.msra.mxu1 %v3039_v17  ;;  %v3041_v50 = vld [vmem:[#allocation6 + $0x50] sm:$0xff]  }
 0x334   :  { %2954 = vmatprep.subr.bf16.mxu1 %v3040_v23 }
 0x335   :  { %v1686_v29 = vadd.f32 %v1685_v20, %v1684_v57  ;;  %v1725_v5 = vadd.f32 %v1724_v46, %v1723_v61 }
 0x337   :  { %v1687_v12 = vrot.slane %v1686_v29, 1  ;;  %2955 = vmatpush3.bf16.msra.mxu1 %v3040_v23 }
 0x338   :  { %2956 = vmatprep.subr.bf16.mxu1 %v3041_v50 }
 0x339   :  { %v1688_v3 = vadd.f32 %v1687_v12, %v1686_v29 }
 0x33b   :  { %v1690_v7 = vmul.f32 0.015625, %v1688_v3  ;;  %2957 = vmatpush3.bf16.msra.mxu1 %v3041_v50 }
 0x33d   :  { %v1691_v15 = vmul.f32 %v1690_v7, %v1665_v18 }
 0x33f   :  { %v1693_v45 = vsel %vm1692_vm4, %v1691_v15, 0.0 }
 0x340   :  { %1694 = vadd.xlane.f32.xlu1 %v1693_v45 }
 0x359   :  { %v2950_v22 = vpop.f32.mrf.mxu1 }
 0x35a   :  { %v4422_v57 = vadd.f32 %v2950_v22, %v4353_v33 }
 0x35b   :  { %v1630_v1 = vpop.f32.mrf.mxu1 }
 0x35c   :  { %v4415_v47 = vadd.f32 %v4353_v33, %v1630_v1  ;;  %v1730_v15 = vsel %vm1667_vm3, %v4422_v57, 0.0 }
 0x35d   :  { %v2951_v21 = vpop.f32.mrf.mxu1 }
 0x35e   :  { %v1726_v11 = vsel %vm1667_vm3, %v4415_v47, 0.0  ;;  %v4428_v12 = vadd.f32 %v2951_v21, %v4353_v33  ;;  %v3042_v21 = vld [vmem:[#allocation6 + $0x48] sm:$0xff]  }
 0x35f   :  { %v1633_v59 = vpop.f32.mrf.mxu1  ;;  %v1727_v29 = vadd.f32 %v1726_v11, %v1725_v5  ;;  %2958 = vmatprep.subr.bf16.mxu1 %v3042_v21  ;;  %v1666_v5 = vld [vmem:[#allocation7 + $0x30] sm:$0xf] }
 0x360   :  { %v4425_v20 = vadd.f32 %v4353_v33, %v1633_v59  ;;  %v1732_v10 = vsel %vm1667_vm3, %v4428_v12, 0.0  ;;  %2959 = vmatpush3.bf16.msra.mxu1 %v3042_v21 }
 0x362   :  { %v1728_v3 = vsel %vm1667_vm3, %v4425_v20, 0.0 }
 0x363   :  { %v1729_v7 = vadd.f32 %v1728_v3, %v1727_v29 }
 0x365   :  { %v1731_v45 = vadd.f32 %v1730_v15, %v1729_v7 }
 0x367   :  { %v1733_v25 = vadd.f32 %v1732_v10, %v1731_v45 }
 0x369   :  { %v1734_v52 = vrot.slane %v1733_v25, 4 }
 0x36b   :  { %v1735_v26 = vadd.f32 %v1734_v52, %v1733_v25 }
 0x36d   :  { %v1736_v35 = vrot.slane %v1735_v26, 2 }
 0x36f   :  { %v1737_v22 = vadd.f32 %v1736_v35, %v1735_v26 }
 0x371   :  { %v1738_v33 = vrot.slane %v1737_v22, 1 }
 0x373   :  { %v1739_v61 = vadd.f32 %v1738_v33, %v1737_v22 }
 0x375   :  { %v1740_v1 = vmul.f32 0.015625, %v1739_v61 }
 0x377   :  { %v1741_v46 = vmul.f32 %v1740_v1, %v1665_v18 }
 0x379   :  { %v1742_v11 = vsel %vm1692_vm4, %v1741_v46, 0.0  ;;  %v5603_v46 = vld [vmem:[#allocation26_spill] sm:$0xff] }
 0x37a   :  { %1743 = vadd.xlane.f32.xlu0 %v1742_v11 }
 0x3c9   :  { %v1695_v59 = vpop.xlane.xlu1 %1694 }
 0x3ca   :  { %v1696_v29 = vmax.f32 %v1695_v59, 0.0  ;;  %v5605_v59 = vld [vmem:[#allocation30_spill] sm:$0xff] }
 0x3cc   :  { %v1697_v3 = vmul.f32 %v1696_v29, %v1666_v5 }
 0x3ce   :  { %v1698_v7 = vsel %vm1692_vm4, %v1697_v3, 0.0  ;;  %v5607_v3 = vld [vmem:[#allocation25_spill] sm:$0xff] }
 0x3cf   :  { %v1699_v15 = vrot.slane %v1698_v7, 4 }
 0x3d1   :  { %v1700_v45 = vadd.f32 %v1699_v15, %v1698_v7 }
 0x3d3   :  { %v1701_v10 = vrot.slane %v1700_v45, 2 }
 0x3d5   :  { %v1702_v25 = vadd.f32 %v1701_v10, %v1700_v45 }
 0x3d7   :  { %v1703_v52 = vrot.slane %v1702_v25, 1 }
 0x3d9   :  { %v1704_v26 = vadd.f32 %v1703_v52, %v1702_v25 }
 0x3db   :  { %v2827_v35 = vmul.f32 -1.442695, %v1704_v26 }
 0x3dd   :  { %3044 = vpow2.f32 %v2827_v35 }
 0x3ea   :  { %v3045_v18 = vpop.eup %3044 }
 0x3eb   :  { %v1708_v17 = vadd.f32 1.0, %v3045_v18 }
 0x3ed   :  { %3046 = vrcp.f32 %v1708_v17 }
 0x3fa   :  { %v3047_v23 = vpop.eup %3046 }
 0x3fb   :  { %v1711_v22 = vmul.f32 %v3047_v23, %v4356_v43  ;;  %v1712_v33 = vmul.f32 %v3047_v23, %v4362_v31  ;;  %v1713_v50 = vmul.f32 %v3047_v23, %v4359_v58  ;;  %v1714_v61 = vmul.f32 %v3047_v23, %v4367_v13  ;;  %v5609_v43 = vld [vmem:[#allocation27_spill] sm:$0xff]  ;;  %v5611_v31 = vld [vmem:[#allocation38_spill] sm:$0xff] }
 0x3fc   :  { %v1715_v1 = vmul.f32 %v3047_v23, %v4374_v44  ;;  %v1716_v21 = vmul.f32 %v3047_v23, %v4384_v40  ;;  %v5613_v13 = vld [vmem:[#allocation47_spill] sm:$0xff]  ;;  %v1717_v44 = vmul.f32 %v3047_v23, %v4379_v39  ;;  %v1718_v40 = vmul.f32 %v3047_v23, %v4387_v42  ;;  %v5615_v42 = vld [vmem:[#allocation34_spill] sm:$0xff] }
 0x3fd   :  { %v4445_v11 = vadd.f32 %v1711_v22, %v5603_v46  ;;  %v4448_v29 = vadd.f32 %v1712_v33, %v5605_v59  ;;  %v4451_v7 = vadd.f32 %v1713_v50, %v5607_v3  ;;  %v4454_v15 = vadd.f32 %v1714_v61, %v5609_v43  ;;  %v5617_v22 = vld [vmem:[#allocation44_spill] sm:$0xff] }
 0x3fe   :  { %v4457_v58 = vadd.f32 %v1715_v1, %v5611_v31  ;;  %v4460_v45 = vadd.f32 %v1716_v21, %v5613_v13  ;;  %v4479_v23 = vadd.f32 %v1717_v44, %v5615_v42  ;;  %v4482_v33 = vadd.f32 %v1718_v40, %v5617_v22 }
 0x3ff   :  { %5604 = vst [vmem:[#allocation96_spill] sm:$0xff] %v4445_v11  ;;  %5606 = vst [vmem:[#allocation81_spill] sm:$0xff] %v4448_v29  ;;  %v5418_v10 = vmax.f32 %v4445_v11, 0.0  ;;  %v5417_v25 = vmax.f32 %v4448_v29, 0.0  ;;  %v5416_v52 = vmax.f32 %v4451_v7, 0.0  ;;  %v5415_v26 = vmax.f32 %v4454_v15, 0.0 }
 0x400   :  { %5608 = vst [vmem:[#allocation95_spill] sm:$0xff] %v4451_v7  ;;  %5610 = vst [vmem:[#allocation94_spill] sm:$0xff] %v4454_v15  ;;  %v5414_v35 = vmax.f32 %v4457_v58, 0.0  ;;  %v5413_v18 = vmax.f32 %v4460_v45, 0.0  ;;  %v5412_v46 = vmax.f32 %v4479_v23, 0.0  ;;  %v5411_v59 = vmax.f32 %v4482_v33, 0.0 }
 0x401   :  { %5612 = vst [vmem:[#allocation76_spill] sm:$0xff] %v4457_v58  ;;  %5614 = vst [vmem:[#allocation79_spill] sm:$0xff] %v4460_v45  ;;  %v1800_v17 = vpack.c.bf16 %v5417_v25, %v5418_v10  ;;  %v1801_v39 = vpack.c.bf16 %v5415_v26, %v5416_v52  ;;  %v5646_v45 = vld [vmem:[#allocation22_spill] sm:$0xff] }
 0x402   :  { %5616 = vst [vmem:[#allocation91_spill] sm:$0xff] %v4479_v23  ;;  %5618 = vst [vmem:[#allocation39_spill] sm:$0xff] %v4482_v33  ;;  %v1802_v61 = vpack.c.bf16 %v5413_v18, %v5414_v35  ;;  %v1803_v31 = vpack.c.bf16 %v5411_v59, %v5412_v46  ;;  %v5636_v59 = vld [vmem:[#allocation12_spill] sm:$0xff] }
 0x403   :  { %2960 = vmatprep.mubr.msk.bf16.mxu1 %vm1667_vm3, %v1800_v17  ;;  %v1744_v50 = vpop.xlane.xlu0 %1743  ;;  %v5637_v46 = vsub.s32 7, %v5636_v59  ;;  %v5640_v26 = vsub.s32 3, %v5636_v59  ;;  %v5641_v52 = vsub.s32 0, %v5636_v59 }
 0x404   :  { %v1745_v1 = vmax.f32 %v1744_v50, 0.0  ;;  %2961 = vmatmul.mubr.msk.bf16.vlgmr.msra.gmra.mxu1 %vm1667_vm3, %v1801_v39 }
 0x405   :  { %2964 = vmatprep.mubr.msk.bf16.mxu1 %vm1667_vm3, %v1802_v61 }
 0x406   :  { %v1746_v21 = vmul.f32 %v1745_v1, %v1666_v5 }
 0x408   :  { %v1747_v3 = vsel %vm1692_vm4, %v1746_v21, 0.0 }
 0x409   :  { %v1748_v43 = vrot.slane %v1747_v3, 4 }
 0x40b   :  { %v1749_v13 = vadd.f32 %v1748_v43, %v1747_v3 }
 0x40c   :  { %2965 = vmatmul.mubr.msk.bf16.gmra.mxu1 %vm1667_vm3, %v1803_v31 }
 0x40d   :  { %v1750_v44 = vrot.slane %v1749_v13, 2 }
 0x40f   :  { %v1751_v40 = vadd.f32 %v1750_v44, %v1749_v13  ;;  %v5619_v13 = vld [vmem:[#allocation59_spill] sm:$0xff] }
 0x411   :  { %v1752_v17 = vrot.slane %v1751_v40, 1 }
 0x413   :  { %v1753_v39 = vadd.f32 %v1752_v17, %v1751_v40  ;;  %v5621_v40 = vld [vmem:[#allocation68_spill] sm:$0xff] }
 0x415   :  { %v2828_v5 = vmul.f32 -1.442695, %v1753_v39  ;;  %v5623_v39 = vld [vmem:[#allocation56_spill] sm:$0xff] }
 0x417   :  { %3048 = vpow2.f32 %v2828_v5 }
 0x424   :  { %v3049_v42 = vpop.eup %3048 }
 0x425   :  { %v1757_v22 = vadd.f32 1.0, %v3049_v42 }
 0x427   :  { %3050 = vrcp.f32 %v1757_v22 }
 0x434   :  { %v3051_v50 = vpop.eup %3050 }
 0x435   :  { %v1760_v61 = vmul.f32 %v3051_v50, %v4400_v34  ;;  %v1761_v1 = vmul.f32 %v3051_v50, %v4397_v41  ;;  %v1762_v21 = vmul.f32 %v3051_v50, %v4405_v62  ;;  %v1763_v3 = vmul.f32 %v3051_v50, %v4412_v6  ;;  %v5625_v34 = vld [vmem:[#allocation66_spill] sm:$0xff]  ;;  %v5627_v41 = vld [vmem:[#allocation73_spill] sm:$0xff] }
 0x436   :  { %v1764_v43 = vmul.f32 %v3051_v50, %v4415_v47  ;;  %v1765_v31 = vmul.f32 %v3051_v50, %v4425_v20  ;;  %v5629_v6 = vld [vmem:[#allocation82_spill] sm:$0xff]  ;;  %v1766_v47 = vmul.f32 %v3051_v50, %v4422_v57  ;;  %v1767_v20 = vmul.f32 %v3051_v50, %v4428_v12  ;;  %v5631_v12 = vld [vmem:[#allocation87_spill] sm:$0xff] }
 0x437   :  { %v4506_v44 = vadd.f32 %v1760_v61, %v5619_v13  ;;  %v4509_v17 = vadd.f32 %v1761_v1, %v5621_v40  ;;  %v4512_v5 = vadd.f32 %v1762_v21, %v5623_v39  ;;  %v4515_v42 = vadd.f32 %v1763_v3, %v5625_v34  ;;  %v5633_v40 = vld [vmem:[#allocation88_spill] sm:$0xff] }
 0x438   :  { %v4518_v62 = vadd.f32 %v1764_v43, %v5627_v41  ;;  %v4521_v22 = vadd.f32 %v1765_v31, %v5629_v6  ;;  %v4540_v50 = vadd.f32 %v1766_v47, %v5631_v12  ;;  %v4543_v39 = vadd.f32 %v1767_v20, %v5633_v40  ;;  %v3043_v20 = vld [vmem:[#allocation6 + $0x68] sm:$0xff]  }
 0x439   :  { %5620 = vst [vmem:[#allocation78_spill] sm:$0xff] %v4506_v44  ;;  %5622 = vst [vmem:[#allocation31_spill] sm:$0xff] %v4509_v17  ;;  %v5410_v61 = vmax.f32 %v4506_v44, 0.0  ;;  %v5409_v1 = vmax.f32 %v4509_v17, 0.0  ;;  %v5408_v21 = vmax.f32 %v4512_v5, 0.0  ;;  %v5405_v13 = vmax.f32 %v4515_v42, 0.0  ;;  %2976 = vmatprep.subr.bf16.mxu0 %v3043_v20  ;;  %2994 = vmatprep.subr.bf16.mxu1 %v3043_v20 }
 0x43a   :  { %5624 = vst [vmem:[#allocation99_spill] sm:$0xff] %v4512_v5  ;;  %5626 = vst [vmem:[#allocation93_spill] sm:$0xff] %v4515_v42  ;;  %v5404_v3 = vmax.f32 %v4518_v62, 0.0  ;;  %v5403_v43 = vmax.f32 %v4521_v22, 0.0  ;;  %v5407_v41 = vmax.f32 %v4540_v50, 0.0  ;;  %v5406_v6 = vmax.f32 %v4543_v39, 0.0  ;;  %2977 = vmatpush3.bf16.msra.mxu0 %v3043_v20  ;;  %2995 = vmatpush3.bf16.msra.mxu1 %v3043_v20 }
 0x43b   :  { %5628 = vst [vmem:[#allocation75_spill] sm:$0xff] %v4518_v62  ;;  %5630 = vst [vmem:[#allocation41_spill] sm:$0xff] %v4521_v22  ;;  %v1804_v31 = vpack.c.bf16 %v5409_v1, %v5410_v61  ;;  %v1805_v57 = vpack.c.bf16 %v5405_v13, %v5408_v21  ;;  %v5643_v22 = vsub.s32 5, %v5636_v59  ;;  %v5644_v62 = vsub.s32 2, %v5636_v59 }
 0x43c   :  { %5632 = vst [vmem:[#allocation85_spill] sm:$0xff] %v4540_v50  ;;  %5634 = vst [vmem:[#allocation64_spill] sm:$0xff] %v4543_v39  ;;  %v1806_v34 = vpack.c.bf16 %v5403_v43, %v5404_v3  ;;  %v1807_v47 = vpack.c.bf16 %v5406_v6, %v5407_v41  ;;  %v1982_v41 = vld [vmem:[#allocation7 + $0x40] sm:$0xff] }
 0x43d   :  { %2968 = vmatprep.mubr.msk.bf16.mxu1 %vm1667_vm3, %v1804_v31  ;;  %v4569_v18 = vrot.slane %v1982_v41, %v5637_v46  ;;  %v4584_v46 = vrot.slane %v1982_v41, %v5640_v26  ;;  %v4600_v26 = vrot.slane %v1982_v41, %v5643_v22 }
 0x43e   :  { %2969 = vmatmul.mubr.msk.bf16.gmra.mxu1 %vm1667_vm3, %v1805_v57  ;;  %v4559_v57 = vld [vmem:[#allocation7 + $0x38] ss:$0 sm:$0xff] }
 0x43f   :  { %2972 = vmatprep.mubr.msk.bf16.mxu1 %vm1667_vm3, %v1806_v34  ;;  %5635 = vst [vmem:[#allocation89_spill] sm:$0xff] %v4559_v57 }
 0x446   :  { %2973 = vmatmul.mubr.msk.bf16.gmra.mxu1 %vm1667_vm3, %v1807_v47 }
 0x4c4   :  { %v2962_v31 = vpop.f32.mrf.mxu1 }
 0x4c5   :  { %v1912_v40 = vadd.f32 %v2962_v31, %v4559_v57  ;;  %v5638_v31 = vsub.s32 4, %v5636_v59 }
 0x4c6   :  { %v1903_v12 = vpop.f32.mrf.mxu1 }
 0x4c7   :  { %v1904_v34 = vadd.f32 %v4559_v57, %v1903_v12  ;;  %v1968_v47 = vmax.f32 %v1912_v40, 0.0  ;;  %v4573_v12 = vrot.slane %v1982_v41, %v5638_v31  ;;  %v4588_v31 = vrot.slane %v1982_v41, %v5641_v52 }
 0x4c8   :  { %v2963_v43 = vpop.f32.mrf.mxu1  ;;  %v4604_v52 = vrot.slane %v1982_v41, %v5644_v62 }
 0x4c9   :  { %v1966_v3 = vmax.f32 %v1904_v34, 0.0  ;;  %v1915_v13 = vadd.f32 %v2963_v43, %v4559_v57  ;;  %v5639_v43 = vsub.s32 1, %v5636_v59  ;;  %v2068_v40 = vrot.slane %v1968_v47, 7 }
 0x4ca   :  { %v1906_v6 = vpop.f32.mrf.mxu1  ;;  %v2004_v10 = vrot.slane %v1968_v47, 1 }
 0x4cb   :  { %v1907_v21 = vadd.f32 %v4559_v57, %v1906_v6  ;;  %v2065_v1 = vrot.slane %v1966_v3, 7  ;;  %v4565_v61 = vmax.f32 %v1915_v13, 0.0  ;;  %v4578_v35 = vrot.slane %v1982_v41, %v5639_v43 }
 0x4cc   :  { %v5642_v6 = vsub.s32 6, %v5636_v59  ;;  %v2001_v44 = vrot.slane %v1966_v3, 1 }
 0x4cd   :  { %v1967_v20 = vmax.f32 %v1907_v21, 0.0  ;;  %v2112_v34 = vsel %vm459_vm0, 0.0, %v2065_v1  ;;  %v5424_v13 = vrot.slane %v4565_v61, 7  ;;  %v2966_v21 = vpop.f32.mrf.mxu1  ;;  %v5645_v5 = vrot.slane %v4565_v61, 1 }
 0x4ce   :  { %v2113_v25 = vmul.f32 %v2112_v34, %v5562_v53  ;;  %v4596_v50 = vrot.slane %v1982_v41, %v5642_v6  ;;  %v2155_v53 = vmul.f32 %v4573_v12, %v1968_v47  ;;  %v4608_v34 = vmul.f32 %v4569_v18, %v1968_v47 }
 0x4cf   :  { %v2071_v43 = vsel %vm459_vm0, %v2068_v40, %v5424_v13  ;;  %v2066_v39 = vrot.slane %v1967_v20, 7  ;;  %v2002_v42 = vrot.slane %v1967_v20, 1  ;;  %v2364_v13 = vmul.f32 %v4578_v35, %v1968_v47  ;;  %v1919_v17 = vpop.f32.mrf.mxu1 }
 0x4d0   :  { %v2007_v6 = vsel %vm314_vm1, %v2004_v10, %v5645_v5  ;;  %v2133_v22 = vmul.f32 %v4584_v46, %v2113_v25  ;;  %v2343_v59 = vmul.f32 %v4588_v31, %v2113_v25  ;;  %v2116_v62 = vmul.f32 %v2071_v43, %v3370_v36 }
 0x4d1   :  { %v2153_v41 = vmul.f32 %v4573_v12, %v1966_v3  ;;  %v2362_v33 = vmul.f32 %v4578_v35, %v1966_v3  ;;  %v2067_v23 = vsel %vm459_vm0, %v2065_v1, %v2066_v39  ;;  %v2069_v47 = vsel %vm459_vm0, %v2066_v39, %v2068_v40  ;;  %v2967_v39 = vpop.f32.mrf.mxu1 }
 0x4d2   :  { %v4622_v58 = vmul.f32 %v2007_v6, %v5646_v45  ;;  %v2003_v5 = vsel %vm314_vm1, %v2001_v44, %v2002_v42  ;;  %v2005_v15 = vsel %vm314_vm1, %v2002_v42, %v2004_v10  ;;  %v2114_v7 = vmul.f32 %v2067_v23, %v5561_v37  ;;  %v5647_v23 = vld [vmem:[#allocation24_spill] sm:$0xff] }
 0x4d3   :  { %v2156_v36 = vmul.f32 %v4573_v12, %v4565_v61  ;;  %v2246_v25 = vmul.f32 %v4569_v18, %v4565_v61  ;;  %v2365_v1 = vmul.f32 %v4578_v35, %v4565_v61  ;;  %v1928_v3 = vadd.f32 %v2966_v21, %v4559_v57  ;;  %v5648_v42 = vld [vmem:[#allocation20_spill] sm:$0xff]  ;;  %v1922_v16 = vpop.f32.mrf.mxu1 }
 0x4d4   :  { %v4634_v45 = vadd.f32 %v2153_v41, %v2133_v22  ;;  %v4636_v40 = vadd.f32 %v2362_v33, %v2343_v59  ;;  %v2136_v10 = vmul.f32 %v4584_v46, %v2116_v62  ;;  %v2115_v37 = vmul.f32 %v2069_v47, %v5557_v2 }
 0x4d5   :  { %v4641_v44 = vmul.f32 %v2003_v5, %v5647_v23  ;;  %v2050_v43 = vmul.f32 %v2005_v15, %v5648_v42  ;;  %v2344_v6 = vmul.f32 %v4588_v31, %v2114_v7  ;;  %v1920_v29 = vadd.f32 %v4559_v57, %v1919_v17 }
 0x4d6   :  { %v4648_v21 = vmul.f32 %v4600_v26, %v4622_v58  ;;  %v2227_v33 = vmul.f32 %v4596_v50, %v2116_v62  ;;  %v2346_v22 = vmul.f32 %v4588_v31, %v2116_v62  ;;  %v1931_v59 = vadd.f32 %v2967_v39, %v4559_v57  ;;  %v4663_v62 = vld [vmem:[#allocation7 + $0x48] ss:$0 sm:$0xff] }
 0x4d7   :  { %v4655_v2 = vmul.f32 %v4604_v52, %v4622_v58  ;;  %v2154_v15 = vmul.f32 %v4573_v12, %v1967_v20  ;;  %v2225_v41 = vmul.f32 %v4596_v50, %v2114_v7  ;;  %v2363_v17 = vmul.f32 %v4578_v35, %v1967_v20 }
 0x4d8   :  { %v2172_v47 = vadd.f32 %v2156_v36, %v2136_v10  ;;  %v2134_v5 = vmul.f32 %v4584_v46, %v2114_v7  ;;  %v2135_v23 = vmul.f32 %v4584_v46, %v2115_v37  ;;  %v2244_v42 = vmul.f32 %v4569_v18, %v1967_v20 }
 0x4d9   :  { %v2345_v39 = vmul.f32 %v4588_v31, %v2115_v37  ;;  %v2378_v11 = vadd.f32 %v2363_v17, %v2344_v6  ;;  %v1970_v32 = vmax.f32 %v1920_v29, 0.0  ;;  %v4666_v30 = vmax.f32 %v1931_v59, 0.0 }
 0x4da   :  { %v2261_v60 = vadd.f32 %v2246_v25, %v2227_v33  ;;  %v4668_v27 = vadd.f32 %v2365_v1, %v2346_v22  ;;  %v2278_v36 = vmul.f32 %v4663_v62, %v2050_v43  ;;  %v4671_v10 = vmax.f32 %v1928_v3, 0.0 }
 0x4db   :  { %v2259_v7 = vadd.f32 %v2244_v42, %v2225_v41  ;;  %v2397_v55 = vmul.f32 %v4604_v52, %v2050_v43  ;;  %v2008_v20 = vrot.slane %v1970_v32, 1  ;;  %v2072_v38 = vrot.slane %v1970_v32, 7 }
 0x4dc   :  { %v2170_v4 = vadd.f32 %v2154_v15, %v2134_v5  ;;  %v2171_v54 = vadd.f32 %v2155_v53, %v2135_v23  ;;  %v5445_v6 = vrot.slane %v4666_v30, 1  ;;  %v1923_v29 = vadd.f32 %v4559_v57, %v1922_v16  ;;  %v5651_v53 = vld [vmem:[#allocation13_spill] sm:$0xff]  ;;  %v5652_v5 = vld [vmem:[#allocation50_spill] sm:$0xff] }
 0x4dd   :  { %v4676_v59 = vadd.f32 %v2364_v13, %v2345_v39  ;;  %v2412_v25 = vadd.f32 %v2397_v55, %v2378_v11  ;;  %v5649_v1 = vrot.slane %v4565_v61, 1  ;;  %v5650_v3 = vrot.slane %v4565_v61, 7 }
 0x4de   :  { %v2012_v41 = vrot.slane %v4671_v10, 1  ;;  %v2076_v15 = vrot.slane %v4671_v10, 7  ;;  %v2293_v13 = vadd.f32 %v2278_v36, %v2259_v7  ;;  %v4692_v55 = vmul.f32 %v4569_v18, %v4671_v10 }
 0x4df   :  { %v2009_v33 = vsel %vm314_vm1, %v5649_v1, %v2008_v20  ;;  %v2073_v22 = vsel %vm459_vm0, %v5650_v3, %v2072_v38  ;;  %v2189_v61 = vmul.f32 %v4600_v26, %v4641_v44  ;;  %v4703_v1 = vmax.f32 %v1923_v29, 0.0 }
 0x4e0   :  { %v4687_v17 = vmul.f32 %v2009_v33, %v5651_v53  ;;  %v2117_v16 = vmul.f32 %v2073_v22, %v5652_v5  ;;  %v2015_v39 = vsel %vm314_vm1, %v2012_v41, %v5445_v6  ;;  %v2427_v36 = vmul.f32 %v2412_v25, %v4245_v63  ;;  %v5653_v6 = vld [vmem:[#allocation33_spill] sm:$0xff] }
 0x4e1   :  { %v2226_v3 = vmul.f32 %v4596_v50, %v2115_v37  ;;  %v2157_v22 = vmul.f32 %v4573_v12, %v1970_v32  ;;  %v2247_v53 = vmul.f32 %v4569_v18, %v1970_v32  ;;  %v2366_v5 = vmul.f32 %v4578_v35, %v1970_v32 }
 0x4e2   :  { %v2137_v23 = vmul.f32 %v4584_v46, %v2117_v16  ;;  %v2192_v42 = vmul.f32 %v4600_v26, %v4687_v17  ;;  %v2228_v7 = vmul.f32 %v4596_v50, %v2117_v16  ;;  %v2280_v33 = vmul.f32 %v4663_v62, %v4687_v17 }
 0x4e3   :  { %v2190_v11 = vmul.f32 %v4600_v26, %v2050_v43  ;;  %v2347_v29 = vmul.f32 %v4588_v31, %v2117_v16  ;;  %v4716_v19 = vmul.f32 %v2015_v39, %v5653_v6  ;;  %v5654_v63 = vrot.slane %v4666_v30, 7 }
 0x4e4   :  { %v2205_v37 = vadd.f32 %v2189_v61, %v4634_v45  ;;  %v2173_v0 = vadd.f32 %v2157_v22, %v2137_v23  ;;  %v2208_v24 = vadd.f32 %v2192_v42, %v2172_v47  ;;  %v2010_v49 = vrot.slane %v4703_v1, 1  ;;  %v5655_v61 = vld [vmem:[#allocation14_spill] sm:$0xff]  ;;  %v5656_v42 = vld [vmem:[#allocation29_spill] sm:$0xff] }
 0x4e5   :  { %v4721_v25 = vsel %vm459_vm0, %v2076_v15, %v5654_v63  ;;  %v2074_v32 = vrot.slane %v4703_v1, 7  ;;  %v2262_v28 = vadd.f32 %v2247_v53, %v2228_v7  ;;  %v2295_v43 = vadd.f32 %v2280_v33, %v2261_v60 }
 0x4e6   :  { %v2260_v16 = vadd.f32 %v4608_v34, %v2226_v3  ;;  %v2279_v6 = vmul.f32 %v4663_v62, %v4622_v58  ;;  %v2011_v39 = vsel %vm314_vm1, %v2008_v20, %v2010_v49  ;;  %v2013_v63 = vsel %vm314_vm1, %v2010_v49, %v2012_v41  ;;  %v5657_v34 = vld [vmem:[#allocation15_spill] sm:$0xff]  ;;  %v5659_v3 = vld [vmem:[#allocation62_spill] sm:$0xff] }
 0x4e7   :  { %v2075_v57 = vsel %vm459_vm0, %v2072_v38, %v2074_v32  ;;  %v2077_v45 = vsel %vm459_vm0, %v2074_v32, %v2076_v15  ;;  %v2381_v47 = vadd.f32 %v2366_v5, %v2347_v29  ;;  %v2053_v23 = vmul.f32 %v2011_v39, %v5655_v61  ;;  %v5658_v38 = vld [vmem:[#allocation52_spill] sm:$0xff] }
 0x4e8   :  { %v2118_v22 = vmul.f32 %v2075_v57, %v5656_v42  ;;  %v2248_v60 = vmul.f32 %v4569_v18, %v4703_v1  ;;  %v4738_v7 = vmul.f32 %v2013_v63, %v5657_v34  ;;  %v2294_v58 = vadd.f32 %v2279_v6, %v2260_v16 }
 0x4e9   :  { %v2308_v20 = vmul.f32 %v2293_v13, %v5581_v51  ;;  %v2396_v49 = vmul.f32 %v4604_v52, %v4641_v44  ;;  %v4744_v41 = vmul.f32 %v2077_v45, %v5658_v38  ;;  %v2281_v33 = vmul.f32 %v4663_v62, %v2053_v23  ;;  %v4752_v44 = vld [vmem:[#allocation7 + $0x50] ss:$0 sm:$0xff] }
 0x4ea   :  { %v2229_v15 = vmul.f32 %v4596_v50, %v2118_v22  ;;  %v2206_v57 = vadd.f32 %v2190_v11, %v2170_v4  ;;  %v2309_v53 = vmul.f32 %v2294_v58, %v5659_v3  ;;  %v2207_v32 = vadd.f32 %v4648_v21, %v2171_v54  ;;  %v5660_v54 = vld [vmem:[#allocation37_spill] sm:$0xff] }
 0x4eb   :  { %v2323_v5 = vadd.f32 %v2308_v20, %v2205_v37  ;;  %v2411_v29 = vadd.f32 %v2396_v49, %v4636_v40  ;;  %v2138_v51 = vmul.f32 %v4584_v46, %v2118_v22  ;;  %v2296_v16 = vadd.f32 %v2281_v33, %v2262_v28  ;;  %v5661_v33 = vld [vmem:[#allocation46_spill] sm:$0xff] }
 0x4ec   :  { %v2263_v13 = vadd.f32 %v2248_v60, %v2229_v15  ;;  %v2310_v6 = vmul.f32 %v2295_v43, %v5587_v8  ;;  %v2282_v39 = vmul.f32 %v4663_v62, %v4738_v7  ;;  %v2324_v63 = vadd.f32 %v2309_v53, %v2206_v57 }
 0x4ed   :  { %v2426_v4 = vmul.f32 %v2411_v29, %v5578_v48  ;;  %v2441_v11 = vadd.f32 %v2323_v5, %v4235_v14  ;;  %v2158_v40 = vmul.f32 %v4573_v12, %v4703_v1  ;;  %v2311_v21 = vmul.f32 %v2296_v16, %v5660_v54 }
 0x4ee   :  { %v2325_v37 = vadd.f32 %v2310_v6, %v2207_v32  ;;  %v2413_v28 = vadd.f32 %v4655_v2, %v4676_v59  ;;  %v2297_v45 = vadd.f32 %v2282_v39, %v2263_v13  ;;  %v2193_v43 = vmul.f32 %v4600_v26, %v2053_v23  ;;  %v5662_v39 = vld [vmem:[#allocation49_spill] sm:$0xff] }
 0x4ef   :  { %v2442_v61 = vadd.f32 %v2426_v4, %v2324_v63  ;;  %v2461_v8 = vadd.f32 %v4752_v44, %v2441_v11  ;;  %v2326_v42 = vadd.f32 %v2311_v21, %v2208_v24  ;;  %v2230_v14 = vmul.f32 %v4596_v50, %v4744_v41  ;;  %v5664_v4 = vld [vmem:[#allocation55_spill] sm:$0xff] }
 0x4f0   :  { %v2428_v48 = vmul.f32 %v2413_v28, %v5585_v9  ;;  %v2443_v60 = vadd.f32 %v2427_v36, %v2325_v37  ;;  %v2174_v34 = vadd.f32 %v2158_v40, %v2138_v51  ;;  %v2209_v49 = vadd.f32 %v2193_v43, %v2173_v0 }
 0x4f1   :  { %v2462_v58 = vadd.f32 %v4752_v44, %v2442_v61  ;;  %v2477_v20 = vmax.f32 %v2461_v8, 0.0  ;;  %v2264_v59 = vadd.f32 %v4692_v55, %v2230_v14  ;;  %v2283_v15 = vmul.f32 %v4663_v62, %v4716_v19 }
 0x4f2   :  { %v2444_v38 = vadd.f32 %v2428_v48, %v2326_v42  ;;  %v2463_v2 = vadd.f32 %v4752_v44, %v2443_v60  ;;  %v2312_v9 = vmul.f32 %v2297_v45, %v5661_v33  ;;  %v2399_v36 = vmul.f32 %v4604_v52, %v4687_v17  ;;  %v5665_v60 = vld [vmem:[#allocation89_spill] sm:$0xff] }
 0x4f3   :  { %v2478_v24 = vmax.f32 %v2462_v58, 0.0  ;;  %v2400_v57 = vmul.f32 %v4604_v52, %v2053_v23  ;;  %v2348_v3 = vmul.f32 %v4588_v31, %v2118_v22  ;;  %v2194_v53 = vmul.f32 %v4600_v26, %v4738_v7  ;;  %v5663_v22 = vld [vmem:[#allocation32_spill] sm:$0xff] }
 0x4f4   :  { %v2464_v0 = vadd.f32 %v4752_v44, %v2444_v38  ;;  %v2298_v5 = vadd.f32 %v2283_v15, %v2264_v59  ;;  %v2327_v29 = vadd.f32 %v2312_v9, %v2209_v49  ;;  %v2414_v32 = vadd.f32 %v2399_v36, %v4668_v27 }
 0x4f5   :  { %v2496_v55 = vpack.c.bf16 %v2478_v24, %v2477_v20  ;;  %v2415_v51 = vadd.f32 %v2400_v57, %v2381_v47  ;;  %v2479_v13 = vmax.f32 %v2463_v2, 0.0  ;;  %v2210_v6 = vadd.f32 %v2194_v53, %v2174_v34 }
 0x4f6   :  { %v2480_v16 = vmax.f32 %v2464_v0, 0.0  ;;  %v2313_v17 = vmul.f32 %v2298_v5, %v5662_v39  ;;  %v2368_v23 = vmul.f32 %v4578_v35, %v4671_v10  ;;  %v2120_v63 = vmul.f32 %v4721_v25, %v5663_v22  ;;  %v5667_v39 = vld [vmem:[#allocation58_spill] sm:$0xff] }
 0x4f7   :  { %2978 = vmatprep.mubr.msk.bf16.mxu0 %vm1523_vm2, %v2496_v55  ;;  %v2429_v11 = vmul.f32 %v2414_v32, %v5664_v4  ;;  %v2349_v40 = vmul.f32 %v4588_v31, %v4744_v41  ;;  %v2367_v27 = vmul.f32 %v4578_v35, %v4703_v1  ;;  %v2430_v21 = vmul.f32 %v2415_v51, %v4256_v56 }
 0x4f8   :  { %v2497_v47 = vpack.c.bf16 %v2480_v16, %v2479_v13  ;;  %v2328_v54 = vadd.f32 %v2313_v17, %v2210_v6  ;;  %v2139_v28 = vmul.f32 %v4584_v46, %v4744_v41  ;;  %v2159_v8 = vmul.f32 %v4573_v12, %v4671_v10  ;;  %v5666_v16 = vld [vmem:[#allocation77_spill] sm:$0xff] }
 0x4f9   :  { %v2445_v37 = vadd.f32 %v2429_v11, %v2327_v29  ;;  %v2382_v45 = vadd.f32 %v2367_v27, %v2348_v3  ;;  %v2383_v61 = vadd.f32 %v2368_v23, %v2349_v40  ;;  %v2140_v43 = vmul.f32 %v4584_v46, %v2120_v63 }
 0x4fa   :  { %2979 = vmatmul.mubr.msk.bf16.vlgmr.msra.gmra.mxu0 %vm1523_vm2, %v2497_v47  ;;  %v2446_v25 = vadd.f32 %v2430_v21, %v2328_v54  ;;  %v2160_v1 = vmul.f32 %v4573_v12, %v4666_v30  ;;  %v2401_v14 = vmul.f32 %v4604_v52, %v4738_v7  ;;  %v2402_v34 = vmul.f32 %v4604_v52, %v4716_v19 }
 0x4fb   :  { %v2465_v42 = vadd.f32 %v4752_v44, %v2445_v37  ;;  %v2231_v10 = vmul.f32 %v4596_v50, %v2120_v63  ;;  %v2350_v58 = vmul.f32 %v4588_v31, %v2120_v63  ;;  %v2175_v38 = vadd.f32 %v2159_v8, %v2139_v28  ;;  %v5672_v8 = vld [vmem:[#allocation35_spill] sm:$0xff] }
 0x4fc   :  { %v2466_v48 = vadd.f32 %v4752_v44, %v2446_v25  ;;  %v2416_v15 = vadd.f32 %v2401_v14, %v2382_v45  ;;  %v2417_v24 = vadd.f32 %v2402_v34, %v2383_v61  ;;  %v2250_v33 = vmul.f32 %v4569_v18, %v4666_v30 }
 0x4fd   :  { %v2481_v20 = vmax.f32 %v2465_v42, 0.0  ;;  %v2369_v7 = vmul.f32 %v4578_v35, %v4666_v30  ;;  %v4819_v57 = vadd.f32 %v2160_v1, %v2140_v43  ;;  %v2195_v0 = vmul.f32 %v4600_v26, %v4716_v19 }
 0x4fe   :  { %v2970_v56 = vpop.f32.mrf.mxu1  ;;  %v2482_v2 = vmax.f32 %v2466_v48, 0.0  ;;  %v4823_v53 = vadd.f32 %v2250_v33, %v2231_v10  ;;  %v4833_v6 = vmul.f32 %v2416_v15, %v5666_v16  ;;  %v4836_v17 = vmul.f32 %v2417_v24, %v5667_v39  ;;  %v5673_v48 = vld [vmem:[#allocation16_spill] sm:$0xff] }
 0x4ff   :  { %v1944_v41 = vadd.f32 %v2970_v56, %v5665_v60  ;;  %v4825_v5 = vadd.f32 %v2369_v7, %v2350_v58  ;;  %v4830_v13 = vadd.f32 %v2195_v0, %v2175_v38  ;;  %v5670_v21 = vrot.slane %v4666_v30, 1  ;;  %v5674_v33 = vld [vmem:[#allocation40_spill] sm:$0xff] }
 0x500   :  { %v1935_v49 = vpop.f32.mrf.mxu1  ;;  %v2498_v3 = vpack.c.bf16 %v2482_v2, %v2481_v20  ;;  %v5671_v28 = vrot.slane %v4666_v30, 7 }
 0x501   :  { %v1936_v59 = vadd.f32 %v5665_v60, %v1935_v49  ;;  %v4817_v9 = vmax.f32 %v1944_v41, 0.0 }
 0x502   :  { %v2971_v36 = vpop.f32.mrf.mxu1  ;;  %2982 = vmatprep.mubr.msk.bf16.mxu0 %vm1523_vm2, %v2498_v3 }
 0x503   :  { %v1974_v55 = vmax.f32 %v1936_v59, 0.0  ;;  %v1947_v29 = vadd.f32 %v2971_v36, %v5665_v60  ;;  %v2020_v19 = vrot.slane %v4817_v9, 1  ;;  %v2084_v23 = vrot.slane %v4817_v9, 7 }
 0x504   :  { %v1938_v32 = vpop.f32.mrf.mxu1  ;;  %v4842_v11 = vmul.f32 %v4573_v12, %v4817_v9  ;;  %v4846_v40 = vmul.f32 %v4569_v18, %v4817_v9  ;;  %v4852_v54 = vmul.f32 %v4578_v35, %v4817_v9  ;;  %v5675_v9 = vld [vmem:[#allocation57_spill] sm:$0xff] }
 0x505   :  { %v1939_v51 = vadd.f32 %v5665_v60, %v1938_v32  ;;  %v2016_v22 = vrot.slane %v1974_v55, 1  ;;  %v2080_v63 = vrot.slane %v1974_v55, 7  ;;  %v4848_v27 = vmax.f32 %v1947_v29, 0.0  ;;  %v5676_v32 = vld [vmem:[#allocation17_spill] sm:$0xff] }
 0x506   :  { %v2974_v4 = vpop.f32.mrf.mxu1  ;;  %5668 = vst [vmem:[#allocation98_spill] sm:$0xff] %v4842_v11  ;;  %5669 = vst [vmem:[#allocation92_spill] sm:$0xff] %v4852_v54  ;;  %v2161_v25 = vmul.f32 %v4573_v12, %v1974_v55  ;;  %v2251_v1 = vmul.f32 %v4569_v18, %v1974_v55  ;;  %v2370_v14 = vmul.f32 %v4578_v35, %v1974_v55 }
 0x507   :  { %v1975_v47 = vmax.f32 %v1939_v51, 0.0  ;;  %v2017_v37 = vsel %vm314_vm1, %v5670_v21, %v2016_v22  ;;  %v2081_v45 = vsel %vm459_vm0, %v5671_v28, %v2080_v63  ;;  %v2022_v42 = vrot.slane %v4848_v27, 1 }
 0x508   :  { %v1951_v61 = vpop.f32.mrf.mxu1  ;;  %v2121_v43 = vmul.f32 %v2081_v45, %v5672_v8  ;;  %v2086_v56 = vrot.slane %v4848_v27, 7  ;;  %v4866_v41 = vmul.f32 %v2017_v37, %v5673_v48  ;;  %v1960_v30 = vadd.f32 %v2974_v4, %v5665_v60 }
 0x509   :  { %v2018_v34 = vrot.slane %v1975_v47, 1  ;;  %v2023_v49 = vsel %vm314_vm1, %v2020_v19, %v2022_v42  ;;  %v2164_v2 = vmul.f32 %v4573_v12, %v4848_v27  ;;  %v2254_v3 = vmul.f32 %v4569_v18, %v4848_v27 }
 0x50a   :  { %v2141_v10 = vmul.f32 %v4584_v46, %v2121_v43  ;;  %v2232_v58 = vmul.f32 %v4596_v50, %v2121_v43  ;;  %v2351_v20 = vmul.f32 %v4588_v31, %v2121_v43  ;;  %v2087_v38 = vsel %vm459_vm0, %v2084_v23, %v2086_v56  ;;  %v2975_v24 = vpop.f32.mrf.mxu1 }
 0x50b   :  { %v2019_v59 = vsel %vm314_vm1, %v2016_v22, %v2018_v34  ;;  %v2021_v15 = vsel %vm314_vm1, %v2018_v34, %v2020_v19  ;;  %v4884_v7 = vmul.f32 %v2023_v49, %v5674_v33  ;;  %v2124_v36 = vmul.f32 %v2087_v38, %v5675_v9  ;;  %v5678_v22 = vld [vmem:[#allocation36_spill] sm:$0xff] }
 0x50c   :  { %v2373_v0 = vmul.f32 %v4578_v35, %v4848_v27  ;;  %v4891_v55 = vadd.f32 %v2161_v25, %v2141_v10  ;;  %v4893_v29 = vadd.f32 %v2251_v1, %v2232_v58  ;;  %v4896_v51 = vmul.f32 %v2021_v15, %v5676_v32  ;;  %v1954_v8 = vpop.f32.mrf.mxu1  ;;  %v5679_v1 = vld [vmem:[#allocation43_spill] sm:$0xff] }
 0x50d   :  { %v2082_v16 = vrot.slane %v1975_v47, 7  ;;  %v4898_v39 = vadd.f32 %v2370_v14, %v2351_v20  ;;  %v2144_v19 = vmul.f32 %v4584_v46, %v2124_v36  ;;  %v4902_v4 = vmul.f32 %v2019_v59, %v5678_v22 }
 0x50e   :  { %v2162_v21 = vmul.f32 %v4573_v12, %v1975_v47  ;;  %v2235_v37 = vmul.f32 %v4596_v50, %v2124_v36  ;;  %v2354_v28 = vmul.f32 %v4588_v31, %v2124_v36  ;;  %v2252_v25 = vmul.f32 %v4569_v18, %v1975_v47 }
 0x50f   :  { %5677 = vst [vmem:[#allocation26_spill] sm:$0xff] %v4898_v39  ;;  %v2083_v45 = vsel %vm459_vm0, %v2080_v63, %v2082_v16  ;;  %v2085_v43 = vsel %vm459_vm0, %v2082_v16, %v2084_v23  ;;  %v2286_v14 = vmul.f32 %v4663_v62, %v4896_v51  ;;  %v2371_v34 = vmul.f32 %v4578_v35, %v1975_v47  ;;  %v5683_v47 = vld [vmem:[#allocation54_spill] sm:$0xff] }
 0x510   :  { %v2122_v48 = vmul.f32 %v2083_v45, %v5679_v1  ;;  %v4914_v10 = vadd.f32 %v2164_v2, %v2144_v19  ;;  %v4916_v58 = vmax.f32 %v1960_v30, 0.0  ;;  %v1952_v20 = vadd.f32 %v5665_v60, %v1951_v61 }
 0x511   :  { %v1963_v63 = vadd.f32 %v2975_v24, %v5665_v60  ;;  %v1955_v59 = vadd.f32 %v5665_v60, %v1954_v8  ;;  %v4924_v15 = vadd.f32 %v2254_v3, %v2235_v37  ;;  %v4926_v33 = vadd.f32 %v2373_v0, %v2354_v28 }
 0x512   :  { %5680 = vst [vmem:[#allocation30_spill] sm:$0xff] %v4914_v10  ;;  %v2142_v49 = vmul.f32 %v4584_v46, %v2122_v48  ;;  %v2233_v38 = vmul.f32 %v4596_v50, %v2122_v48  ;;  %v2352_v23 = vmul.f32 %v4588_v31, %v2122_v48  ;;  %v4929_v2 = vmul.f32 %v2085_v43, %v5683_v47  ;;  %v5687_v47 = vld [vmem:[#allocation45_spill] sm:$0xff] }
 0x513   :  { %5681 = vst [vmem:[#allocation25_spill] sm:$0xff] %v4924_v15  ;;  %5682 = vst [vmem:[#allocation27_spill] sm:$0xff] %v4926_v33  ;;  %v2028_v30 = vrot.slane %v4916_v58, 1  ;;  %v2092_v24 = vrot.slane %v4916_v58, 7  ;;  %v4935_v9 = vmul.f32 %v4573_v12, %v4916_v58  ;;  %v4939_v36 = vmul.f32 %v4569_v18, %v4916_v58  ;;  %v5688_v33 = vld [vmem:[#allocation21_spill] sm:$0xff] }
 0x514   :  { %v2267_v61 = vadd.f32 %v2252_v25, %v2233_v38  ;;  %v4941_v60 = vadd.f32 %v2162_v21, %v2142_v49  ;;  %v1978_v3 = vmax.f32 %v1952_v20, 0.0  ;;  %v1981_v0 = vmax.f32 %v1963_v63, 0.0  ;;  %v5686_v49 = vld [vmem:[#allocation51_spill] sm:$0xff] }
 0x515   :  { %5684 = vst [vmem:[#allocation38_spill] sm:$0xff] %v4939_v36  ;;  %v1979_v32 = vmax.f32 %v1955_v59, 0.0  ;;  %v4945_v19 = vadd.f32 %v2371_v34, %v2352_v23  ;;  %v4949_v22 = vmul.f32 %v4578_v35, %v4916_v58  ;;  %v2196_v37 = vmul.f32 %v4600_v26, %v4866_v41 }
 0x516   :  { %v4943_v16 = vadd.f32 %v2286_v14, %v2267_v61  ;;  %v2024_v28 = vrot.slane %v1978_v3, 1  ;;  %v2088_v45 = vrot.slane %v1978_v3, 7  ;;  %v2284_v21 = vmul.f32 %v4663_v62, %v4866_v41 }
 0x517   :  { %5685 = vst [vmem:[#allocation47_spill] sm:$0xff] %v4945_v19  ;;  %v2285_v25 = vmul.f32 %v4663_v62, %v4902_v4  ;;  %v2165_v8 = vmul.f32 %v4573_v12, %v1978_v3  ;;  %v2030_v43 = vrot.slane %v1981_v0, 1  ;;  %v2094_v1 = vrot.slane %v1981_v0, 7  ;;  %v5689_v19 = vld [vmem:[#allocation65_spill] sm:$0xff] }
 0x518   :  { %v4960_v48 = vmul.f32 %v4600_v26, %v4902_v4  ;;  %v2089_v14 = vsel %vm459_vm0, %v2086_v56, %v2088_v45  ;;  %v2255_v34 = vmul.f32 %v4569_v18, %v1978_v3  ;;  %v2374_v58 = vmul.f32 %v4578_v35, %v1978_v3 }
 0x519   :  { %v2026_v20 = vrot.slane %v1979_v32, 1  ;;  %v2025_v63 = vsel %vm314_vm1, %v2022_v42, %v2024_v28  ;;  %v2125_v38 = vmul.f32 %v2089_v14, %v5686_v49  ;;  %v2031_v23 = vsel %vm314_vm1, %v2028_v30, %v2030_v43  ;;  %v5690_v49 = vld [vmem:[#allocation18_spill] sm:$0xff] }
 0x51a   :  { %v2048_v59 = vsel %vm314_vm1, %v2030_v43, 0.0  ;;  %v2063_v61 = vmul.f32 %v2031_v23, %v5687_v47  ;;  %v2095_v56 = vsel %vm459_vm0, %v2092_v24, %v2094_v1  ;;  %v2168_v10 = vmul.f32 %v4573_v12, %v1981_v0 }
 0x51b   :  { %v2064_v36 = vmul.f32 %v2048_v59, %v5688_v33  ;;  %v2145_v3 = vmul.f32 %v4584_v46, %v2125_v38  ;;  %v2236_v27 = vmul.f32 %v4596_v50, %v2125_v38  ;;  %v2355_v42 = vmul.f32 %v4588_v31, %v2125_v38 }
 0x51c   :  { %v2128_v14 = vmul.f32 %v2095_v56, %v5689_v19  ;;  %v4982_v54 = vmul.f32 %v2025_v63, %v5690_v49  ;;  %v2203_v43 = vmul.f32 %v4600_v26, %v2063_v61  ;;  %v2258_v23 = vmul.f32 %v4569_v18, %v1981_v0  ;;  %v5693_v49 = vld [vmem:[#allocation19_spill] sm:$0xff] }
 0x51d   :  { %v2027_v33 = vsel %vm314_vm1, %v2024_v28, %v2026_v20  ;;  %v2204_v59 = vmul.f32 %v4600_v26, %v2064_v36  ;;  %v4990_v47 = vmul.f32 %v4663_v62, %v2063_v61  ;;  %v2292_v38 = vmul.f32 %v4663_v62, %v2064_v36  ;;  %v5694_v36 = vld [vmem:[#allocation42_spill] sm:$0xff] }
 0x51e   :  { %5691 = vst [vmem:[#allocation34_spill] sm:$0xff] %v4982_v54  ;;  %v2148_v1 = vmul.f32 %v4584_v46, %v2128_v14  ;;  %v4993_v15 = vadd.f32 %v2165_v8, %v2145_v3  ;;  %v4995_v19 = vadd.f32 %v2255_v34, %v2236_v27  ;;  %v2239_v63 = vmul.f32 %v4596_v50, %v2128_v14  ;;  %v5695_v27 = vld [vmem:[#allocation60_spill] sm:$0xff]  ;;  %v5696_v14 = vld [vmem:[#allocation61_spill] sm:$0xff] }
 0x51f   :  { %5692 = vst [vmem:[#allocation44_spill] sm:$0xff] %v4990_v47  ;;  %v2029_v56 = vsel %vm314_vm1, %v2026_v20, %v2028_v30  ;;  %v4999_v0 = vadd.f32 %v2374_v58, %v2355_v42  ;;  %v2090_v11 = vrot.slane %v1979_v32, 7  ;;  %v5005_v47 = vmul.f32 %v4604_v52, %v2063_v61 }
 0x520   :  { %v2184_v28 = vadd.f32 %v2168_v10, %v2148_v1  ;;  %v5002_v54 = vmul.f32 %v2029_v56, %v5693_v49  ;;  %v2273_v39 = vadd.f32 %v2258_v23, %v2239_v63  ;;  %v5008_v8 = vmul.f32 %v2027_v33, %v5694_v36  ;;  %v5700_v56 = vld [vmem:[#allocation84_spill] sm:$0xff] }
 0x521   :  { %v2166_v34 = vmul.f32 %v4573_v12, %v1979_v32  ;;  %v2091_v3 = vsel %vm459_vm0, %v2088_v45, %v2090_v11  ;;  %v2093_v30 = vsel %vm459_vm0, %v2090_v11, %v2092_v24  ;;  %v2256_v58 = vmul.f32 %v4569_v18, %v1979_v32 }
 0x522   :  { %v2375_v10 = vmul.f32 %v4578_v35, %v1979_v32  ;;  %v2220_v20 = vadd.f32 %v2204_v59, %v2184_v28  ;;  %v2126_v42 = vmul.f32 %v2091_v3, %v5695_v27  ;;  %v5017_v23 = vmul.f32 %v2093_v30, %v5696_v14 }
 0x523   :  { %v2212_v61 = vadd.f32 %v2196_v37, %v4819_v57  ;;  %v2307_v33 = vadd.f32 %v2292_v38, %v2273_v39  ;;  %v2290_v12 = vmul.f32 %v4663_v62, %v5002_v54  ;;  %v2299_v45 = vadd.f32 %v2284_v21, %v4823_v53  ;;  %v5697_v37 = vld [vmem:[#allocation67_spill] sm:$0xff]  ;;  %v5698_v53 = vld [vmem:[#allocation53_spill] sm:$0xff] }
 0x524   :  { %v2300_v11 = vadd.f32 %v2285_v25, %v4893_v29  ;;  %v2146_v18 = vmul.f32 %v4584_v46, %v2126_v42  ;;  %v2147_v35 = vmul.f32 %v4584_v46, %v5017_v23  ;;  %v2237_v24 = vmul.f32 %v4596_v50, %v2126_v42  ;;  %v5699_v29 = vld [vmem:[#allocation80_spill] sm:$0xff] }
 0x525   :  { %v2409_v32 = vmul.f32 %v4604_v52, %v5002_v54  ;;  %v2356_v57 = vmul.f32 %v4588_v31, %v2126_v42  ;;  %v2357_v39 = vmul.f32 %v4588_v31, %v5017_v23  ;;  %v2314_v1 = vmul.f32 %v2299_v45, %v5697_v37  ;;  %v5704_v37 = vld [vmem:[#allocation71_spill] sm:$0xff] }
 0x526   :  { %v2315_v21 = vmul.f32 %v2300_v11, %v5698_v53  ;;  %v5036_v25 = vadd.f32 %v2220_v20, %v5699_v29  ;;  %v2183_v59 = vadd.f32 %v4935_v9, %v2147_v35  ;;  %v2271_v38 = vadd.f32 %v2256_v58, %v2237_v24 }
 0x527   :  { %v2198_v63 = vmul.f32 %v4600_v26, %v4896_v51  ;;  %v2322_v28 = vmul.f32 %v2307_v33, %v5700_v56  ;;  %v5042_v49 = vadd.f32 %v2166_v34, %v2146_v18  ;;  %v2329_v36 = vadd.f32 %v2314_v1, %v4830_v13  ;;  %v5705_v1 = vld [vmem:[#allocation98_spill] sm:$0xff] }
 0x528   :  { %v2330_v3 = vadd.f32 %v2315_v21, %v2212_v61  ;;  %v2390_v30 = vadd.f32 %v2375_v10, %v2356_v57  ;;  %v5046_v27 = vadd.f32 %v4949_v22, %v2357_v39  ;;  %v2213_v20 = vadd.f32 %v4960_v48, %v4891_v55  ;;  %v5701_v10 = vld [vmem:[#allocation63_spill] sm:$0xff]  ;;  %v5703_v57 = vld [vmem:[#allocation70_spill] sm:$0xff] }
 0x529   :  { %v2234_v9 = vmul.f32 %v4596_v50, %v4929_v2  ;;  %v2219_v58 = vadd.f32 %v2203_v43, %v2183_v59  ;;  %v2305_v42 = vadd.f32 %v2290_v12, %v2271_v38  ;;  %v2447_v14 = vadd.f32 %v4833_v6, %v2329_v36  ;;  %v5706_v21 = vld [vmem:[#allocation86_spill] sm:$0xff]  ;;  %v5708_v36 = vld [vmem:[#allocation25_spill] sm:$0xff] }
 0x52a   :  { %v2448_v34 = vadd.f32 %v4836_v17, %v2330_v3  ;;  %v2287_v13 = vmul.f32 %v4663_v62, %v4884_v7  ;;  %v2316_v22 = vmul.f32 %v4943_v16, %v5701_v10  ;;  %v2403_v55 = vmul.f32 %v4604_v52, %v4866_v41  ;;  %v5702_v41 = vld [vmem:[#allocation26_spill] sm:$0xff] }
 0x52b   :  { %v2268_v33 = vadd.f32 %v4846_v40, %v2234_v9  ;;  %v2467_v48 = vadd.f32 %v4752_v44, %v2447_v14  ;;  %v2214_v61 = vadd.f32 %v2198_v63, %v4941_v60  ;;  %v2404_v6 = vmul.f32 %v4604_v52, %v4902_v4  ;;  %v5707_v59 = vld [vmem:[#allocation34_spill] sm:$0xff] }
 0x52c   :  { %v2468_v43 = vadd.f32 %v4752_v44, %v2448_v34  ;;  %v2331_v40 = vadd.f32 %v2316_v22, %v2213_v20  ;;  %v2418_v12 = vadd.f32 %v2403_v55, %v4825_v5  ;;  %v2143_v45 = vmul.f32 %v4584_v46, %v4929_v2  ;;  %v5711_v22 = vld [vmem:[#allocation47_spill] sm:$0xff] }
 0x52d   :  { %v2302_v17 = vadd.f32 %v2287_v13, %v2268_v33  ;;  %v2424_v16 = vadd.f32 %v2409_v32, %v2390_v30  ;;  %v2483_v11 = vmax.f32 %v2467_v48, 0.0  ;;  %v2419_v35 = vadd.f32 %v2404_v6, %v5702_v41  ;;  %v5710_v13 = vld [vmem:[#allocation92_spill] sm:$0xff]  ;;  %v5712_v48 = vld [vmem:[#allocation30_spill] sm:$0xff] }
 0x52e   :  { %v2484_v18 = vmax.f32 %v2468_v43, 0.0  ;;  %v2337_v24 = vadd.f32 %v2322_v28, %v2219_v58  ;;  %v2433_v60 = vmul.f32 %v2418_v12, %v5704_v37  ;;  %v2179_v53 = vadd.f32 %v5705_v1, %v2143_v45  ;;  %v5715_v12 = vld [vmem:[#allocation28_spill] sm:$0xff] }
 0x52f   :  { %v2317_v39 = vmul.f32 %v2302_v17, %v5703_v57  ;;  %v2434_v29 = vmul.f32 %v2419_v35, %v5706_v21  ;;  %v2199_v5 = vmul.f32 %v4600_v26, %v4884_v7  ;;  %v2288_v46 = vmul.f32 %v4663_v62, %v5707_v59  ;;  %v5716_v57 = vld [vmem:[#allocation100_spill] sm:$0xff] }
 0x530   :  { %v2499_v4 = vpack.c.bf16 %v2484_v18, %v2483_v11  ;;  %v2449_v38 = vadd.f32 %v2433_v60, %v2331_v40  ;;  %v2200_v63 = vmul.f32 %v4600_v26, %v5707_v59  ;;  %v2289_v56 = vmul.f32 %v4663_v62, %v5008_v8  ;;  %v5709_v62 = vld [vmem:[#allocation69_spill] sm:$0xff]  ;;  %v5717_v60 = vld [vmem:[#allocation23_spill] sm:$0xff] }
 0x531   :  { %v2332_v32 = vadd.f32 %v2317_v39, %v2214_v61  ;;  %v2215_v28 = vadd.f32 %v2199_v5, %v2179_v53  ;;  %v2303_v3 = vadd.f32 %v2288_v46, %v5708_v36  ;;  %v2353_v30 = vmul.f32 %v4588_v31, %v4929_v2  ;;  %v5713_v61 = vld [vmem:[#allocation72_spill] sm:$0xff]  ;;  %v5719_v46 = vld [vmem:[#allocation27_spill] sm:$0xff] }
 0x532   :  { %2983 = vmatmul.mubr.msk.bf16.gmra.mxu0 %vm1523_vm2, %v2499_v4  ;;  %v2405_v20 = vmul.f32 %v4604_v52, %v4896_v51  ;;  %v2469_v58 = vadd.f32 %v4752_v44, %v2449_v38  ;;  %v2304_v14 = vadd.f32 %v2289_v56, %v4995_v19  ;;  %v2406_v34 = vmul.f32 %v4604_v52, %v4884_v7  ;;  %v5714_v19 = vld [vmem:[#allocation83_spill] sm:$0xff]  ;;  %v5718_v4 = vld [vmem:[#allocation38_spill] sm:$0xff] }
 0x533   :  { %v2450_v9 = vadd.f32 %v2434_v29, %v2332_v32  ;;  %v2318_v33 = vmul.f32 %v2303_v3, %v5709_v62  ;;  %v2387_v10 = vadd.f32 %v5710_v13, %v2353_v30  ;;  %v2201_v31 = vmul.f32 %v4600_v26, %v5008_v8  ;;  %v5721_v56 = vld [vmem:[#allocation90_spill] sm:$0xff]  ;;  %v5723_v3 = vld [vmem:[#allocation97_spill] sm:$0xff] }
 0x534   :  { %v2420_v55 = vadd.f32 %v2405_v20, %v5711_v22  ;;  %v2485_v51 = vmax.f32 %v2469_v58, 0.0  ;;  %v2216_v43 = vadd.f32 %v2200_v63, %v5712_v48  ;;  %v2319_v6 = vmul.f32 %v2304_v14, %v5713_v61  ;;  %v5724_v14 = vld [vmem:[#allocation74_spill] sm:$0xff] }
 0x535   :  { %v2470_v2 = vadd.f32 %v4752_v44, %v2450_v9  ;;  %v2439_v17 = vmul.f32 %v2424_v16, %v5714_v19  ;;  %v2333_v40 = vadd.f32 %v2318_v33, %v2215_v28  ;;  %v2421_v7 = vadd.f32 %v2406_v34, %v2387_v10 }
 0x536   :  { %v2435_v45 = vmul.f32 %v2420_v55, %v5715_v12  ;;  %v2334_v18 = vadd.f32 %v2319_v6, %v2216_v43  ;;  %v2217_v41 = vadd.f32 %v2201_v31, %v4993_v15  ;;  %v2238_v35 = vmul.f32 %v4596_v50, %v5017_v23  ;;  %v2853_v6 = vld [vmem:[#allocation7 + $0x58] ss:$0 sm:$0xff] }
 0x537   :  { %v2486_v11 = vmax.f32 %v2470_v2, 0.0  ;;  %v2436_v39 = vmul.f32 %v2421_v7, %v5716_v57  ;;  %v2320_v1 = vmul.f32 %v2305_v42, %v5717_v60  ;;  %v2407_v53 = vmul.f32 %v4604_v52, %v5707_v59  ;;  %v5720_v59 = vld [vmem:[#allocation44_spill] sm:$0xff] }
 0x538   :  { %v2451_v37 = vadd.f32 %v2435_v45, %v2333_v40  ;;  %v2272_v21 = vadd.f32 %v5718_v4, %v2238_v35  ;;  %v2408_v29 = vmul.f32 %v4604_v52, %v5008_v8  ;;  %v2425_v15 = vadd.f32 %v5005_v47, %v5046_v27  ;;  %v5722_v27 = vld [vmem:[#allocation48_spill] sm:$0xff] }
 0x539   :  { %v2500_v16 = vpack.c.bf16 %v2486_v11, %v2485_v51  ;;  %v2452_v5 = vadd.f32 %v2436_v39, %v2334_v18  ;;  %v2335_v23 = vadd.f32 %v2320_v1, %v2217_v41  ;;  %v2422_v32 = vadd.f32 %v2407_v53, %v5719_v46 }
 0x53a   :  { %v2471_v50 = vadd.f32 %v4752_v44, %v2451_v37  ;;  %v2202_v42 = vmul.f32 %v4600_v26, %v5002_v54  ;;  %v2306_v38 = vadd.f32 %v5720_v59, %v2272_v21  ;;  %v2423_v63 = vadd.f32 %v2408_v29, %v4999_v0 }
 0x53b   :  { %2986 = vmatprep.mubr.msk.bf16.mxu0 %vm1523_vm2, %v2500_v16  ;;  %v2440_v52 = vmul.f32 %v2425_v15, %v5721_v56  ;;  %v2455_v8 = vadd.f32 %v2439_v17, %v2337_v24  ;;  %v2472_v47 = vadd.f32 %v4752_v44, %v2452_v5  ;;  %v2437_v28 = vmul.f32 %v2422_v32, %v5722_v27 }
 0x53c   :  { %v2218_v36 = vadd.f32 %v2202_v42, %v5042_v49  ;;  %v2321_v30 = vmul.f32 %v2306_v38, %v5723_v3  ;;  %v2487_v9 = vmax.f32 %v2471_v50, 0.0  ;;  %v2438_v34 = vmul.f32 %v2423_v63, %v5724_v14 }
 0x53d   :  { %v2456_v20 = vadd.f32 %v2440_v52, %v5036_v25  ;;  %v2488_v58 = vmax.f32 %v2472_v47, 0.0  ;;  %v2453_v26 = vadd.f32 %v2437_v28, %v2335_v23  ;;  %v2475_v24 = vadd.f32 %v4752_v44, %v2455_v8 }
 0x53e   :  { %v2336_v54 = vadd.f32 %v2321_v30, %v2218_v36 }
 0x53f   :  { %v2501_v0 = vpack.c.bf16 %v2488_v58, %v2487_v9  ;;  %v2473_v62 = vadd.f32 %v4752_v44, %v2453_v26  ;;  %v2476_v33 = vadd.f32 %v4752_v44, %v2456_v20  ;;  %v2491_v25 = vmax.f32 %v2475_v24, 0.0 }
 0x540   :  { %v2454_v13 = vadd.f32 %v2438_v34, %v2336_v54 }
 0x541   :  { %2987 = vmatmul.mubr.msk.bf16.gmra.mxu0 %vm1523_vm2, %v2501_v0  ;;  %v2489_v10 = vmax.f32 %v2473_v62, 0.0  ;;  %v2492_v22 = vmax.f32 %v2476_v33, 0.0  ;;  %v2651_v62 = vld [vmem:[#allocation7 + $0x60] sm:$0xf] }
 0x542   :  { %v2474_v49 = vadd.f32 %v4752_v44, %v2454_v13 }
 0x543   :  { %v2503_v2 = vpack.c.bf16 %v2492_v22, %v2491_v25 }
 0x544   :  { %v2490_v55 = vmax.f32 %v2474_v49, 0.0 }
 0x546   :  { %v2502_v31 = vpack.c.bf16 %v2490_v55, %v2489_v10 }
 0x548   :  { %2990 = vmatprep.mubr.msk.bf16.mxu1 %vm1523_vm2, %v2502_v31 }
 0x549   :  { %2991 = vmatmul.mubr.msk.bf16.vlgmr.msra.gmra.mxu1 %vm1523_vm2, %v2503_v2 }
 0x5ba   :  { %v2980_v51 = vpop.f32.mrf.mxu0 }
 0x5bb   :  { %v5141_v40 = vadd.f32 %v2980_v51, %v2853_v6 }
 0x5bc   :  { %v2568_v48 = vpop.f32.mrf.mxu0 }
 0x5bd   :  { %v5137_v17 = vadd.f32 %v2853_v6, %v2568_v48  ;;  %v2656_v11 = vsel %vm1667_vm3, %v5141_v40, 0.0 }
 0x5be   :  { %v2981_v43 = vpop.f32.mrf.mxu0 }
 0x5bf   :  { %v2653_v7 = vsel %vm1667_vm3, %v5137_v17, 0.0  ;;  %v5147_v18 = vadd.f32 %v2981_v43, %v2853_v6 }
 0x5c0   :  { %v2571_v61 = vpop.f32.mrf.mxu0 }
 0x5c1   :  { %v5135_v19 = vadd.f32 %v2853_v6, %v2571_v61  ;;  %v2658_v37 = vsel %vm1667_vm3, %v5147_v18, 0.0 }
 0x5c3   :  { %v2654_v44 = vsel %vm1667_vm3, %v5135_v19, 0.0 }
 0x5c4   :  { %v2655_v12 = vadd.f32 %v2654_v44, %v2653_v7 }
 0x5c6   :  { %v2657_v41 = vadd.f32 %v2656_v11, %v2655_v12 }
 0x5c8   :  { %v2659_v1 = vadd.f32 %v2658_v37, %v2657_v41 }
 0x5f2   :  { %v2984_v45 = vpop.f32.mrf.mxu0 }
 0x5f3   :  { %v5155_v16 = vadd.f32 %v2984_v45, %v2853_v6 }
 0x5f4   :  { %v2584_v35 = vpop.f32.mrf.mxu0 }
 0x5f5   :  { %v5149_v57 = vadd.f32 %v2853_v6, %v2584_v35  ;;  %v2664_v50 = vsel %vm1667_vm3, %v5155_v16, 0.0 }
 0x5f6   :  { %v2985_v39 = vpop.f32.mrf.mxu0 }
 0x5f7   :  { %v2660_v60 = vsel %vm1667_vm3, %v5149_v57, 0.0  ;;  %v5159_v29 = vadd.f32 %v2985_v39, %v2853_v6 }
 0x5f8   :  { %v2587_v53 = vpop.f32.mrf.mxu0  ;;  %v2661_v21 = vadd.f32 %v2660_v60, %v2659_v1 }
 0x5f9   :  { %v5157_v4 = vadd.f32 %v2853_v6, %v2587_v53  ;;  %v2666_v46 = vsel %vm1667_vm3, %v5159_v29, 0.0 }
 0x5fb   :  { %v2662_v15 = vsel %vm1667_vm3, %v5157_v4, 0.0 }
 0x5fc   :  { %v2663_v5 = vadd.f32 %v2662_v15, %v2661_v21  ;;  %v2652_v15 = vld [vmem:[#allocation7 + $0x68] sm:$0xf] }
 0x5fe   :  { %v2665_v23 = vadd.f32 %v2664_v50, %v2663_v5 }
 0x600   :  { %v2667_v32 = vadd.f32 %v2666_v46, %v2665_v23 }
 0x601   :  { %v2988_v59 = vpop.f32.mrf.mxu0 }
 0x602   :  { %v2668_v42 = vrot.slane %v2667_v32, 4  ;;  %v5169_v28 = vadd.f32 %v2988_v59, %v2853_v6 }
 0x603   :  { %v2600_v63 = vpop.f32.mrf.mxu0 }
 0x604   :  { %v2669_v38 = vadd.f32 %v2668_v42, %v2667_v32  ;;  %v5167_v8 = vadd.f32 %v2853_v6, %v2600_v63  ;;  %v2705_v34 = vsel %vm1667_vm3, %v5169_v28, 0.0 }
 0x605   :  { %v2989_v56 = vpop.f32.mrf.mxu0 }
 0x606   :  { %v2670_v52 = vrot.slane %v2669_v38, 2  ;;  %v2702_v20 = vsel %vm1667_vm3, %v5167_v8, 0.0  ;;  %v5175_v9 = vadd.f32 %v2989_v56, %v2853_v6 }
 0x607   :  { %v2603_v47 = vpop.f32.mrf.mxu0 }
 0x608   :  { %v2671_v27 = vadd.f32 %v2670_v52, %v2669_v38  ;;  %v5171_v36 = vadd.f32 %v2853_v6, %v2603_v47  ;;  %v2707_v49 = vsel %vm1667_vm3, %v5175_v9, 0.0 }
 0x609   :  { %v2992_v3 = vpop.f32.mrf.mxu1 }
 0x60a   :  { %v2672_v30 = vrot.slane %v2671_v27, 1  ;;  %v2703_v58 = vsel %vm1667_vm3, %v5171_v36, 0.0  ;;  %v5185_v55 = vadd.f32 %v2992_v3, %v2853_v6 }
 0x60b   :  { %v2616_v26 = vpop.f32.mrf.mxu1  ;;  %v2704_v54 = vadd.f32 %v2703_v58, %v2702_v20 }
 0x60c   :  { %v2673_v14 = vadd.f32 %v2672_v30, %v2671_v27  ;;  %v5181_v0 = vadd.f32 %v2853_v6, %v2616_v26  ;;  %v2713_v7 = vsel %vm1667_vm3, %v5185_v55, 0.0 }
 0x60d   :  { %v2706_v24 = vadd.f32 %v2705_v34, %v2704_v54  ;;  %v2993_v33 = vpop.f32.mrf.mxu1 }
 0x60e   :  { %v2674_v13 = vmul.f32 0.015625, %v2673_v14  ;;  %v2709_v31 = vsel %vm1667_vm3, %v5181_v0, 0.0  ;;  %v5192_v43 = vadd.f32 %v2993_v33, %v2853_v6 }
 0x60f   :  { %v2619_v10 = vpop.f32.mrf.mxu1  ;;  %v2708_v25 = vadd.f32 %v2707_v49, %v2706_v24 }
 0x610   :  { %v2675_v22 = vmul.f32 %v2674_v13, %v2651_v62  ;;  %v5189_v2 = vadd.f32 %v2853_v6, %v2619_v10  ;;  %v2715_v45 = vsel %vm1667_vm3, %v5192_v43, 0.0 }
 0x611   :  { %v2710_v51 = vadd.f32 %v2709_v31, %v2708_v25 }
 0x612   :  { %v2676_v48 = vsel %vm1692_vm4, %v2675_v22, 0.0  ;;  %v2711_v61 = vsel %vm1667_vm3, %v5189_v2, 0.0 }
 0x613   :  { %2677 = vadd.xlane.f32.xlu0 %v2676_v48  ;;  %v2712_v44 = vadd.f32 %v2711_v61, %v2710_v51 }
 0x615   :  { %v2714_v12 = vadd.f32 %v2713_v7, %v2712_v44  ;;  %v5725_v44 = vld [vmem:[#allocation96_spill] sm:$0xff] }
 0x616   :  { %v5726_v7 = vmax.f32 %v5725_v44, 0.0  ;;  %v5755_v44 = vld [vmem:[#allocation64_spill] sm:$0xff] }
 0x617   :  { %v2716_v11 = vadd.f32 %v2715_v45, %v2714_v12  ;;  %v5727_v45 = vld [vmem:[#allocation81_spill] sm:$0xff] }
 0x619   :  { %v2717_v41 = vrot.slane %v2716_v11, 4 }
 0x61b   :  { %v2718_v35 = vadd.f32 %v2717_v41, %v2716_v11  ;;  %v5728_v11 = vmax.f32 %v5727_v45, 0.0  ;;  %v5729_v41 = vld [vmem:[#allocation95_spill] sm:$0xff] }
 0x61d   :  { %v2719_v39 = vrot.slane %v2718_v35, 2 }
 0x61f   :  { %v2720_v37 = vadd.f32 %v2719_v39, %v2718_v35 }
 0x621   :  { %v2721_v60 = vrot.slane %v2720_v37, 1 }
 0x623   :  { %v2722_v6 = vadd.f32 %v2721_v60, %v2720_v37  ;;  %v5733_v37 = vld [vmem:[#allocation76_spill] sm:$0xff] }
 0x625   :  { %v2723_v1 = vmul.f32 0.015625, %v2722_v6 }
 0x627   :  { %v2724_v53 = vmul.f32 %v2723_v1, %v2651_v62  ;;  %v5737_v1 = vld [vmem:[#allocation91_spill] sm:$0xff] }
 0x629   :  { %v2725_v21 = vsel %vm1692_vm4, %v2724_v53, 0.0 }
 0x62a   :  { %2726 = vadd.xlane.f32.xlu1 %v2725_v21  ;;  %v5739_v21 = vld [vmem:[#allocation39_spill] sm:$0xff] }
 0x69c   :  { %v2678_v5 = vpop.xlane.xlu0 %2677 }
 0x69d   :  { %v2679_v50 = vmax.f32 %v2678_v5, 0.0 }
 0x69f   :  { %v2680_v23 = vmul.f32 %v2679_v50, %v2652_v15 }
 0x6a1   :  { %v2681_v46 = vsel %vm1692_vm4, %v2680_v23, 0.0 }
 0x6a2   :  { %v2682_v32 = vrot.slane %v2681_v46, 4 }
 0x6a4   :  { %v2683_v42 = vadd.f32 %v2682_v32, %v2681_v46 }
 0x6a6   :  { %v2684_v59 = vrot.slane %v2683_v42, 2 }
 0x6a8   :  { %v2685_v38 = vadd.f32 %v2684_v59, %v2683_v42 }
 0x6aa   :  { %v2686_v63 = vrot.slane %v2685_v38, 1 }
 0x6ac   :  { %v2687_v56 = vadd.f32 %v2686_v63, %v2685_v38 }
 0x6ae   :  { %v2854_v52 = vmul.f32 -1.442695, %v2687_v56 }
 0x6b0   :  { %3052 = vpow2.f32 %v2854_v52 }
 0x6b3   :  { %v2727_v47 = vpop.xlane.xlu1 %2726 }
 0x6b4   :  { %v2728_v27 = vmax.f32 %v2727_v47, 0.0 }
 0x6b6   :  { %v2729_v3 = vmul.f32 %v2728_v27, %v2652_v15  ;;  %v5740_v15 = vmax.f32 %v5739_v21, 0.0 }
 0x6b8   :  { %v2730_v30 = vsel %vm1692_vm4, %v2729_v3, 0.0 }
 0x6b9   :  { %v2731_v20 = vrot.slane %v2730_v30, 4 }
 0x6bb   :  { %v2732_v58 = vadd.f32 %v2731_v20, %v2730_v30 }
 0x6bd   :  { %v3053_v26 = vpop.eup %3052  ;;  %v2733_v14 = vrot.slane %v2732_v58, 2 }
 0x6be   :  { %v2691_v54 = vadd.f32 1.0, %v3053_v26 }
 0x6bf   :  { %v2734_v34 = vadd.f32 %v2733_v14, %v2732_v58 }
 0x6c0   :  { %3054 = vrcp.f32 %v2691_v54 }
 0x6c1   :  { %v2735_v62 = vrot.slane %v2734_v34, 1 }
 0x6c3   :  { %v2736_v24 = vadd.f32 %v2735_v62, %v2734_v34  ;;  %v5741_v34 = vld [vmem:[#allocation78_spill] sm:$0xff] }
 0x6c4   :  { %v5742_v62 = vmax.f32 %v5741_v34, 0.0 }
 0x6c5   :  { %v2855_v33 = vmul.f32 -1.442695, %v2736_v24 }
 0x6c7   :  { %3056 = vpow2.f32 %v2855_v33  ;;  %v5743_v33 = vld [vmem:[#allocation31_spill] sm:$0xff] }
 0x6cd   :  { %v3055_v13 = vpop.eup %3054 }
 0x6ce   :  { %v2694_v49 = vmul.f32 %v3055_v13, %v5137_v17  ;;  %v2695_v10 = vmul.f32 %v3055_v13, %v5135_v19  ;;  %v2696_v25 = vmul.f32 %v3055_v13, %v5141_v40  ;;  %v2697_v22 = vmul.f32 %v3055_v13, %v5147_v18  ;;  %v5731_v40 = vld [vmem:[#allocation94_spill] sm:$0xff] }
 0x6cf   :  { %v2698_v31 = vmul.f32 %v3055_v13, %v5149_v57  ;;  %v2699_v51 = vmul.f32 %v3055_v13, %v5157_v4  ;;  %v2700_v48 = vmul.f32 %v3055_v13, %v5155_v16  ;;  %v2701_v61 = vmul.f32 %v3055_v13, %v5159_v29  ;;  %v5735_v4 = vld [vmem:[#allocation79_spill] sm:$0xff] }
 0x6d0   :  { %v2751_v12 = vadd.f32 %v2694_v49, %v5726_v7  ;;  %v2752_v17 = vadd.f32 %v2695_v10, %v5728_v11  ;;  %v5730_v19 = vmax.f32 %v5729_v41, 0.0  ;;  %v5732_v39 = vmax.f32 %v5731_v40, 0.0  ;;  %v5745_v49 = vld [vmem:[#allocation99_spill] sm:$0xff] }
 0x6d1   :  { %v5734_v57 = vmax.f32 %v5733_v37, 0.0  ;;  %v5736_v6 = vmax.f32 %v5735_v4, 0.0  ;;  %v5738_v29 = vmax.f32 %v5737_v1, 0.0  ;;  %v2758_v5 = vadd.f32 %v2701_v61, %v5740_v15 }
 0x6d2   :  { %v2753_v35 = vadd.f32 %v2696_v25, %v5730_v19  ;;  %v2754_v18 = vadd.f32 %v2697_v22, %v5732_v39  ;;  %v2767_v50 = vmax.f32 %v2751_v12, 0.0  ;;  %v2768_v23 = vmax.f32 %v2752_v17, 0.0  ;;  %v5749_v22 = vld [vmem:[#allocation75_spill] sm:$0xff] }
 0x6d3   :  { %v2755_v60 = vadd.f32 %v2698_v31, %v5734_v57  ;;  %v2756_v16 = vadd.f32 %v2699_v51, %v5736_v6  ;;  %v2757_v53 = vadd.f32 %v2700_v48, %v5738_v29  ;;  %v2774_v63 = vmax.f32 %v2758_v5, 0.0  ;;  %v5753_v48 = vld [vmem:[#allocation85_spill] sm:$0xff] }
 0x6d4   :  { %v2769_v46 = vmax.f32 %v2753_v35, 0.0  ;;  %v2770_v32 = vmax.f32 %v2754_v18, 0.0  ;;  %2783 = vst.msk [vmem:[%s5319_s4] sm:$0xff] %vm1667_vm3, %v2767_v50  ;;  %2784 = vst.msk [vmem:[%s5319_s4 + $0x8] sm:$0xff] %vm1667_vm3, %v2768_v23  ;;  %v3057_v56 = vpop.eup %3056  ;;  %v5744_v13 = vmax.f32 %v5743_v33, 0.0  ;;  %v5756_v7 = vmax.f32 %v5755_v44, 0.0 }
 0x6d5   :  { %v2771_v42 = vmax.f32 %v2755_v60, 0.0  ;;  %v2772_v59 = vmax.f32 %v2756_v16, 0.0  ;;  %v2773_v38 = vmax.f32 %v2757_v53, 0.0  ;;  %2790 = vst.msk [vmem:[%s5319_s4 + $0x38] sm:$0xff] %vm1667_vm3, %v2774_v63  ;;  %v2740_v52 = vadd.f32 1.0, %v3057_v56 }
 0x6d6   :  { %2785 = vst.msk [vmem:[%s5319_s4 + $0x10] sm:$0xff] %vm1667_vm3, %v2769_v46  ;;  %2786 = vst.msk [vmem:[%s5319_s4 + $0x18] sm:$0xff] %vm1667_vm3, %v2770_v32 }
 0x6d7   :  { %2787 = vst.msk [vmem:[%s5319_s4 + $0x20] sm:$0xff] %vm1667_vm3, %v2771_v42  ;;  %2788 = vst.msk [vmem:[%s5319_s4 + $0x28] sm:$0xff] %vm1667_vm3, %v2772_v59  ;;  %3058 = vrcp.f32 %v2740_v52 }
 0x6d8   :  { %2789 = vst.msk [vmem:[%s5319_s4 + $0x30] sm:$0xff] %vm1667_vm3, %v2773_v38 }
 0x6e4   :  { %v3059_v47 = vpop.eup %3058 }
 0x6e5   :  { %v2743_v27 = vmul.f32 %v3059_v47, %v5167_v8  ;;  %v2744_v3 = vmul.f32 %v3059_v47, %v5171_v36  ;;  %v2745_v30 = vmul.f32 %v3059_v47, %v5169_v28  ;;  %v2746_v20 = vmul.f32 %v3059_v47, %v5175_v9  ;;  %v5747_v28 = vld [vmem:[#allocation93_spill] sm:$0xff] }
 0x6e6   :  { %v2747_v58 = vmul.f32 %v3059_v47, %v5181_v0  ;;  %v2748_v26 = vmul.f32 %v3059_v47, %v5189_v2  ;;  %v2749_v54 = vmul.f32 %v3059_v47, %v5185_v55  ;;  %v2750_v14 = vmul.f32 %v3059_v47, %v5192_v43  ;;  %v5751_v2 = vld [vmem:[#allocation41_spill] sm:$0xff] }
 0x6e7   :  { %v2759_v24 = vadd.f32 %v2743_v27, %v5742_v62  ;;  %v2760_v8 = vadd.f32 %v2744_v3, %v5744_v13  ;;  %v5746_v36 = vmax.f32 %v5745_v49, 0.0  ;;  %v5748_v25 = vmax.f32 %v5747_v28, 0.0 }
 0x6e8   :  { %v5750_v0 = vmax.f32 %v5749_v22, 0.0  ;;  %v5752_v51 = vmax.f32 %v5751_v2, 0.0  ;;  %v5754_v43 = vmax.f32 %v5753_v48, 0.0  ;;  %v2766_v12 = vadd.f32 %v2750_v14, %v5756_v7 }
 0x6e9   :  { %v2761_v10 = vadd.f32 %v2745_v30, %v5746_v36  ;;  %v2762_v9 = vadd.f32 %v2746_v20, %v5748_v25  ;;  %v2775_v45 = vmax.f32 %v2759_v24, 0.0  ;;  %v2776_v11 = vmax.f32 %v2760_v8, 0.0 }
 0x6ea   :  { %v2763_v31 = vadd.f32 %v2747_v58, %v5750_v0  ;;  %v2764_v55 = vadd.f32 %v2748_v26, %v5752_v51  ;;  %v2765_v61 = vadd.f32 %v2749_v54, %v5754_v43  ;;  %v2782_v39 = vmax.f32 %v2766_v12, 0.0 }
 0x6eb   :  { %v2777_v17 = vmax.f32 %v2761_v10, 0.0  ;;  %v2778_v41 = vmax.f32 %v2762_v9, 0.0  ;;  %2791 = vst.msk [vmem:[%s5319_s4 + $0x40] sm:$0xff] %vm1667_vm3, %v2775_v45  ;;  %2792 = vst.msk [vmem:[%s5319_s4 + $0x48] sm:$0xff] %vm1667_vm3, %v2776_v11 }
 0x6ec   :  { %v2779_v19 = vmax.f32 %v2763_v31, 0.0  ;;  %v2780_v35 = vmax.f32 %v2764_v55, 0.0  ;;  %v2781_v40 = vmax.f32 %v2765_v61, 0.0  ;;  %2798 = vst.msk [vmem:[%s5319_s4 + $0x78] sm:$0xff] %vm1667_vm3, %v2782_v39 }
 0x6ed   :  { %2793 = vst.msk [vmem:[%s5319_s4 + $0x50] sm:$0xff] %vm1667_vm3, %v2777_v17  ;;  %2794 = vst.msk [vmem:[%s5319_s4 + $0x58] sm:$0xff] %vm1667_vm3, %v2778_v41 }
 0x6ee   :  { %2795 = vst.msk [vmem:[%s5319_s4 + $0x60] sm:$0xff] %vm1667_vm3, %v2779_v19  ;;  %2796 = vst.msk [vmem:[%s5319_s4 + $0x68] sm:$0xff] %vm1667_vm3, %v2780_v35 }
 0x6ef   :  { %2797 = vst.msk [vmem:[%s5319_s4 + $0x70] sm:$0xff] %vm1667_vm3, %v2781_v40 }
 0x6f0   :  { %2803 = vsyncpa [#allocation3], 1 }
 0x6f1   :  { %2804 = vsyncpa [#allocation5], 1 }
 0x6f2   :  { %2805 = vsyncpa [#allocation8], 1 }

</bundles_post_ra>
